<compile_context>
chip_gen: v6e
topology: v6e:2x2x1
jax: 0.10.0
libtpu: 0.0.40
codegen_flags: <defaults>
</compile_context>

<pallas_src>
import jax
import jax.numpy as jnp
from jax.experimental import pallas as pl
from jax.experimental.pallas import tpu as pltpu

# Config matching LEEmbedder(num_features=4, activation='leaky', num_gnn_hidden=20,
#                            num_hidden=10, num_layers=2, backbone='GIN')
NUM_FEATURES = 4
NUM_GNN_HIDDEN = 20
NUM_HIDDEN = 10
NEG_SLOPE = 0.01        # torch.nn.LeakyReLU default negative_slope
OUT_PAD = 128           # lane-dense padded output width (sliced back to NUM_HIDDEN)


def _leaky(x, slope=NEG_SLOPE):
    return jnp.where(x > 0, x, slope * x)


def _double_leaky(x, slope=NEG_SLOPE):
    # LeakyReLU(LeakyReLU(x)) == where(x > 0, x, slope**2 * x): one select instead of two.
    return jnp.where(x > 0, x, (slope * slope) * x)


def le_embedder_kernel(x_ref, adj_ref, mask_ref, inv_cnt_ref,
                       w1_ref, b1_ref, w2_ref, b2_ref, wp_ref, bp_ref,
                       out_ref):
    cn = x_ref.shape[0]        # nodes per chunk (C*N)
    cg = mask_ref.shape[0]     # graphs per chunk (C*G)
    npg = cn // cg             # nodes per graph (equal-sized graphs)

    h = x_ref[...]                                       # [CN, F]
    adj = adj_ref[...]                                   # [CN, CN] block-diag union graph

    # ---- GIN layer 1: nn1((1 + eps) * x + sum_neighbors x), eps = 0 ----
    agg = h + jnp.dot(adj, h, preferred_element_type=jnp.float32)
    h = _double_leaky(
        jnp.dot(agg, w1_ref[...], preferred_element_type=jnp.float32) + b1_ref[...])
    # TODO(synk): nn Dropout(0.1) is identity in eval mode; training-mode dropout omitted.

    # ---- GIN layer 2 ----
    agg = h + jnp.dot(adj, h, preferred_element_type=jnp.float32)
    h = _double_leaky(
        jnp.dot(agg, w2_ref[...], preferred_element_type=jnp.float32) + b2_ref[...])

    # ---- global pooling ----
    mask = mask_ref[...]                                            # [CG, CN] one-hot
    sums = jnp.dot(mask, h, preferred_element_type=jnp.float32)     # global_add_pool
    means = sums * inv_cnt_ref[...]                                 # global_mean_pool

    # global_max_pool: position-major node layout means rows [p*CG:(p+1)*CG] hold node
    # position p of every graph -> contiguous sublane-aligned slices, npg-1 vector maxes.
    maxs = h[0:cg, :]
    for p in range(1, npg):
        maxs = jnp.maximum(maxs, h[p * cg:(p + 1) * cg, :])

    # ---- proj over cat([mean, sum, max], -1); wp_ref stacks the three row blocks ----
    out = (jnp.dot(means, wp_ref[0], preferred_element_type=jnp.float32)
           + jnp.dot(sums, wp_ref[1], preferred_element_type=jnp.float32)
           + jnp.dot(maxs, wp_ref[2], preferred_element_type=jnp.float32)
           + bp_ref[...])
    out_ref[...] = _leaky(out)                                      # [CG, 128] lane-dense store


def _vmem_limit_bytes(CN, CG, F, Hg, OP):
    f32 = 4
    per_step = f32 * (CN * F + CN * CN + CG * CN + CG + CG * OP)     # per-chunk windows
    weights = f32 * (F * Hg + Hg + Hg * Hg + Hg + 3 * Hg * OP + OP)  # resident params
    need = 2 * (per_step + weights) + (8 << 20)                      # 2 buffers each + headroom
    return int(min(48 << 20, max(16 << 20, need)))


def le_embedder_forward(x, adj, mask, params, *, rows_target=128):
    """x [B,N,F]; adj [B,N,N] with adj[i,j]=1 iff edge j->i; mask [B,G,N] one-hot graph
    assignment.  Nodes of each instance must be grouped by graph with equal graph sizes
    (N % G == 0).  Returns [B, G, num_hidden]."""
    B, N, F = x.shape
    G = mask.shape[1]
    Hg = params["w1"].shape[1]
    H = params["wp"].shape[1]
    OP = OUT_PAD
    assert N % G == 0, "equal-sized, contiguously grouped graphs expected"
    npg = N // G
    # TODO(synk): ragged graph sizes need a gid-masked max path instead of this layout.

    # Instances per grid step: fill ~rows_target MXU rows (128 = one v5e tile; use 256 on
    # v6e/v7x for large B, keeping >=2 grid steps on v7x so both TensorCores get work).
    C = max(1, min(B, rows_target // max(N, 1)))
    S = -(-B // C)
    B_pad = S * C
    CN, CG = C * N, C * G

    if B_pad != B:
        pad = ((0, B_pad - B), (0, 0), (0, 0))
        x, adj, mask = jnp.pad(x, pad), jnp.pad(adj, pad), jnp.pad(mask, pad)

    # Position-major node layout inside a chunk: instance c, node i (graph g=i//npg,
    # position p=i%npg) -> chunk row p*CG + (c*G + g).  The union adjacency stays
    # block-diagonal under this permutation (no cross-instance edges), and "node p of
    # every graph" becomes a contiguous row slice for the in-kernel max pool.
    c_ix = jnp.arange(C)
    i_ix = jnp.arange(N)
    g_of = i_ix // npg
    p_of = i_ix % npg
    new_row = p_of[None, :] * CG + (c_ix[:, None] * G + g_of[None, :])          # [C, N]
    grow = c_ix[:, None] * G + jnp.arange(G)[None, :]                            # [C, G]

    x_r = x.reshape(S, C, N, F)
    adj_r = adj.reshape(S, C, N, N)
    mask_r = mask.reshape(S, C, G, N)

    x_bd = jnp.zeros((S, CN, F), x.dtype).at[:, new_row, :].set(x_r)
    adj_bd = jnp.zeros((S, CN, CN), adj.dtype).at[
        :, new_row[:, :, None], new_row[:, None, :]].set(adj_r)
    mask_bd = jnp.zeros((S, CG, CN), mask.dtype).at[
        :, grow[:, :, None], new_row[:, None, :]].set(mask_r)

    counts = mask_r.sum(axis=-1).reshape(S, CG, 1)
    inv_cnt = jnp.where(counts > 0, 1.0 / jnp.maximum(counts, 1.0), 0.0)  # empty graph -> 0

    # Proj weight: pad out-dim to 128 lanes, stack [mean, sum, max] row blocks on a leading
    # axis (indexed in-kernel) -> no misaligned in-kernel slices, one resident operand.
    wp_pad = jnp.pad(params["wp"], ((0, 0), (0, OP - H)))
    wp_stack = wp_pad.reshape(3, Hg, OP)
    bp_pad = jnp.pad(params["bp"], ((0, 0), (0, OP - H)))

    def inst(shape):    # per-chunk operand: leading (squeezed) axis walks the grid
        return pl.BlockSpec((None,) + tuple(shape), lambda s: (s,) + (0,) * len(shape))

    def shared(shape):  # weights: same full-array block every step (stays resident)
        return pl.BlockSpec(tuple(shape), lambda s: (0,) * len(shape))

    out_bd = pl.pallas_call(
        le_embedder_kernel,
        out_shape=jax.ShapeDtypeStruct((S, CG, OP), jnp.float32),
        grid=(S,),
        in_specs=[
            inst((CN, F)),        # x (block-diag chunk, position-major rows)
            inst((CN, CN)),       # adj (block-diag chunk)
            inst((CG, CN)),       # one-hot graph mask (sum/mean pool matmul)
            inst((CG, 1)),        # 1 / nodes-per-graph
            shared((F, Hg)),      # w1
            shared((1, Hg)),      # b1
            shared((Hg, Hg)),     # w2
            shared((1, Hg)),      # b2
            shared((3, Hg, OP)),  # wp: [mean, sum, max] blocks, lane-padded
            shared((1, OP)),      # bp, lane-padded
        ],
        out_specs=inst((CG, OP)),
        compiler_params=pltpu.CompilerParams(
            dimension_semantics=("parallel",),    # shard chunks across TCs (v7x)
            vmem_limit_bytes=_vmem_limit_bytes(CN, CG, F, Hg, OP),
        ),
    )(x_bd, adj_bd, mask_bd, inv_cnt,
      params["w1"], params["b1"], params["w2"], params["b2"], wp_stack, bp_pad)
    # TODO(synk): for large N, row-tile adj with a (tm, CN) grid axis (accumulating the
    #             aggregation) and cast adj/mask/h to bf16 for the O(N^2) matmuls
    #             (f32 accumulation); re-derive the VMEM limit from the tiled block sizes.

    return out_bd.reshape(B_pad, G, OP)[:B, :, :H]                   # [B, G, num_hidden]


def init_params(key):
    # Deterministic init mimicking torch.nn.Linear defaults: U(-1/sqrt(fan_in), 1/sqrt(fan_in)).
    def linear(k, fan_in, fan_out):
        kw, kb = jax.random.split(k)
        bound = 1.0 / float(fan_in) ** 0.5
        w = jax.random.uniform(kw, (fan_in, fan_out), jnp.float32, -bound, bound)
        b = jax.random.uniform(kb, (1, fan_out), jnp.float32, -bound, bound)
        return w, b

    k1, k2, k3 = jax.random.split(key, 3)
    w1, b1 = linear(k1, NUM_FEATURES, NUM_GNN_HIDDEN)      # GIN layer-1 MLP Linear
    w2, b2 = linear(k2, NUM_GNN_HIDDEN, NUM_GNN_HIDDEN)    # GIN layer-2 MLP Linear
    wp, bp = linear(k3, 3 * NUM_GNN_HIDDEN, NUM_HIDDEN)    # self.proj
    return dict(w1=w1, b1=b1, w2=w2, b2=b2, wp=wp, bp=bp)


def le_embedder_reference(x, adj, mask, params):
    """Pure-JAX reference of the same forward pass (correctness check)."""
    def leaky(v, s=NEG_SLOPE):
        return jnp.where(v > 0, v, s * v)

    def one(xb, adjb, mb):
        h = xb
        for w, b in ((params["w1"], params["b1"]), (params["w2"], params["b2"])):
            h = leaky(leaky((h + adjb @ h) @ w + b))
        cnt = mb.sum(axis=-1, keepdims=True)
        sums = mb @ h
        means = sums / jnp.maximum(cnt, 1.0)
        maxs = jnp.max(jnp.where(mb[:, :, None] > 0, h[None, :, :], -1e30), axis=1)
        pooled = jnp.concatenate([means, sums, maxs], axis=-1)
        return leaky(pooled @ params["wp"] + params["bp"])

    return jax.vmap(one)(x, adj, mask)


if __name__ == "__main__":
    # Keep the reference's XLA f32 matmuls at full precision so it matches the kernel closely.
    jax.config.update("jax_default_matmul_precision", "highest")

    key = jax.random.PRNGKey(0)
    kx, kp = jax.random.split(key)

    # B independent "local explanation" instances; each holds two 4-node ring graphs,
    # nodes grouped by graph.  C=16 instances/chunk -> 128-row block-diag adj, 2 grid steps.
    B, N, G = 32, 8, 2
    x = jax.random.normal(kx, (B, N, NUM_FEATURES), jnp.float32)

    # edge_index [2, E] for one instance: two 4-node rings, edges in both directions.
    src = jnp.array([0, 1, 1, 2, 2, 3, 3, 0, 4, 5, 5, 6, 6, 7, 7, 4], dtype=jnp.int32)
    dst = jnp.array([1, 0, 2, 1, 3, 2, 0, 3, 5, 4, 6, 5, 7, 6, 4, 7], dtype=jnp.int32)
    batch = jnp.array([0, 0, 0, 0, 1, 1, 1, 1], dtype=jnp.int32)     # node -> graph id

    # Glue: densify the graph structure outside the kernel and replicate across instances.
    adj1 = jnp.zeros((N, N), jnp.float32).at[dst, src].set(1.0)      # adj[i, j]=1 iff edge j->i
    mask1 = (batch[None, :] == jnp.arange(G)[:, None]).astype(jnp.float32)    # [G, N]
    adj = jnp.tile(adj1[None], (B, 1, 1))                            # [B, N, N]
    mask = jnp.tile(mask1[None], (B, 1, 1))                          # [B, G, N]

    params = init_params(kp)

    fwd = jax.jit(le_embedder_forward)
    out = fwd(x, adj, mask, params)
    jax.block_until_ready(out)

    assert out.shape == (B, G, NUM_HIDDEN) and out.dtype == jnp.float32
    ref = le_embedder_reference(x, adj, mask, params)
    assert jnp.allclose(out, ref, atol=2e-3, rtol=2e-3), float(jnp.max(jnp.abs(out - ref)))
    print("KERNEL_OK")
</pallas_src>

<mosaic_0001>
module attributes {stable_mosaic.version = 11 : i64} {
  func.func @le_embedder_kernel(%arg0: i32, %arg1: memref<1x128x4xf32, #tpu.memory_space<vmem>>, %arg2: memref<1x128x128xf32, #tpu.memory_space<vmem>>, %arg3: memref<1x32x128xf32, #tpu.memory_space<vmem>>, %arg4: memref<1x32x1xf32, #tpu.memory_space<vmem>>, %arg5: memref<4x20xf32, #tpu.memory_space<vmem>>, %arg6: memref<1x20xf32, #tpu.memory_space<vmem>>, %arg7: memref<20x20xf32, #tpu.memory_space<vmem>>, %arg8: memref<1x20xf32, #tpu.memory_space<vmem>>, %arg9: memref<3x20x128xf32, #tpu.memory_space<vmem>>, %arg10: memref<1x128xf32, #tpu.memory_space<vmem>>, %arg11: memref<1x32x128xf32, #tpu.memory_space<vmem>>) attributes {dimension_semantics = [#tpu.dimension_semantics<parallel>], iteration_bounds = array<i64: 2>, scalar_prefetch = 0 : i64, scratch_operands = 0 : i64, tpu.core_type = #tpu.core_type<tc>, window_params = [{transform_indices = @transform_0, window_bounds = array<i64: 1, 128, 4>}, {transform_indices = @transform_1, window_bounds = array<i64: 1, 128, 128>}, {transform_indices = @transform_2, window_bounds = array<i64: 1, 32, 128>}, {transform_indices = @transform_3, window_bounds = array<i64: 1, 32, 1>}, {pipeline_mode = #tpu.pipeline_mode<synchronous>, transform_indices = @transform_4, window_bounds = array<i64: 4, 20>}, {pipeline_mode = #tpu.pipeline_mode<synchronous>, transform_indices = @transform_5, window_bounds = array<i64: 1, 20>}, {pipeline_mode = #tpu.pipeline_mode<synchronous>, transform_indices = @transform_6, window_bounds = array<i64: 20, 20>}, {pipeline_mode = #tpu.pipeline_mode<synchronous>, transform_indices = @transform_7, window_bounds = array<i64: 1, 20>}, {pipeline_mode = #tpu.pipeline_mode<synchronous>, transform_indices = @transform_8, window_bounds = array<i64: 3, 20, 128>}, {pipeline_mode = #tpu.pipeline_mode<synchronous>, transform_indices = @transform_9, window_bounds = array<i64: 1, 128>}, {transform_indices = @transform_10, window_bounds = array<i64: 1, 32, 128>}]} {
    %c0 = arith.constant 0 : index
    %c0_0 = arith.constant 0 : index
    %c0_1 = arith.constant 0 : index
    %0 = vector.load %arg1[%c0, %c0_0, %c0_1] : memref<1x128x4xf32, #tpu.memory_space<vmem>>, vector<1x128x4xf32>
    %1 = vector.shape_cast %0 : vector<1x128x4xf32> to vector<128x4xf32>
    %c0_2 = arith.constant 0 : index
    %c0_3 = arith.constant 0 : index
    %c0_4 = arith.constant 0 : index
    %2 = vector.load %arg2[%c0_2, %c0_3, %c0_4] : memref<1x128x128xf32, #tpu.memory_space<vmem>>, vector<1x128x128xf32>
    %3 = vector.shape_cast %2 : vector<1x128x128xf32> to vector<128x128xf32>
    %cst = arith.constant dense<0.000000e+00> : vector<128x4xf32>
    %4 = tpu.matmul %3, %1, %cst {dimension_numbers = #tpu.dot_dimension_numbers<[1], [0], [0], [1], [0, 0, 1, 1], [], []>, precision = #tpu.contract_precision<fp32>} : vector<128x128xf32>, vector<128x4xf32>, vector<128x4xf32> -> vector<128x4xf32>
    %5 = arith.addf %1, %4 : vector<128x4xf32>
    %c0_5 = arith.constant 0 : index
    %c0_6 = arith.constant 0 : index
    %6 = vector.load %arg5[%c0_5, %c0_6] : memref<4x20xf32, #tpu.memory_space<vmem>>, vector<4x20xf32>
    %cst_7 = arith.constant dense<0.000000e+00> : vector<128x20xf32>
    %7 = tpu.matmul %5, %6, %cst_7 {dimension_numbers = #tpu.dot_dimension_numbers<[1], [0], [0], [1], [0, 0, 1, 1], [], []>, precision = #tpu.contract_precision<fp32>} : vector<128x4xf32>, vector<4x20xf32>, vector<128x20xf32> -> vector<128x20xf32>
    %c0_8 = arith.constant 0 : index
    %c0_9 = arith.constant 0 : index
    %8 = vector.load %arg6[%c0_8, %c0_9] : memref<1x20xf32, #tpu.memory_space<vmem>>, vector<1x20xf32>
    %9 = vector.broadcast %8 : vector<1x20xf32> to vector<128x20xf32>
    %10 = arith.addf %7, %9 : vector<128x20xf32>
    %cst_10 = arith.constant 0.000000e+00 : f32
    %11 = vector.broadcast %cst_10 : f32 to vector<128x20xf32>
    %12 = arith.cmpf ogt, %10, %11 : vector<128x20xf32>
    %cst_11 = arith.constant 9.99999974E-5 : f32
    %13 = vector.broadcast %cst_11 : f32 to vector<128x20xf32>
    %14 = arith.mulf %13, %10 : vector<128x20xf32>
    %15 = arith.select %12, %10, %14 : vector<128x20xi1>, vector<128x20xf32>
    %cst_12 = arith.constant dense<0.000000e+00> : vector<128x20xf32>
    %16 = tpu.matmul %3, %15, %cst_12 {dimension_numbers = #tpu.dot_dimension_numbers<[1], [0], [0], [1], [0, 0, 1, 1], [], []>, precision = #tpu.contract_precision<fp32>} : vector<128x128xf32>, vector<128x20xf32>, vector<128x20xf32> -> vector<128x20xf32>
    %17 = arith.addf %15, %16 : vector<128x20xf32>
    %c0_13 = arith.constant 0 : index
    %c0_14 = arith.constant 0 : index
    %18 = vector.load %arg7[%c0_13, %c0_14] : memref<20x20xf32, #tpu.memory_space<vmem>>, vector<20x20xf32>
    %cst_15 = arith.constant dense<0.000000e+00> : vector<128x20xf32>
    %19 = tpu.matmul %17, %18, %cst_15 {dimension_numbers = #tpu.dot_dimension_numbers<[1], [0], [0], [1], [0, 0, 1, 1], [], []>, precision = #tpu.contract_precision<fp32>} : vector<128x20xf32>, vector<20x20xf32>, vector<128x20xf32> -> vector<128x20xf32>
    %c0_16 = arith.constant 0 : index
    %c0_17 = arith.constant 0 : index
    %20 = vector.load %arg8[%c0_16, %c0_17] : memref<1x20xf32, #tpu.memory_space<vmem>>, vector<1x20xf32>
    %21 = vector.broadcast %20 : vector<1x20xf32> to vector<128x20xf32>
    %22 = arith.addf %19, %21 : vector<128x20xf32>
    %cst_18 = arith.constant 0.000000e+00 : f32
    %23 = vector.broadcast %cst_18 : f32 to vector<128x20xf32>
    %24 = arith.cmpf ogt, %22, %23 : vector<128x20xf32>
    %cst_19 = arith.constant 9.99999974E-5 : f32
    %25 = vector.broadcast %cst_19 : f32 to vector<128x20xf32>
    %26 = arith.mulf %25, %22 : vector<128x20xf32>
    %27 = arith.select %24, %22, %26 : vector<128x20xi1>, vector<128x20xf32>
    %c0_20 = arith.constant 0 : index
    %c0_21 = arith.constant 0 : index
    %c0_22 = arith.constant 0 : index
    %28 = vector.load %arg3[%c0_20, %c0_21, %c0_22] : memref<1x32x128xf32, #tpu.memory_space<vmem>>, vector<1x32x128xf32>
    %29 = vector.shape_cast %28 : vector<1x32x128xf32> to vector<32x128xf32>
    %cst_23 = arith.constant dense<0.000000e+00> : vector<32x20xf32>
    %30 = tpu.matmul %29, %27, %cst_23 {dimension_numbers = #tpu.dot_dimension_numbers<[1], [0], [0], [1], [0, 0, 1, 1], [], []>, precision = #tpu.contract_precision<fp32>} : vector<32x128xf32>, vector<128x20xf32>, vector<32x20xf32> -> vector<32x20xf32>
    %c0_24 = arith.constant 0 : index
    %c0_25 = arith.constant 0 : index
    %c0_26 = arith.constant 0 : index
    %31 = vector.load %arg4[%c0_24, %c0_25, %c0_26] : memref<1x32x1xf32, #tpu.memory_space<vmem>>, vector<1x32x1xf32>
    %32 = vector.shape_cast %31 : vector<1x32x1xf32> to vector<32x1xf32>
    %33 = vector.broadcast %32 : vector<32x1xf32> to vector<32x20xf32>
    %34 = arith.mulf %30, %33 : vector<32x20xf32>
    %35 = vector.extract_strided_slice %27 {offsets = [0, 0], sizes = [32, 20], strides = [1, 1]} : vector<128x20xf32> to vector<32x20xf32>
    %36 = vector.extract_strided_slice %27 {offsets = [32, 0], sizes = [32, 20], strides = [1, 1]} : vector<128x20xf32> to vector<32x20xf32>
    %37 = arith.maximumf %35, %36 : vector<32x20xf32>
    %38 = vector.extract_strided_slice %27 {offsets = [64, 0], sizes = [32, 20], strides = [1, 1]} : vector<128x20xf32> to vector<32x20xf32>
    %39 = arith.maximumf %37, %38 : vector<32x20xf32>
    %40 = vector.extract_strided_slice %27 {offsets = [96, 0], sizes = [32, 20], strides = [1, 1]} : vector<128x20xf32> to vector<32x20xf32>
    %41 = arith.maximumf %39, %40 : vector<32x20xf32>
    %c0_27 = arith.constant 0 : index
    %c0_28 = arith.constant 0 : index
    %c0_29 = arith.constant 0 : index
    %42 = vector.load %arg9[%c0_27, %c0_28, %c0_29] : memref<3x20x128xf32, #tpu.memory_space<vmem>>, vector<1x20x128xf32>
    %43 = vector.shape_cast %42 : vector<1x20x128xf32> to vector<20x128xf32>
    %cst_30 = arith.constant dense<0.000000e+00> : vector<32x128xf32>
    %44 = tpu.matmul %34, %43, %cst_30 {dimension_numbers = #tpu.dot_dimension_numbers<[1], [0], [0], [1], [0, 0, 1, 1], [], []>, precision = #tpu.contract_precision<fp32>} : vector<32x20xf32>, vector<20x128xf32>, vector<32x128xf32> -> vector<32x128xf32>
    %c1 = arith.constant 1 : index
    %c0_31 = arith.constant 0 : index
    %c0_32 = arith.constant 0 : index
    %45 = vector.load %arg9[%c1, %c0_31, %c0_32] : memref<3x20x128xf32, #tpu.memory_space<vmem>>, vector<1x20x128xf32>
    %46 = vector.shape_cast %45 : vector<1x20x128xf32> to vector<20x128xf32>
    %cst_33 = arith.constant dense<0.000000e+00> : vector<32x128xf32>
    %47 = tpu.matmul %30, %46, %cst_33 {dimension_numbers = #tpu.dot_dimension_numbers<[1], [0], [0], [1], [0, 0, 1, 1], [], []>, precision = #tpu.contract_precision<fp32>} : vector<32x20xf32>, vector<20x128xf32>, vector<32x128xf32> -> vector<32x128xf32>
    %48 = arith.addf %44, %47 : vector<32x128xf32>
    %c2 = arith.constant 2 : index
    %c0_34 = arith.constant 0 : index
    %c0_35 = arith.constant 0 : index
    %49 = vector.load %arg9[%c2, %c0_34, %c0_35] : memref<3x20x128xf32, #tpu.memory_space<vmem>>, vector<1x20x128xf32>
    %50 = vector.shape_cast %49 : vector<1x20x128xf32> to vector<20x128xf32>
    %cst_36 = arith.constant dense<0.000000e+00> : vector<32x128xf32>
    %51 = tpu.matmul %41, %50, %cst_36 {dimension_numbers = #tpu.dot_dimension_numbers<[1], [0], [0], [1], [0, 0, 1, 1], [], []>, precision = #tpu.contract_precision<fp32>} : vector<32x20xf32>, vector<20x128xf32>, vector<32x128xf32> -> vector<32x128xf32>
    %52 = arith.addf %48, %51 : vector<32x128xf32>
    %c0_37 = arith.constant 0 : index
    %c0_38 = arith.constant 0 : index
    %53 = vector.load %arg10[%c0_37, %c0_38] : memref<1x128xf32, #tpu.memory_space<vmem>>, vector<1x128xf32>
    %54 = vector.broadcast %53 : vector<1x128xf32> to vector<32x128xf32>
    %55 = arith.addf %52, %54 : vector<32x128xf32>
    %cst_39 = arith.constant 0.000000e+00 : f32
    %56 = vector.broadcast %cst_39 : f32 to vector<32x128xf32>
    %57 = arith.cmpf ogt, %55, %56 : vector<32x128xf32>
    %cst_40 = arith.constant 0.00999999977 : f32
    %58 = vector.broadcast %cst_40 : f32 to vector<32x128xf32>
    %59 = arith.mulf %58, %55 : vector<32x128xf32>
    %60 = arith.select %57, %55, %59 : vector<32x128xi1>, vector<32x128xf32>
    %c0_41 = arith.constant 0 : index
    %c0_42 = arith.constant 0 : index
    %c0_43 = arith.constant 0 : index
    %61 = vector.load %arg11[%c0_41, %c0_42, %c0_43] : memref<1x32x128xf32, #tpu.memory_space<vmem>>, vector<1x32x128xf32>
    %62 = vector.shape_cast %61 : vector<1x32x128xf32> to vector<32x128xf32>
    %63 = vector.shape_cast %60 : vector<32x128xf32> to vector<1x32x128xf32>
    tpu.vector_store %arg11[%c0_41, %c0_42, %c0_43], %63 {strides = array<i32>} : memref<1x32x128xf32, #tpu.memory_space<vmem>>, vector<1x32x128xf32>,
    return
  }
  func.func @transform_0(%arg0: i32) -> (i32, i32, i32) {
    %c0_i32 = arith.constant 0 : i32
    %c0_i32_0 = arith.constant 0 : i32
    %c0_i32_1 = arith.constant 0 : i32
    return %arg0, %c0_i32, %c0_i32_0 : i32, i32, i32
  }
  func.func @transform_1(%arg0: i32) -> (i32, i32, i32) {
    %c0_i32 = arith.constant 0 : i32
    %c0_i32_0 = arith.constant 0 : i32
    %c0_i32_1 = arith.constant 0 : i32
    return %arg0, %c0_i32, %c0_i32_0 : i32, i32, i32
  }
  func.func @transform_2(%arg0: i32) -> (i32, i32, i32) {
    %c0_i32 = arith.constant 0 : i32
    %c0_i32_0 = arith.constant 0 : i32
    %c0_i32_1 = arith.constant 0 : i32
    return %arg0, %c0_i32, %c0_i32_0 : i32, i32, i32
  }
  func.func @transform_3(%arg0: i32) -> (i32, i32, i32) {
    %c0_i32 = arith.constant 0 : i32
    %c0_i32_0 = arith.constant 0 : i32
    %c0_i32_1 = arith.constant 0 : i32
    return %arg0, %c0_i32, %c0_i32_0 : i32, i32, i32
  }
  func.func @transform_4(%arg0: i32) -> (i32, i32) {
    %c0_i32 = arith.constant 0 : i32
    %c0_i32_0 = arith.constant 0 : i32
    %c0_i32_1 = arith.constant 0 : i32
    return %c0_i32, %c0_i32_0 : i32, i32
  }
  func.func @transform_5(%arg0: i32) -> (i32, i32) {
    %c0_i32 = arith.constant 0 : i32
    %c0_i32_0 = arith.constant 0 : i32
    %c0_i32_1 = arith.constant 0 : i32
    return %c0_i32, %c0_i32_0 : i32, i32
  }
  func.func @transform_6(%arg0: i32) -> (i32, i32) {
    %c0_i32 = arith.constant 0 : i32
    %c0_i32_0 = arith.constant 0 : i32
    %c0_i32_1 = arith.constant 0 : i32
    return %c0_i32, %c0_i32_0 : i32, i32
  }
  func.func @transform_7(%arg0: i32) -> (i32, i32) {
    %c0_i32 = arith.constant 0 : i32
    %c0_i32_0 = arith.constant 0 : i32
    %c0_i32_1 = arith.constant 0 : i32
    return %c0_i32, %c0_i32_0 : i32, i32
  }
  func.func @transform_8(%arg0: i32) -> (i32, i32, i32) {
    %c0_i32 = arith.constant 0 : i32
    %c0_i32_0 = arith.constant 0 : i32
    %c0_i32_1 = arith.constant 0 : i32
    %c0_i32_2 = arith.constant 0 : i32
    return %c0_i32, %c0_i32_0, %c0_i32_1 : i32, i32, i32
  }
  func.func @transform_9(%arg0: i32) -> (i32, i32) {
    %c0_i32 = arith.constant 0 : i32
    %c0_i32_0 = arith.constant 0 : i32
    %c0_i32_1 = arith.constant 0 : i32
    return %c0_i32, %c0_i32_0 : i32, i32
  }
  func.func @transform_10(%arg0: i32) -> (i32, i32, i32) {
    %c0_i32 = arith.constant 0 : i32
    %c0_i32_0 = arith.constant 0 : i32
    %c0_i32_1 = arith.constant 0 : i32
    return %arg0, %c0_i32, %c0_i32_0 : i32, i32, i32
  }
}

</mosaic_0001>

<bundles_post_ra>
// kernel: le_embedder_forward.1
= control target key start
LH: loop header
LB: loop body
LE: loop exit
PB: predicated region body
PF: predicated region fallthrough
CT: control target
= control target key end

     0   :  { %s10698_s13 = smov 0   ;;  %s13695_s0 = inlined_call_operand.vmem [shape: f32[2,128,4], index: 0, kind: input, shape index: {}]   ;;  %s13696_s1 = inlined_call_operand.vmem [shape: f32[2,128,128], index: 1, kind: input, shape index: {}]   ;;  %s13697_s2 = inlined_call_operand.vmem [shape: f32[2,32,128], index: 2, kind: input, shape index: {}]   ;;  %s13698_s3 = inlined_call_operand.vmem [shape: f32[2,32,1], index: 3, kind: input, shape index: {}]   ;;  %s13699_s4 = inlined_call_operand.vmem [shape: f32[4,20], index: 4, kind: input, shape index: {}]   ;;  %s13700_s5 = inlined_call_operand.vmem [shape: f32[1,20], index: 5, kind: input, shape index: {}]   ;;  %s13701_s6 = inlined_call_operand.vmem [shape: f32[20,20], index: 6, kind: input, shape index: {}]   ;;  %s13702_s7 = inlined_call_operand.vmem [shape: f32[1,20], index: 7, kind: input, shape index: {}]   ;;  %s13703_s8 = inlined_call_operand.vmem [shape: f32[3,20,128], index: 8, kind: input, shape index: {}]   ;;  %s13704_s9 = inlined_call_operand.vmem [shape: f32[1,128], index: 9, kind: input, shape index: {}]   ;;  %s13705_s10 = inlined_call_operand.vmem [shape: f32[2,32,128], index: 10, kind: output, shape index: {}]  }
   0x1 LB: > { %s8278_s14 = sadd.s32 4294967295, %s10640_s13   ;;  %p8282_p0 = scmp.ge.s32.totalorder %s10640_s13, 1  ;;  %s10640_s13 = sphi %s10698_s13, %s20_s13  }
   0x2   : > { %p342_p1 = scmp.lt.s32.totalorder %s10640_s13, 3 }
   0x4   : > { %p343_p2 = pnand %p8282_p0, %p342_p1 }
   0x6   : > { %346 = sbr.rel (%p343_p2) target bundleno = 1917 (0x77d), region = 60 }
   0xb   : > { %p395_p3 = scmp.lt.s32.totalorder %s8278_s14, 1  ;;  %vm1811_vm0 = vcmask 1043456   ;;  %vm1762_vm1 = vcmask 31744  }
   0xd   : > { %s14177_s14 = smov (!%p395_p3, %s8278_s14), 1 }
   0xe   : > { %s8304_s15 = sshll.u32 %s14177_s14, 7  ;;  %s12722_s16 = sshll.u32 %s14177_s14, 5 }
   0xf   : > { %s10714_s18 = scalar_lea.vmem %s13695_s0, %s8304_s15  ;;  %s10800_s21 = scalar_lea.vmem %s13696_s1, %s8304_s15 }
  0x10   : > { %v435_v0 = vld [vmem:[%s10714_s18 + $0x78] sm:$0xff]  ;;  %v434_v1 = vld [vmem:[%s10714_s18 + $0x70] sm:$0xff]  ;;  %v433_v2 = vld [vmem:[%s10714_s18 + $0x68] sm:$0xff]  ;;  %s12728_s19 = scalar_lea.vmem %s13697_s2, %s12722_s16  ;;  %s419_s26 = scalar_lea.vmem %s13705_s10, %s12722_s16 }
  0x11   : > { %v10719_v3 = vand.u32 4294901760, %v435_v0  ;;  %v10721_v4 = vand.u32 4294901760, %v434_v1  ;;  %v10723_v5 = vand.u32 4294901760, %v433_v2  ;;  %v432_v6 = vld [vmem:[%s10714_s18 + $0x60] sm:$0xff]  ;;  %v431_v7 = vld [vmem:[%s10714_s18 + $0x58] sm:$0xff]  ;;  %v430_v8 = vld [vmem:[%s10714_s18 + $0x50] sm:$0xff] }
  0x12   : > { %v10728_v9 = vand.u32 4294901760, %v432_v6  ;;  %v10730_v10 = vand.u32 4294901760, %v431_v7  ;;  %v10732_v11 = vand.u32 4294901760, %v430_v8  ;;  %v429_v12 = vld [vmem:[%s10714_s18 + $0x48] sm:$0xff]  ;;  %v428_v13 = vld [vmem:[%s10714_s18 + $0x40] sm:$0xff]  ;;  %v427_v18 = vld [vmem:[%s10714_s18 + $0x38] sm:$0xff] }
  0x13   : > { %9155 = vmatprep.subr.mxu0 %v10719_v3  ;;  %v10738_v14 = vsub.f32 %v435_v0, %v10719_v3  ;;  %v10741_v15 = vsub.f32 %v434_v1, %v10721_v4  ;;  %v10743_v16 = vand.u32 4294901760, %v429_v12  ;;  %v10746_v17 = vsub.f32 %v433_v2, %v10723_v5  ;;  %v426_v25 = vld [vmem:[%s10714_s18 + $0x30] sm:$0xff]  ;;  %v425_v35 = vld [vmem:[%s10714_s18 + $0x28] sm:$0xff]  ;;  %v424_v40 = vld [vmem:[%s10714_s18 + $0x20] sm:$0xff] }
  0x14   : > { %9156 = vmatpush3.msra.mxu0 %v10719_v3  ;;  %v10751_v19 = vsub.f32 %v432_v6, %v10728_v9  ;;  %v10754_v20 = vsub.f32 %v431_v7, %v10730_v10  ;;  %v10766_v24 = vand.u32 4294901760, %v428_v13  ;;  %v10773_v27 = vand.u32 4294901760, %v427_v18  ;;  %v436_v47 = vld [vmem:[%s10800_s21] sm:$0xff]  ;;  %v437_v49 = vld [vmem:[%s10800_s21 + $0x8] sm:$0xff]  ;;  %v423_v53 = vld [vmem:[%s10714_s18 + $0x18] sm:$0xff] }
  0x15   : > { %9157 = vmatprep.subr.mxu0 %v10721_v4  ;;  %v10758_v21 = vand.u32 4294901760, %v10738_v14  ;;  %v10761_v22 = vand.u32 4294901760, %v10741_v15  ;;  %v10764_v23 = vand.u32 4294901760, %v10746_v17  ;;  %v10779_v29 = vsub.f32 %v430_v8, %v10732_v11  ;;  %v422_v59 = vld [vmem:[%s10714_s18 + $0x10] sm:$0xff]  ;;  %v421_v6 = vld [vmem:[%s10714_s18 + $0x8] sm:$0xff] }
  0x16   : > { %9158 = vmatpush3.msra.mxu0 %v10721_v4  ;;  %v10771_v26 = vand.u32 4294901760, %v10751_v19  ;;  %v10776_v28 = vand.u32 4294901760, %v10754_v20  ;;  %v10789_v33 = vsub.f32 %v429_v12, %v10743_v16  ;;  %v10792_v34 = vand.u32 4294901760, %v426_v25  ;;  %v438_v63 = vld [vmem:[%s10800_s21 + $0x10] sm:$0xff] }
  0x17   : > { %13877 = vst [vmem:[#allocation2_spill] sm:$0xff] %v10761_v22  ;;  %13878 = vst [vmem:[#allocation3_spill] sm:$0xff] %v10764_v23  ;;  %9159 = vmatprep.subr.mxu0 %v10723_v5  ;;  %v697_v30 = vsub.f32 %v10738_v14, %v10758_v21  ;;  %v704_v31 = vsub.f32 %v10741_v15, %v10761_v22  ;;  %v711_v32 = vsub.f32 %v10746_v17, %v10764_v23 }
  0x18   : > { %13879 = vst [vmem:[#allocation4_spill] sm:$0xff] %v10771_v26  ;;  %13880 = vst [vmem:[#allocation5_spill] sm:$0xff] %v10776_v28  ;;  %9160 = vmatpush3.msra.mxu0 %v10723_v5  ;;  %v718_v38 = vsub.f32 %v10751_v19, %v10771_v26  ;;  %v10806_v39 = vand.u32 4294901760, %v10779_v29  ;;  %v10811_v41 = vand.u32 4294901760, %v10789_v33  ;;  %v10814_v42 = vsub.f32 %v428_v13, %v10766_v24 }
  0x19   : > { %9161 = vmatprep.subr.mxu0 %v10728_v9  ;;  %v698_v36 = vand.u32 4294901760, %v697_v30  ;;  %v705_v37 = vand.u32 4294901760, %v704_v31  ;;  %v712_v43 = vand.u32 4294901760, %v711_v32  ;;  %v725_v44 = vsub.f32 %v10754_v20, %v10776_v28  ;;  %v420_v31 = vld [vmem:[%s10714_s18] sm:$0xff] }
  0x1a   : > { %13881 = vst [vmem:[#allocation6_spill] sm:$0xff] %v10806_v39  ;;  %9162 = vmatpush3.msra.mxu0 %v10728_v9  ;;  %13882 = vst [vmem:[#allocation7_spill] sm:$0xff] %v10811_v41  ;;  %v10819_v45 = vand.u32 4294901760, %v425_v35  ;;  %v10822_v46 = vsub.f32 %v427_v18, %v10773_v27  ;;  %v10826_v48 = vand.u32 4294901760, %v424_v40  ;;  %v719_v50 = vand.u32 4294901760, %v718_v38  ;;  %v439_v18 = vld [vmem:[%s10800_s21 + $0x18] sm:$0xff] }
  0x1b   : > { %9163 = vmatprep.subr.mxu0 %v10730_v10  ;;  %9211 = vmatprep.subr.mxu1 %v698_v36  ;;  %v732_v51 = vsub.f32 %v10779_v29, %v10806_v39  ;;  %v10833_v52 = vand.u32 4294901760, %v10814_v42  ;;  %v10837_v54 = vsub.f32 %v426_v25, %v10792_v34  ;;  %v739_v55 = vsub.f32 %v10789_v33, %v10811_v41  ;;  %v442_v41 = vld [vmem:[%s10800_s21 + $0x30] sm:$0xff] }
  0x1c   : > { %9164 = vmatpush3.msra.mxu0 %v10730_v10  ;;  %9212 = vmatpush3.msra.mxu1 %v698_v36  ;;  %v10842_v56 = vand.u32 4294901760, %v436_v47  ;;  %v726_v57 = vand.u32 4294901760, %v725_v44  ;;  %v10846_v58 = vand.u32 4294901760, %v10822_v46  ;;  %v10850_v60 = vsub.f32 %v425_v35, %v10819_v45 }
  0x1d   : > { %9165 = vmatprep.subr.mxu0 %v10732_v11  ;;  %9213 = vmatprep.subr.mxu1 %v705_v37  ;;  %13883 = vst [vmem:[#allocation8_spill] sm:$0xff] %v10833_v52  ;;  %v10852_v61 = vand.u32 4294901760, %v437_v49  ;;  %v10855_v62 = vand.u32 4294901760, %v423_v53  ;;  %v733_v0 = vand.u32 4294901760, %v732_v51  ;;  %v746_v1 = vsub.f32 %v10814_v42, %v10833_v52 }
  0x1e   : > { %9166 = vmatpush3.msra.mxu0 %v10732_v11  ;;  %9214 = vmatpush3.msra.mxu1 %v705_v37  ;;  %13884 = vst [vmem:[#allocation9_spill] sm:$0xff] %v10842_v56  ;;  %13885 = vst [vmem:[#allocation10_spill] sm:$0xff] %v10846_v58  ;;  %v10862_v2 = vand.u32 4294901760, %v10837_v54  ;;  %v10866_v7 = vsub.f32 %v424_v40, %v10826_v48  ;;  %v740_v8 = vand.u32 4294901760, %v739_v55  ;;  %v10869_v12 = vand.u32 4294901760, %v422_v59 }
  0x1f   : > { %9167 = vmatprep.subr.mxu0 %v10743_v16  ;;  %9215 = vmatprep.subr.mxu1 %v712_v43  ;;  %13886 = vst [vmem:[#allocation11_spill] sm:$0xff] %v10852_v61  ;;  %v10872_v13 = vsub.f32 %v436_v47, %v10842_v56  ;;  %v753_v25 = vsub.f32 %v10822_v46, %v10846_v58  ;;  %v10879_v30 = vand.u32 4294901760, %v10850_v60  ;;  %v10885_v35 = vand.u32 4294901760, %v438_v63  ;;  %v440_v47 = vld [vmem:[%s10800_s21 + $0x20] sm:$0xff] }
  0x20   : > { %9168 = vmatpush3.msra.mxu0 %v10743_v16  ;;  %9216 = vmatpush3.msra.mxu1 %v712_v43  ;;  %13887 = vst [vmem:[#allocation12_spill] sm:$0xff] %v10862_v2  ;;  %v10883_v32 = vsub.f32 %v437_v49, %v10852_v61  ;;  %v10888_v36 = vand.u32 4294901760, %v421_v6  ;;  %v10891_v37 = vsub.f32 %v423_v53, %v10855_v62  ;;  %v747_v38 = vand.u32 4294901760, %v746_v1  ;;  %v441_v1 = vld [vmem:[%s10800_s21 + $0x28] sm:$0xff] }
  0x21   : > { %9169 = vmatprep.subr.mxu0 %v10766_v24  ;;  %9217 = vmatprep.subr.mxu1 %v719_v50  ;;  %13888 = vst [vmem:[#allocation13_spill] sm:$0xff] %v10872_v13  ;;  %13889 = vst [vmem:[#allocation14_spill] sm:$0xff] %v10879_v30  ;;  %v760_v40 = vsub.f32 %v10837_v54, %v10862_v2  ;;  %v10897_v43 = vand.u32 4294901760, %v10866_v7  ;;  %v10899_v44 = vand.u32 4294901760, %v439_v18  ;;  %v10903_v49 = vand.u32 4294901760, %v420_v31 }
  0x22   : > { %9170 = vmatpush3.msra.mxu0 %v10766_v24  ;;  %9218 = vmatpush3.msra.mxu1 %v719_v50  ;;  %13890 = vst [vmem:[#allocation15_spill] sm:$0xff] %v10883_v32  ;;  %13891 = vst [vmem:[#allocation16_spill] sm:$0xff] %v10885_v35  ;;  %v10906_v50 = vand.u32 4294901760, %v10872_v13  ;;  %v10909_v51 = vsub.f32 %v422_v59, %v10869_v12  ;;  %v754_v53 = vand.u32 4294901760, %v753_v25  ;;  %v10923_v59 = vand.u32 4294901760, %v10891_v37 }
  0x23   : > { %9171 = vmatprep.subr.mxu0 %v10773_v27  ;;  %9219 = vmatprep.subr.mxu1 %v726_v57  ;;  %13892 = vst [vmem:[#allocation17_spill] sm:$0xff] %v10888_v36  ;;  %13893 = vst [vmem:[#allocation18_spill] sm:$0xff] %v10897_v43  ;;  %v767_v55 = vsub.f32 %v10850_v60, %v10879_v30  ;;  %v10926_v2 = vsub.f32 %v421_v6, %v10888_v36  ;;  %v10928_v25 = vand.u32 4294901760, %v440_v47 }
  0x24   : > { %9172 = vmatpush3.msra.mxu0 %v10773_v27  ;;  %9220 = vmatpush3.msra.mxu1 %v726_v57  ;;  %13894 = vst [vmem:[#allocation19_spill] sm:$0xff] %v10899_v44  ;;  %13895 = vst [vmem:[#allocation20_spill] sm:$0xff] %v10906_v50  ;;  %v10915_v57 = vand.u32 4294901760, %v10883_v32  ;;  %v761_v30 = vand.u32 4294901760, %v760_v40  ;;  %v10934_v58 = vsub.f32 %v439_v18, %v10899_v44  ;;  %v10942_v52 = vand.u32 4294901760, %v441_v1 }
  0x25   : > { %9173 = vmatprep.subr.mxu0 %v10792_v34  ;;  %9221 = vmatprep.subr.mxu1 %v733_v0  ;;  %13898 = vst [vmem:[#allocation23_spill] sm:$0xff] %v10923_v59  ;;  %13899 = vst [vmem:[#allocation24_spill] sm:$0xff] %v10928_v25  ;;  %v536_v6 = vsub.f32 %v10872_v13, %v10906_v50  ;;  %v768_v40 = vand.u32 4294901760, %v767_v55  ;;  %v781_v39 = vsub.f32 %v10891_v37, %v10923_v59  ;;  %v443_v50 = vld [vmem:[%s10800_s21 + $0x38] sm:$0xff] }
  0x26   : > { %9174 = vmatpush3.msra.mxu0 %v10792_v34  ;;  %9222 = vmatpush3.msra.mxu1 %v733_v0  ;;  %13896 = vst [vmem:[#allocation21_spill] sm:$0xff] %v10915_v57  ;;  %v10918_v0 = vsub.f32 %v438_v63, %v10885_v35  ;;  %v774_v63 = vsub.f32 %v10866_v7, %v10897_v43  ;;  %13900 = vst [vmem:[#allocation25_spill] sm:$0xff] %v10934_v58  ;;  %v10958_v28 = vand.u32 4294901760, %v10926_v2 }
  0x27   : > { %9175 = vmatprep.subr.mxu0 %v10819_v45  ;;  %9223 = vmatprep.subr.mxu1 %v740_v8  ;;  %13902 = vst [vmem:[#allocation27_spill] sm:$0xff] %v10942_v52  ;;  %v546_v18 = vsub.f32 %v10883_v32, %v10915_v57  ;;  %v10961_v55 = vsub.f32 %v440_v47, %v10928_v25  ;;  %v10976_v47 = vand.u32 4294901760, %v442_v41  ;;  %v10992_v22 = vand.u32 4294901760, %v443_v50 }
  0x28   : > { %13897 = vst [vmem:[#allocation22_spill] sm:$0xff] %v10918_v0  ;;  %9176 = vmatpush3.msra.mxu0 %v10819_v45  ;;  %9224 = vmatpush3.msra.mxu1 %v740_v8  ;;  %v10940_v8 = vand.u32 4294901760, %v10909_v51  ;;  %v10948_v43 = vand.u32 4294901760, %v10918_v0  ;;  %13904 = vst [vmem:[#allocation29_spill] sm:$0xff] %v10958_v28  ;;  %v775_v57 = vand.u32 4294901760, %v774_v63  ;;  %v10974_v26 = vsub.f32 %v441_v1, %v10942_v52 }
  0x29   : > { %9177 = vmatprep.subr.mxu0 %v10826_v48  ;;  %9225 = vmatprep.subr.mxu1 %v747_v38  ;;  %13905 = vst [vmem:[#allocation30_spill] sm:$0xff] %v10961_v55  ;;  %13909 = vst [vmem:[#allocation34_spill] sm:$0xff] %v10976_v47  ;;  %v10979_v63 = vand.u32 4294901760, %v546_v18  ;;  %v795_v1 = vsub.f32 %v10926_v2, %v10958_v28  ;;  %v11004_v28 = vsub.f32 %v442_v41, %v10976_v47 }
  0x2a   : > { %9178 = vmatpush3.msra.mxu0 %v10826_v48  ;;  %9226 = vmatpush3.msra.mxu1 %v747_v38  ;;  %13901 = vst [vmem:[#allocation26_spill] sm:$0xff] %v10940_v8  ;;  %13903 = vst [vmem:[#allocation28_spill] sm:$0xff] %v10948_v43  ;;  %v10951_v38 = vsub.f32 %v420_v31, %v10903_v49  ;;  %v10965_v31 = vand.u32 4294901760, %v10934_v58  ;;  %v788_v59 = vsub.f32 %v10909_v51, %v10940_v8 }
  0x2b   : > { %9179 = vmatprep.subr.mxu0 %v10855_v62  ;;  %9227 = vmatprep.subr.mxu1 %v754_v53  ;;  %13908 = vst [vmem:[#allocation33_spill] sm:$0xff] %v10974_v26  ;;  %13910 = vst [vmem:[#allocation35_spill] sm:$0xff] %v10979_v63  ;;  %v556_v23 = vsub.f32 %v10918_v0, %v10948_v43  ;;  %v10990_v8 = vand.u32 4294901760, %v10961_v55  ;;  %v444_v43 = vld [vmem:[%s10800_s21 + $0x40] sm:$0xff]  ;;  %v11016_v41 = vsub.f32 %v443_v50, %v10992_v22 }
  0x2c   : > { %9180 = vmatpush3.msra.mxu0 %v10855_v62  ;;  %9228 = vmatpush3.msra.mxu1 %v754_v53  ;;  %13906 = vst [vmem:[#allocation31_spill] sm:$0xff] %v10965_v31  ;;  %v10969_v53 = vand.u32 4294901760, %v536_v6  ;;  %v782_v6 = vand.u32 4294901760, %v781_v39  ;;  %13913 = vst [vmem:[#allocation38_spill] sm:$0xff] %v10992_v22  ;;  %v566_v18 = vsub.f32 %v10934_v58, %v10965_v31  ;;  %v789_v39 = vand.u32 4294901760, %v788_v59  ;;  %v445_v58 = vld [vmem:[%s10800_s21 + $0x48] sm:$0xff] }
  0x2d   : > { %9181 = vmatprep.subr.mxu0 %v10869_v12  ;;  %9229 = vmatprep.subr.mxu1 %v761_v30  ;;  %13912 = vst [vmem:[#allocation37_spill] sm:$0xff] %v10990_v8  ;;  %13915 = vst [vmem:[#allocation40_spill] sm:$0xff] %v11004_v28  ;;  %v796_v59 = vand.u32 4294901760, %v795_v1 }
  0x2e   : > { %9182 = vmatpush3.msra.mxu0 %v10869_v12  ;;  %9230 = vmatpush3.msra.mxu1 %v761_v30  ;;  %13907 = vst [vmem:[#allocation32_spill] sm:$0xff] %v10969_v53  ;;  %v10984_v30 = vand.u32 4294901760, %v10951_v38  ;;  %13917 = vst [vmem:[#allocation42_spill] sm:$0xff] %v11016_v41 }
  0x2f   : > { %9183 = vmatprep.subr.mxu0 %v10888_v36  ;;  %9231 = vmatprep.subr.mxu1 %v768_v40 }
  0x30   : > { %13911 = vst [vmem:[#allocation36_spill] sm:$0xff] %v10984_v30  ;;  %9184 = vmatpush3.msra.mxu0 %v10888_v36  ;;  %9232 = vmatpush3.msra.mxu1 %v768_v40  ;;  %v11001_v40 = vand.u32 4294901760, %v10974_v26  ;;  %v11007_v36 = vand.u32 4294901760, %v556_v23  ;;  %v802_v31 = vsub.f32 %v10951_v38, %v10984_v30  ;;  %v11021_v23 = vand.u32 4294901760, %v566_v18 }
  0x31   : > { %9185 = vmatprep.subr.mxu0 %v10903_v49  ;;  %9233 = vmatprep.subr.mxu1 %v775_v57  ;;  %v11029_v30 = vand.u32 4294901760, %v445_v58  ;;  %v11037_v18 = vand.u32 4294901760, %v11016_v41 }
  0x32   : > { %9186 = vmatpush3.msra.mxu0 %v10903_v49  ;;  %9187 = vmatprep.mubr.f32.mxu0 %v10969_v53  ;;  %13914 = vst [vmem:[#allocation39_spill] sm:$0xff] %v11001_v40  ;;  %13916 = vst [vmem:[#allocation41_spill] sm:$0xff] %v11007_v36  ;;  %v576_v53 = vsub.f32 %v10961_v55, %v10990_v8  ;;  %v586_v1 = vsub.f32 %v10974_v26, %v11001_v40  ;;  %v803_v50 = vand.u32 4294901760, %v802_v31  ;;  %v447_v8 = vld [vmem:[%s10800_s21 + $0x58] sm:$0xff] }
  0x33   : > { %9234 = vmatpush3.msra.mxu1 %v775_v57  ;;  %9188 = vmatmul.mubr.f32.vlgmr.msra.gmra.mxu0 %v10979_v63  ;;  %v11018_v57 = vand.u32 4294901760, %v444_v43  ;;  %13919 = vst [vmem:[#allocation44_spill] sm:$0xff] %v11021_v23  ;;  %v11027_v63 = vand.u32 4294901760, %v11004_v28  ;;  %13921 = vst [vmem:[#allocation46_spill] sm:$0xff] %v11029_v30 }
  0x34   : > { %9235 = vmatprep.subr.mxu1 %v782_v6  ;;  %9267 = vmatprep.subr.mxu0 %v10738_v14  ;;  %13923 = vst [vmem:[#allocation48_spill] sm:$0xff] %v11037_v18  ;;  %v11046_v31 = vand.u32 4294901760, %v586_v1 }
  0x35   : > { %13918 = vst [vmem:[#allocation43_spill] sm:$0xff] %v11018_v57  ;;  %9236 = vmatpush3.msra.mxu1 %v782_v6  ;;  %9268 = vmatpush3.msra.mxu0 %v10738_v14  ;;  %13920 = vst [vmem:[#allocation45_spill] sm:$0xff] %v11027_v63  ;;  %v446_v6 = vld [vmem:[%s10800_s21 + $0x50] sm:$0xff]  ;;  %v11034_v14 = vand.u32 4294901760, %v576_v53  ;;  %v11040_v40 = vsub.f32 %v444_v43, %v11018_v57  ;;  %v11051_v53 = vsub.f32 %v445_v58, %v11029_v30  ;;  %v448_v58 = vld [vmem:[%s10800_s21 + $0x60] sm:$0xff] }
  0x36   : > { %9237 = vmatprep.subr.mxu1 %v789_v39  ;;  %9269 = vmatprep.subr.mxu0 %v10741_v15  ;;  %13925 = vst [vmem:[#allocation50_spill] sm:$0xff] %v11046_v31 }
  0x37   : > { %9190 = vmatprep.mubr.f32.mxu0 %v11007_v36  ;;  %9238 = vmatpush3.msra.mxu1 %v789_v39  ;;  %13922 = vst [vmem:[#allocation47_spill] sm:$0xff] %v11034_v14  ;;  %13924 = vst [vmem:[#allocation49_spill] sm:$0xff] %v11040_v40  ;;  %v11053_v39 = vand.u32 4294901760, %v446_v6  ;;  %v11060_v43 = vand.u32 4294901760, %v11040_v40 }
  0x38   : > { %9270 = vmatpush3.msra.mxu0 %v10741_v15  ;;  %9239 = vmatprep.subr.mxu1 %v796_v59  ;;  %v596_v15 = vsub.f32 %v11004_v28, %v11027_v63  ;;  %13926 = vst [vmem:[#allocation51_spill] sm:$0xff] %v11051_v53 }
  0x39   : > { %9191 = vmatmul.mubr.f32.gmra.mxu0 %v11021_v23  ;;  %9271 = vmatprep.subr.mxu0 %v10746_v17  ;;  %13927 = vst [vmem:[#allocation52_spill] sm:$0xff] %v11053_v39  ;;  %13928 = vst [vmem:[#allocation53_spill] sm:$0xff] %v11060_v43  ;;  %v449_v23 = vld [vmem:[%s10800_s21 + $0x68] sm:$0xff] }
  0x3a   : > { %9240 = vmatpush3.msra.mxu1 %v796_v59  ;;  %9272 = vmatpush3.msra.mxu0 %v10746_v17  ;;  %v606_v17 = vsub.f32 %v11016_v41, %v11037_v18  ;;  %v11062_v59 = vand.u32 4294901760, %v447_v8  ;;  %v11069_v1 = vand.u32 4294901760, %v596_v15  ;;  %v616_v15 = vsub.f32 %v11040_v40, %v11060_v43 }
  0x3b   : > { %9241 = vmatprep.subr.mxu1 %v803_v50  ;;  %9273 = vmatprep.subr.mxu0 %v10751_v19  ;;  %v11100_v36 = vand.u32 4294901760, %v449_v23 }
  0x3c   : > { %9193 = vmatprep.mubr.f32.mxu0 %v11034_v14  ;;  %9242 = vmatpush3.msra.mxu1 %v803_v50  ;;  %13929 = vst [vmem:[#allocation54_spill] sm:$0xff] %v11062_v59  ;;  %13930 = vst [vmem:[#allocation55_spill] sm:$0xff] %v11069_v1  ;;  %v11072_v50 = vand.u32 4294901760, %v11051_v53  ;;  %v11075_v14 = vsub.f32 %v446_v6, %v11053_v39  ;;  %v11089_v6 = vand.u32 4294901760, %v448_v58 }
  0x3d   : > { %9243 = vmatprep.mubr.f32.mxu1 %v10842_v56  ;;  %9274 = vmatpush3.msra.mxu0 %v10751_v19  ;;  %v11082_v19 = vand.u32 4294901760, %v606_v17  ;;  %13937 = vst [vmem:[#allocation62_spill] sm:$0xff] %v11100_v36 }
  0x3e   : > { %9194 = vmatmul.mubr.f32.gmra.mxu0 %v11046_v31  ;;  %9244 = vmatmul.mubr.f32.vlgmr.msra.gmra.mxu1 %v10852_v61  ;;  %13931 = vst [vmem:[#allocation56_spill] sm:$0xff] %v11072_v50  ;;  %13932 = vst [vmem:[#allocation57_spill] sm:$0xff] %v11075_v14  ;;  %v11087_v31 = vsub.f32 %v447_v8, %v11062_v59  ;;  %v11098_v17 = vand.u32 4294901760, %v11075_v14  ;;  %v450_v8 = vld [vmem:[%s10800_s21 + $0x70] sm:$0xff]  ;;  %v11113_v61 = vsub.f32 %v448_v58, %v11089_v6 }
  0x3f   : > { %9275 = vmatprep.subr.mxu0 %v10754_v20  ;;  %9323 = vmatprep.subr.mxu1 %v10719_v3  ;;  %13933 = vst [vmem:[#allocation58_spill] sm:$0xff] %v11082_v19  ;;  %13935 = vst [vmem:[#allocation60_spill] sm:$0xff] %v11089_v6  ;;  %v11127_v56 = vand.u32 4294901760, %v450_v8 }
  0x40   : > { %9276 = vmatpush3.msra.mxu0 %v10754_v20  ;;  %9324 = vmatpush3.msra.mxu1 %v10719_v3  ;;  %13934 = vst [vmem:[#allocation59_spill] sm:$0xff] %v11087_v31  ;;  %v626_v20 = vsub.f32 %v11051_v53, %v11072_v50  ;;  %13936 = vst [vmem:[#allocation61_spill] sm:$0xff] %v11098_v17  ;;  %v11136_v58 = vand.u32 4294901760, %v11113_v61 }
  0x41   : > { %9277 = vmatprep.subr.mxu0 %v10779_v29  ;;  %9325 = vmatprep.subr.mxu1 %v10721_v4  ;;  %13940 = vst [vmem:[#allocation65_spill] sm:$0xff] %v11113_v61  ;;  %13943 = vst [vmem:[#allocation68_spill] sm:$0xff] %v11127_v56 }
  0x42   : > { %9196 = vmatprep.mubr.f32.mxu0 %v11069_v1  ;;  %9246 = vmatprep.mubr.f32.mxu1 %v10885_v35  ;;  %v11107_v1 = vand.u32 4294901760, %v616_v15  ;;  %v11110_v35 = vand.u32 4294901760, %v11087_v31  ;;  %v636_v15 = vsub.f32 %v11075_v14, %v11098_v17  ;;  %13944 = vst [vmem:[#allocation69_spill] sm:$0xff] %v11136_v58 }
  0x43   : > { %9278 = vmatpush3.msra.mxu0 %v10779_v29  ;;  %9326 = vmatpush3.msra.mxu1 %v10721_v4  ;;  %v451_v29 = vld [vmem:[%s10800_s21 + $0x78] sm:$0xff]  ;;  %s414_s21 = scalar_lea.vmem %s13698_s3, %s12722_s16 }
  0x44   : > { %9197 = vmatmul.mubr.f32.gmra.mxu0 %v11082_v19  ;;  %9247 = vmatmul.mubr.f32.gmra.mxu1 %v10899_v44  ;;  %13938 = vst [vmem:[#allocation63_spill] sm:$0xff] %v11107_v1  ;;  %13939 = vst [vmem:[#allocation64_spill] sm:$0xff] %v11110_v35  ;;  %v11120_v19 = vand.u32 4294901760, %v626_v20  ;;  %v11125_v44 = vsub.f32 %v449_v23, %v11100_v36  ;;  %v11138_v20 = vand.u32 4294901760, %v451_v29  ;;  %v11144_v23 = vand.u32 4294901760, %v636_v15 }
  0x45   : > { %9279 = vmatprep.subr.mxu0 %v10789_v33  ;;  %9327 = vmatprep.subr.mxu1 %v10723_v5  ;;  %v656_v15 = vsub.f32 %v11113_v61, %v11136_v58 }
  0x46   : > { %9280 = vmatpush3.msra.mxu0 %v10789_v33  ;;  %9328 = vmatpush3.msra.mxu1 %v10723_v5  ;;  %13941 = vst [vmem:[#allocation66_spill] sm:$0xff] %v11120_v19  ;;  %13942 = vst [vmem:[#allocation67_spill] sm:$0xff] %v11125_v44  ;;  %v646_v33 = vsub.f32 %v11087_v31, %v11110_v35 }
  0x47   : > { %9281 = vmatprep.subr.mxu0 %v10814_v42  ;;  %9329 = vmatprep.subr.mxu1 %v10728_v9  ;;  %13945 = vst [vmem:[#allocation70_spill] sm:$0xff] %v11138_v20  ;;  %13946 = vst [vmem:[#allocation71_spill] sm:$0xff] %v11144_v23 }
  0x48   : > { %9199 = vmatprep.mubr.f32.mxu0 %v11107_v1  ;;  %9249 = vmatprep.mubr.f32.mxu1 %v10928_v25  ;;  %v11147_v1 = vand.u32 4294901760, %v11125_v44  ;;  %v11150_v25 = vsub.f32 %v450_v8, %v11127_v56 }
  0x49   : > { %9282 = vmatpush3.msra.mxu0 %v10814_v42  ;;  %9330 = vmatpush3.msra.mxu1 %v10728_v9  ;;  %v11156_v42 = vand.u32 4294901760, %v646_v33 }
  0x4a   : > { %9200 = vmatmul.mubr.f32.gmra.mxu0 %v11120_v19  ;;  %9250 = vmatmul.mubr.f32.gmra.mxu1 %v10942_v52  ;;  %13947 = vst [vmem:[#allocation72_spill] sm:$0xff] %v11147_v1  ;;  %13948 = vst [vmem:[#allocation73_spill] sm:$0xff] %v11150_v25  ;;  %v11161_v19 = vsub.f32 %v451_v29, %v11138_v20  ;;  %v11170_v8 = vand.u32 4294901760, %v11150_v25  ;;  %v11176_v29 = vand.u32 4294901760, %v656_v15 }
  0x4b   : > { %9283 = vmatprep.subr.mxu0 %v10822_v46  ;;  %9331 = vmatprep.subr.mxu1 %v10730_v10  ;;  %13949 = vst [vmem:[#allocation74_spill] sm:$0xff] %v11156_v42 }
  0x4c   : > { %9284 = vmatpush3.msra.mxu0 %v10822_v46  ;;  %9332 = vmatpush3.msra.mxu1 %v10730_v10  ;;  %13950 = vst [vmem:[#allocation75_spill] sm:$0xff] %v11161_v19  ;;  %v666_v46 = vsub.f32 %v11125_v44, %v11147_v1  ;;  %13951 = vst [vmem:[#allocation76_spill] sm:$0xff] %v11170_v8  ;;  %v11179_v33 = vand.u32 4294901760, %v11161_v19 }
  0x4d   : > { %9285 = vmatprep.subr.mxu0 %v10837_v54  ;;  %9333 = vmatprep.subr.mxu1 %v10732_v11  ;;  %13952 = vst [vmem:[#allocation77_spill] sm:$0xff] %v11176_v29 }
  0x4e   : > { %9202 = vmatprep.mubr.f32.mxu0 %v11144_v23  ;;  %9252 = vmatprep.mubr.f32.mxu1 %v10976_v47  ;;  %13953 = vst [vmem:[#allocation78_spill] sm:$0xff] %v11179_v33  ;;  %v686_v15 = vsub.f32 %v11161_v19, %v11179_v33 }
  0x4f   : > { %9286 = vmatpush3.msra.mxu0 %v10837_v54  ;;  %9334 = vmatpush3.msra.mxu1 %v10732_v11  ;;  %v11185_v54 = vand.u32 4294901760, %v666_v46 }
  0x50   : > { %9203 = vmatmul.mubr.f32.gmra.mxu0 %v11156_v42  ;;  %9253 = vmatmul.mubr.f32.gmra.mxu1 %v10992_v22  ;;  %v676_v42 = vsub.f32 %v11150_v25, %v11170_v8  ;;  %v11205_v46 = vand.u32 4294901760, %v686_v15  ;;  %v13964_v15 = vld [vmem:[#allocation5_spill] sm:$0xff] }
  0x51   : > { %9287 = vmatprep.subr.mxu0 %v10850_v60  ;;  %9335 = vmatprep.subr.mxu1 %v10743_v16  ;;  %13954 = vst [vmem:[#allocation79_spill] sm:$0xff] %v11185_v54 }
  0x52   : > { %9288 = vmatpush3.msra.mxu0 %v10850_v60  ;;  %9336 = vmatpush3.msra.mxu1 %v10743_v16  ;;  %v11199_v60 = vand.u32 4294901760, %v676_v42  ;;  %13956 = vst [vmem:[#allocation81_spill] sm:$0xff] %v11205_v46  ;;  %v13963_v42 = vld [vmem:[#allocation21_spill] sm:$0xff] }
  0x53   : > { %9289 = vmatprep.subr.mxu0 %v10866_v7  ;;  %9337 = vmatprep.subr.mxu1 %v10766_v24 }
  0x54   : > { %9205 = vmatprep.mubr.f32.mxu0 %v11176_v29  ;;  %9255 = vmatprep.mubr.f32.mxu1 %v11018_v57  ;;  %13955 = vst [vmem:[#allocation80_spill] sm:$0xff] %v11199_v60 }
  0x55   : > { %9290 = vmatpush3.msra.mxu0 %v10866_v7  ;;  %9338 = vmatpush3.msra.mxu1 %v10766_v24  ;;  %v13958_v7 = vld [vmem:[#allocation25_spill] sm:$0xff] }
  0x56   : > { %9206 = vmatmul.mubr.f32.gmra.mxu0 %v11185_v54  ;;  %9256 = vmatmul.mubr.f32.gmra.mxu1 %v11029_v30 }
  0x57   : > { %9291 = vmatprep.subr.mxu0 %v10891_v37  ;;  %9339 = vmatprep.subr.mxu1 %v10773_v27 }
  0x58   : > { %9292 = vmatpush3.msra.mxu0 %v10891_v37  ;;  %9340 = vmatpush3.msra.mxu1 %v10773_v27  ;;  %v13959_v37 = vld [vmem:[#allocation17_spill] sm:$0xff] }
  0x59   : > { %9293 = vmatprep.subr.mxu0 %v10909_v51  ;;  %9341 = vmatprep.subr.mxu1 %v10792_v34 }
  0x5a   : > { %9208 = vmatprep.mubr.f32.mxu0 %v11199_v60  ;;  %9258 = vmatprep.mubr.f32.mxu1 %v11053_v39 }
  0x5b   : > { %9294 = vmatpush3.msra.mxu0 %v10909_v51  ;;  %9342 = vmatpush3.msra.mxu1 %v10792_v34  ;;  %v13960_v51 = vld [vmem:[#allocation3_spill] sm:$0xff] }
  0x5c   : > { %9209 = vmatmul.mubr.f32.gmra.mxu0 %v11205_v46  ;;  %9259 = vmatmul.mubr.f32.gmra.mxu1 %v11062_v59 }
  0x5d   : > { %9295 = vmatprep.subr.mxu0 %v10926_v2  ;;  %9343 = vmatprep.subr.mxu1 %v10819_v45 }
  0x5e   : > { %9296 = vmatpush3.msra.mxu0 %v10926_v2  ;;  %9344 = vmatpush3.msra.mxu1 %v10819_v45  ;;  %v13957_v2 = vld [vmem:[#allocation2_spill] sm:$0xff] }
  0x5f   : > { %9297 = vmatprep.subr.mxu0 %v10951_v38  ;;  %9345 = vmatprep.subr.mxu1 %v10826_v48 }
  0x60   : > { %9261 = vmatprep.mubr.f32.mxu1 %v11089_v6  ;;  %9298 = vmatpush3.msra.mxu0 %v10951_v38  ;;  %v13962_v38 = vld [vmem:[#allocation20_spill] sm:$0xff] }
  0x61   : > { %9299 = vmatprep.mubr.f32.mxu0 %v10872_v13  ;;  %9346 = vmatpush3.msra.mxu1 %v10826_v48 }
  0x62   : > { %9262 = vmatmul.mubr.f32.gmra.mxu1 %v11100_v36  ;;  %9300 = vmatmul.mubr.f32.vlgmr.msra.gmra.mxu0 %v10883_v32 }
  0x63   : > { %9347 = vmatprep.subr.mxu1 %v10855_v62  ;;  %9379 = vmatprep.subr.mxu0 %v10758_v21 }
  0x64   : > { %9348 = vmatpush3.msra.mxu1 %v10855_v62  ;;  %9380 = vmatpush3.msra.mxu0 %v10758_v21  ;;  %v13961_v21 = vld [vmem:[#allocation4_spill] sm:$0xff] }
  0x65   : > { %9349 = vmatprep.subr.mxu1 %v10869_v12  ;;  %9381 = vmatprep.subr.mxu0 %v13957_v2 }
  0x66   : > { %9264 = vmatprep.mubr.f32.mxu1 %v11127_v56  ;;  %9302 = vmatprep.mubr.f32.mxu0 %v10918_v0 }
  0x67   : > { %9350 = vmatpush3.msra.mxu1 %v10869_v12  ;;  %9382 = vmatpush3.msra.mxu0 %v13957_v2  ;;  %v13965_v2 = vld [vmem:[#allocation6_spill] sm:$0xff] }
  0x68   : > { %9265 = vmatmul.mubr.f32.gmra.mxu1 %v11138_v20  ;;  %9303 = vmatmul.mubr.f32.gmra.mxu0 %v13958_v7 }
  0x69   : > { %9351 = vmatprep.subr.mxu1 %v13959_v37  ;;  %9383 = vmatprep.subr.mxu0 %v13960_v51 }
  0x6a   : > { %9352 = vmatpush3.msra.mxu1 %v13959_v37  ;;  %9384 = vmatpush3.msra.mxu0 %v13960_v51  ;;  %v13966_v51 = vld [vmem:[#allocation28_spill] sm:$0xff] }
  0x6b   : > { %9353 = vmatprep.subr.mxu1 %v10903_v49  ;;  %9385 = vmatprep.subr.mxu0 %v13961_v21 }
  0x6c   : > { %9305 = vmatprep.mubr.f32.mxu0 %v10961_v55  ;;  %9354 = vmatpush3.msra.mxu1 %v10903_v49 }
  0x6d   : > { %9355 = vmatprep.mubr.f32.mxu1 %v13962_v38  ;;  %9386 = vmatpush3.msra.mxu0 %v13961_v21  ;;  %v13967_v21 = vld [vmem:[#allocation31_spill] sm:$0xff] }
  0x6e   : > { %9306 = vmatmul.mubr.f32.gmra.mxu0 %v10974_v26  ;;  %9356 = vmatmul.mubr.f32.vlgmr.msra.gmra.mxu1 %v13963_v42  ;;  %v13968_v42 = vld [vmem:[#allocation7_spill] sm:$0xff] }
  0x6f   : > { %9387 = vmatprep.subr.mxu0 %v13964_v15  ;;  %9435 = vmatprep.subr.mxu1 %v10719_v3 }
  0x70   : > { %9388 = vmatpush3.msra.mxu0 %v13964_v15  ;;  %9436 = vmatpush3.msra.mxu1 %v10719_v3  ;;  %v13969_v3 = vld [vmem:[#allocation8_spill] sm:$0xff]  ;;  %v13970_v15 = vld [vmem:[#allocation37_spill] sm:$0xff] }
  0x71   : > { %9389 = vmatprep.subr.mxu0 %v13965_v2  ;;  %9437 = vmatprep.subr.mxu1 %v10721_v4 }
  0x72   : > { %9308 = vmatprep.mubr.f32.mxu0 %v11004_v28  ;;  %9358 = vmatprep.mubr.f32.mxu1 %v13966_v51 }
  0x73   : > { %9390 = vmatpush3.msra.mxu0 %v13965_v2  ;;  %9438 = vmatpush3.msra.mxu1 %v10721_v4  ;;  %v13971_v4 = vld [vmem:[#allocation39_spill] sm:$0xff]  ;;  %v13972_v2 = vld [vmem:[#allocation10_spill] sm:$0xff] }
  0x74   : > { %9309 = vmatmul.mubr.f32.gmra.mxu0 %v11016_v41  ;;  %9359 = vmatmul.mubr.f32.gmra.mxu1 %v13967_v21 }
  0x75   : > { %9391 = vmatprep.subr.mxu0 %v13968_v42  ;;  %9439 = vmatprep.subr.mxu1 %v10723_v5 }
  0x76   : > { %9392 = vmatpush3.msra.mxu0 %v13968_v42  ;;  %9440 = vmatpush3.msra.mxu1 %v10723_v5  ;;  %v13973_v5 = vld [vmem:[#allocation12_spill] sm:$0xff]  ;;  %v13981_v42 = vld [vmem:[#allocation11_spill] sm:$0xff] }
  0x77   : > { %9393 = vmatprep.subr.mxu0 %v13969_v3  ;;  %9441 = vmatprep.subr.mxu1 %v10728_v9 }
  0x78   : > { %9311 = vmatprep.mubr.f32.mxu0 %v11040_v40  ;;  %9361 = vmatprep.mubr.f32.mxu1 %v13970_v15 }
  0x79   : > { %9394 = vmatpush3.msra.mxu0 %v13969_v3  ;;  %9442 = vmatpush3.msra.mxu1 %v10728_v9  ;;  %v13974_v9 = vld [vmem:[#allocation14_spill] sm:$0xff]  ;;  %v13983_v3 = vld [vmem:[#allocation19_spill] sm:$0xff] }
  0x7a   : > { %9312 = vmatmul.mubr.f32.gmra.mxu0 %v11051_v53  ;;  %9362 = vmatmul.mubr.f32.gmra.mxu1 %v13971_v4 }
  0x7b   : > { %9395 = vmatprep.subr.mxu0 %v13972_v2  ;;  %9443 = vmatprep.subr.mxu1 %v10730_v10 }
  0x7c   : > { %9396 = vmatpush3.msra.mxu0 %v13972_v2  ;;  %9444 = vmatpush3.msra.mxu1 %v10730_v10  ;;  %v13975_v10 = vld [vmem:[#allocation18_spill] sm:$0xff] }
  0x7d   : > { %9397 = vmatprep.subr.mxu0 %v13973_v5  ;;  %9445 = vmatprep.subr.mxu1 %v10732_v11 }
  0x7e   : > { %9314 = vmatprep.mubr.f32.mxu0 %v11075_v14  ;;  %9364 = vmatprep.mubr.f32.mxu1 %v11027_v63 }
  0x7f   : > { %9398 = vmatpush3.msra.mxu0 %v13973_v5  ;;  %9446 = vmatpush3.msra.mxu1 %v10732_v11  ;;  %v13976_v11 = vld [vmem:[#allocation23_spill] sm:$0xff] }
  0x80   : > { %9315 = vmatmul.mubr.f32.gmra.mxu0 %v11087_v31  ;;  %9365 = vmatmul.mubr.f32.gmra.mxu1 %v11037_v18 }
  0x81   : > { %9399 = vmatprep.subr.mxu0 %v13974_v9  ;;  %9447 = vmatprep.subr.mxu1 %v10743_v16 }
  0x82   : > { %9400 = vmatpush3.msra.mxu0 %v13974_v9  ;;  %9448 = vmatpush3.msra.mxu1 %v10743_v16  ;;  %v13977_v16 = vld [vmem:[#allocation26_spill] sm:$0xff] }
  0x83   : > { %9401 = vmatprep.subr.mxu0 %v13975_v10  ;;  %9449 = vmatprep.subr.mxu1 %v10766_v24 }
  0x84   : > { %9317 = vmatprep.mubr.f32.mxu0 %v11113_v61  ;;  %9367 = vmatprep.mubr.f32.mxu1 %v11060_v43 }
  0x85   : > { %9402 = vmatpush3.msra.mxu0 %v13975_v10  ;;  %9450 = vmatpush3.msra.mxu1 %v10766_v24  ;;  %v13978_v24 = vld [vmem:[#allocation29_spill] sm:$0xff] }
  0x86   : > { %9318 = vmatmul.mubr.f32.gmra.mxu0 %v11125_v44  ;;  %9368 = vmatmul.mubr.f32.gmra.mxu1 %v11072_v50 }
  0x87   : > { %9403 = vmatprep.subr.mxu0 %v13976_v11  ;;  %9451 = vmatprep.subr.mxu1 %v10773_v27 }
  0x88   : > { %9404 = vmatpush3.msra.mxu0 %v13976_v11  ;;  %9452 = vmatpush3.msra.mxu1 %v10773_v27  ;;  %v13979_v27 = vld [vmem:[#allocation36_spill] sm:$0xff] }
  0x89   : > { %9405 = vmatprep.subr.mxu0 %v13977_v16  ;;  %9453 = vmatprep.subr.mxu1 %v10792_v34 }
  0x8a   : > { %9320 = vmatprep.mubr.f32.mxu0 %v11150_v25  ;;  %9370 = vmatprep.mubr.f32.mxu1 %v11098_v17 }
  0x8b   : > { %9406 = vmatpush3.msra.mxu0 %v13977_v16  ;;  %9454 = vmatpush3.msra.mxu1 %v10792_v34  ;;  %v13980_v34 = vld [vmem:[#allocation9_spill] sm:$0xff] }
  0x8c   : > { %9321 = vmatmul.mubr.f32.gmra.mxu0 %v11161_v19  ;;  %9371 = vmatmul.mubr.f32.gmra.mxu1 %v11110_v35 }
  0x8d   : > { %9407 = vmatprep.subr.mxu0 %v13978_v24  ;;  %9455 = vmatprep.subr.mxu1 %v10819_v45 }
  0x8e   : > { %9408 = vmatpush3.msra.mxu0 %v13978_v24  ;;  %9456 = vmatpush3.msra.mxu1 %v10819_v45  ;;  %v13982_v45 = vld [vmem:[#allocation16_spill] sm:$0xff] }
  0x8f   : > { %9409 = vmatprep.subr.mxu0 %v13979_v27  ;;  %9457 = vmatprep.subr.mxu1 %v10826_v48 }
  0x90   : > { %9373 = vmatprep.mubr.f32.mxu1 %v11136_v58  ;;  %9410 = vmatpush3.msra.mxu0 %v13979_v27 }
  0x91   : > { %9411 = vmatprep.mubr.f32.mxu0 %v13980_v34  ;;  %9458 = vmatpush3.msra.mxu1 %v10826_v48  ;;  %v13984_v48 = vld [vmem:[#allocation24_spill] sm:$0xff] }
  0x92   : > { %9374 = vmatmul.mubr.f32.gmra.mxu1 %v11147_v1  ;;  %9412 = vmatmul.mubr.f32.vlgmr.msra.gmra.mxu0 %v13981_v42 }
  0x93   : > { %9459 = vmatprep.subr.mxu1 %v10855_v62  ;;  %9376 = vmatprep.mubr.f32.mxu1 %v11170_v8 }
  0x94   : > { %9460 = vmatpush3.msra.mxu1 %v10855_v62  ;;  %9414 = vmatprep.mubr.f32.mxu0 %v13982_v45  ;;  %v1754_v62 = vld [vmem:[%s13699_s4] sm:$0xf] }
  0x95   : > { %9461 = vmatprep.subr.mxu1 %v10869_v12 }
  0x96   : > { %9462 = vmatpush3.msra.mxu1 %v10869_v12  ;;  %9415 = vmatmul.mubr.f32.gmra.mxu0 %v13983_v3  ;;  %v1813_v12 = vsel %vm1811_vm0, %v1754_v62, 0 }
  0x97   : > { %9377 = vmatmul.mubr.f32.gmra.mxu1 %v11179_v33  ;;  %9463 = vmatprep.subr.mxu1 %v13959_v37 }
  0x98   : > { %9464 = vmatpush3.msra.mxu1 %v13959_v37  ;;  %9417 = vmatprep.mubr.f32.mxu0 %v13984_v48 }
  0x99   : > { %9465 = vmatprep.subr.mxu1 %v10903_v49  ;;  %9467 = vmatprep.mubr.f32.mxu1 %v13980_v34 }
  0x9a   : > { %9466 = vmatpush3.msra.mxu1 %v10903_v49  ;;  %9418 = vmatmul.mubr.f32.gmra.mxu0 %v10942_v52  ;;  %v11367_v49 = vand.u32 4294901760, %v1813_v12 }
  0x9b   : > { %9468 = vmatmul.mubr.f32.vlgmr.msra.gmra.mxu1 %v13981_v42  ;;  %9420 = vmatprep.mubr.f32.mxu0 %v10976_v47 }
  0x9c   : > { %9470 = vmatprep.mubr.f32.mxu1 %v13982_v45  ;;  %13985 = vst [vmem:[#allocation2_spill] sm:$0xff] %v11367_v49  ;;  %9491 = vmatprep.subr.mxu0 %v11367_v49  ;;  %v11371_v37 = vsub.f32 %v1813_v12, %v11367_v49 }
  0x9d   : > { %9492 = vmatpush3.msra.mxu0 %v11367_v49 }
  0x9e   : > { %9421 = vmatmul.mubr.f32.gmra.mxu0 %v10992_v22  ;;  %13986 = vst [vmem:[#allocation17_spill] sm:$0xff] %v11371_v37  ;;  %v11375_v2 = vand.u32 4294901760, %v11371_v37  ;;  %9543 = vmatprep.subr.mxu0 %v11371_v37 }
  0x9f   : > { %9471 = vmatmul.mubr.f32.gmra.mxu1 %v13983_v3  ;;  %9423 = vmatprep.mubr.f32.mxu0 %v11018_v57 }
  0xa0   : > { %9473 = vmatprep.mubr.f32.mxu1 %v13984_v48  ;;  %13987 = vst [vmem:[#allocation3_spill] sm:$0xff] %v11375_v2  ;;  %v2075_v5 = vsub.f32 %v11371_v37, %v11375_v2 }
  0xa2   : > { %9424 = vmatmul.mubr.f32.gmra.mxu0 %v11029_v30  ;;  %v2076_v9 = vand.u32 4294901760, %v2075_v5 }
  0xa3   : > { %9474 = vmatmul.mubr.f32.gmra.mxu1 %v10942_v52  ;;  %9426 = vmatprep.mubr.f32.mxu0 %v11053_v39 }
  0xa4   : > { %9476 = vmatprep.mubr.f32.mxu1 %v10976_v47  ;;  %9517 = vmatprep.subr.mxu1 %v2076_v9 }
  0xa5   : > { %9518 = vmatpush3.msra.mxu1 %v2076_v9 }
  0xa6   : > { %9427 = vmatmul.mubr.f32.gmra.mxu0 %v11062_v59  ;;  %9569 = vmatprep.subr.mxu1 %v11367_v49 }
  0xa7   : > { %9477 = vmatmul.mubr.f32.gmra.mxu1 %v10992_v22  ;;  %9429 = vmatprep.mubr.f32.mxu0 %v11089_v6 }
  0xa8   : > { %9479 = vmatprep.mubr.f32.mxu1 %v11018_v57 }
  0xaa   : > { %9430 = vmatmul.mubr.f32.gmra.mxu0 %v11100_v36 }
  0xab   : > { %9480 = vmatmul.mubr.f32.gmra.mxu1 %v11029_v30  ;;  %9432 = vmatprep.mubr.f32.mxu0 %v11127_v56 }
  0xac   : > { %9482 = vmatprep.mubr.f32.mxu1 %v11053_v39 }
  0xae   : > { %9433 = vmatmul.mubr.f32.gmra.mxu0 %v11138_v20 }
  0xaf   : > { %9483 = vmatmul.mubr.f32.gmra.mxu1 %v11062_v59 }
  0xb0   : > { %9485 = vmatprep.mubr.f32.mxu1 %v11089_v6 }
  0xb3   : > { %9486 = vmatmul.mubr.f32.gmra.mxu1 %v11100_v36 }
  0xb4   : > { %9488 = vmatprep.mubr.f32.mxu1 %v11127_v56 }
  0xb7   : > { %9489 = vmatmul.mubr.f32.gmra.mxu1 %v11138_v20 }
  0xf3   : > { %v9189_v10 = vpop.f32.mrf.mxu0 }
  0xf5   : > { %v539_v11 = vpop.f32.mrf.mxu0 }
  0xf9   : > { %v9192_v16 = vpop.f32.mrf.mxu0 }
  0xfb   : > { %v559_v24 = vpop.f32.mrf.mxu0 }
  0xfe   : > { %v9195_v27 = vpop.f32.mrf.mxu0  ;;  %v9245_v62 = vpop.f32.mrf.mxu1 }
  0xff   : > { %v847_v37 = vadd.f32 %v9245_v62, %v9189_v10 }
 0x100   : > { %v579_v12 = vpop.f32.mrf.mxu0  ;;  %v840_v33 = vpop.f32.mrf.mxu1 }
 0x101   : > { %v841_v49 = vadd.f32 %v840_v33, %v539_v11 }
 0x104   : > { %v9198_v8 = vpop.f32.mrf.mxu0  ;;  %v9248_v1 = vpop.f32.mrf.mxu1 }
 0x106   : > { %v599_v58 = vpop.f32.mrf.mxu0  ;;  %v852_v35 = vpop.f32.mrf.mxu1 }
 0x10a   : > { %v9201_v19 = vpop.f32.mrf.mxu0  ;;  %v9251_v17 = vpop.f32.mrf.mxu1 }
 0x10c   : > { %v619_v25 = vpop.f32.mrf.mxu0  ;;  %v864_v5 = vpop.f32.mrf.mxu1 }
 0x110   : > { %v9204_v50 = vpop.f32.mrf.mxu0  ;;  %v9254_v9 = vpop.f32.mrf.mxu1 }
 0x111   : > { %v883_v10 = vadd.f32 %v9254_v9, %v9198_v8 }
 0x112   : > { %v639_v44 = vpop.f32.mrf.mxu0  ;;  %v876_v43 = vpop.f32.mrf.mxu1 }
 0x113   : > { %v877_v33 = vadd.f32 %v876_v43, %v599_v58 }
 0x116   : > { %v9207_v61 = vpop.f32.mrf.mxu0  ;;  %v9257_v18 = vpop.f32.mrf.mxu1 }
 0x118   : > { %v659_v31 = vpop.f32.mrf.mxu0  ;;  %v888_v63 = vpop.f32.mrf.mxu1 }
 0x11c   : > { %v9210_v14 = vpop.f32.mrf.mxu0  ;;  %v9260_v4 = vpop.f32.mrf.mxu1 }
 0x11e   : > { %v679_v53 = vpop.f32.mrf.mxu0  ;;  %v900_v15 = vpop.f32.mrf.mxu1 }
 0x122   : > { %v9263_v40 = vpop.f32.mrf.mxu1  ;;  %v9301_v21 = vpop.f32.mrf.mxu0 }
 0x124   : > { %v912_v41 = vpop.f32.mrf.mxu1  ;;  %v1034_v51 = vpop.f32.mrf.mxu0 }
 0x125   : > { %v1035_v8 = vadd.f32 %v1034_v51, %v841_v49 }
 0x128   : > { %v9266_v28 = vpop.f32.mrf.mxu1  ;;  %v9304_v26 = vpop.f32.mrf.mxu0 }
 0x129   : > { %v931_v9 = vadd.f32 %v9266_v28, %v9210_v14 }
 0x12a   : > { %v924_v38 = vpop.f32.mrf.mxu1  ;;  %v1048_v55 = vpop.f32.mrf.mxu0 }
 0x12b   : > { %v925_v43 = vadd.f32 %v924_v38, %v679_v53 }
 0x12e   : > { %v9307_v7 = vpop.f32.mrf.mxu0  ;;  %v9357_v20 = vpop.f32.mrf.mxu1 }
 0x130   : > { %v1062_v0 = vpop.f32.mrf.mxu0  ;;  %v1228_v56 = vpop.f32.mrf.mxu1 }
 0x134   : > { %v9310_v32 = vpop.f32.mrf.mxu0  ;;  %v9360_v36 = vpop.f32.mrf.mxu1 }
 0x136   : > { %v1076_v13 = vpop.f32.mrf.mxu0  ;;  %v1244_v6 = vpop.f32.mrf.mxu1 }
 0x13a   : > { %v9313_v59 = vpop.f32.mrf.mxu0  ;;  %v9363_v46 = vpop.f32.mrf.mxu1 }
 0x13c   : > { %v1090_v39 = vpop.f32.mrf.mxu0  ;;  %v1260_v60 = vpop.f32.mrf.mxu1 }
 0x140   : > { %v9316_v30 = vpop.f32.mrf.mxu0  ;;  %v9366_v54 = vpop.f32.mrf.mxu1 }
 0x142   : > { %v1104_v57 = vpop.f32.mrf.mxu0  ;;  %v1276_v29 = vpop.f32.mrf.mxu1 }
 0x146   : > { %v9319_v22 = vpop.f32.mrf.mxu0  ;;  %v9369_v47 = vpop.f32.mrf.mxu1 }
 0x148   : > { %v1118_v23 = vpop.f32.mrf.mxu0  ;;  %v1292_v52 = vpop.f32.mrf.mxu1 }
 0x14c   : > { %v9322_v48 = vpop.f32.mrf.mxu0  ;;  %v11381_v3 = vpop.f32.mrf.mxu1 }
 0x14d   : > { %13988 = vst [vmem:[#allocation4_spill] sm:$0xff] %v11381_v3  ;;  %v859_v3 = vadd.f32 %v9248_v1, %v9192_v16  ;;  %v895_v1 = vadd.f32 %v9257_v18, %v9201_v19  ;;  %v889_v16 = vadd.f32 %v888_v63, %v619_v25 }
 0x14e   : > { %v11383_v45 = vpop.f32.mrf.mxu0  ;;  %v11385_v42 = vpop.f32.mrf.mxu1 }
 0x14f   : > { %13989 = vst [vmem:[#allocation5_spill] sm:$0xff] %v11383_v45  ;;  %13990 = vst [vmem:[#allocation6_spill] sm:$0xff] %v11385_v42  ;;  %v853_v45 = vadd.f32 %v852_v35, %v559_v24  ;;  %v871_v42 = vadd.f32 %v9251_v17, %v9195_v27  ;;  %v907_v24 = vadd.f32 %v9260_v4, %v9204_v50 }
 0x150   : > { %v901_v35 = vadd.f32 %v900_v15, %v639_v44  ;;  %v919_v17 = vadd.f32 %v9263_v40, %v9207_v61  ;;  %v1042_v27 = vadd.f32 %v9301_v21, %v847_v37  ;;  %v1229_v50 = vadd.f32 %v1228_v56, %v1035_v8 }
 0x151   : > { %v1049_v18 = vadd.f32 %v1048_v55, %v853_v45  ;;  %v1070_v19 = vadd.f32 %v9307_v7, %v871_v42  ;;  %v1084_v15 = vadd.f32 %v9310_v32, %v883_v10  ;;  %v1077_v40 = vadd.f32 %v1076_v13, %v877_v33 }
 0x152   : > { %v11387_v34 = vpop.f32.mrf.mxu1  ;;  %v9413_v2 = vpop.f32.mrf.mxu0  ;;  %v1237_v25 = vadd.f32 %v9357_v20, %v1042_v27  ;;  %v1098_v37 = vadd.f32 %v9313_v59, %v895_v1  ;;  %v1091_v51 = vadd.f32 %v1090_v39, %v889_v16  ;;  %v1105_v53 = vadd.f32 %v1104_v57, %v901_v35 }
 0x153   : > { %13991 = vst [vmem:[#allocation7_spill] sm:$0xff] %v11387_v34  ;;  %v865_v34 = vadd.f32 %v864_v5, %v579_v12  ;;  %v913_v5 = vadd.f32 %v912_v41, %v659_v31  ;;  %v1245_v21 = vadd.f32 %v1244_v6, %v1049_v18  ;;  %v1269_v31 = vadd.f32 %v9363_v46, %v1070_v19 }
 0x154   : > { %v11389_v62 = vpop.f32.mrf.mxu1  ;;  %v1467_v11 = vpop.f32.mrf.mxu0  ;;  %v1474_v41 = vadd.f32 %v9413_v2, %v1237_v25  ;;  %v1285_v14 = vadd.f32 %v9366_v54, %v1084_v15  ;;  %v1277_v20 = vadd.f32 %v1276_v29, %v1077_v40  ;;  %v1126_v32 = vadd.f32 %v9319_v22, %v919_v17  ;;  %v10621_v15 = vld [vmem:[%s10714_s18 + $0x10] sm:$0xff] }
 0x155   : > { %13992 = vst [vmem:[#allocation8_spill] sm:$0xff] %v11389_v62  ;;  %v1056_v62 = vadd.f32 %v9304_v26, %v859_v3  ;;  %v1063_v63 = vadd.f32 %v1062_v0, %v865_v34  ;;  %v1112_v26 = vadd.f32 %v9316_v30, %v907_v24  ;;  %v1468_v0 = vadd.f32 %v1467_v11, %v1229_v50  ;;  %v10618_v34 = vld [vmem:[%s10714_s18 + $0x8] sm:$0xff]  ;;  %v13993_v30 = vld [vmem:[#allocation4_spill] sm:$0xff] }
 0x156   : > { %v9416_v12 = vpop.f32.mrf.mxu0  ;;  %v1119_v13 = vadd.f32 %v1118_v23, %v913_v5  ;;  %v1293_v6 = vadd.f32 %v1292_v52, %v1091_v51  ;;  %v1140_v46 = vadd.f32 %v9322_v48, %v931_v9  ;;  %v13994_v45 = vld [vmem:[#allocation5_spill] sm:$0xff]  ;;  %v13995_v29 = vld [vmem:[#allocation6_spill] sm:$0xff] }
 0x157   : > { %v9378_v58 = vpop.f32.mrf.mxu1  ;;  %v1253_v44 = vadd.f32 %v9360_v36, %v1056_v62  ;;  %v1261_v28 = vadd.f32 %v1260_v60, %v1063_v63  ;;  %v1301_v36 = vadd.f32 %v9369_v47, %v1098_v37  ;;  %v1317_v54 = vadd.f32 %v13993_v30, %v1112_v26  ;;  %v10619_v48 = vld [vmem:[%s10714_s18] sm:$0xff] }
 0x158   : > { %v1479_v4 = vpop.f32.mrf.mxu0  ;;  %v1133_v57 = vadd.f32 %v13994_v45, %v925_v43  ;;  %v1309_v3 = vadd.f32 %v13995_v29, %v1105_v53  ;;  %v11403_v16 = vadd.f32 %v9378_v58, %v1140_v46 }
 0x159   : > { %v1340_v61 = vpop.f32.mrf.mxu1  ;;  %v1486_v38 = vadd.f32 %v9416_v12, %v1253_v44  ;;  %v1480_v23 = vadd.f32 %v1479_v4, %v1245_v21  ;;  %v10620_v12 = vld [vmem:[%s10714_s18 + $0x18] sm:$0xff] }
 0x15a   : > { %v9419_v49 = vpop.f32.mrf.mxu0  ;;  %v13996_v2 = vld [vmem:[#allocation7_spill] sm:$0xff]  ;;  %v11405_v24 = vadd.f32 %v1340_v61, %v1133_v57  ;;  %v10624_v57 = vld [vmem:[%s10714_s18 + $0x38] sm:$0xff] }
 0x15b   : > { %v9469_v55 = vpop.f32.mrf.mxu1  ;;  %v11396_v22 = vadd.f32 %v13996_v2, %v1126_v32  ;;  %v1498_v27 = vadd.f32 %v9419_v49, %v1269_v31 }
 0x15c   : > { %v1651_v7 = vadd.f32 %v9469_v55, %v1474_v41  ;;  %v1491_v56 = vpop.f32.mrf.mxu0  ;;  %v13997_v33 = vld [vmem:[#allocation8_spill] sm:$0xff] }
 0x15d   : > { %v1644_v59 = vpop.f32.mrf.mxu1  ;;  %v11401_v1 = vadd.f32 %v13997_v33, %v1119_v13  ;;  %v1492_v19 = vadd.f32 %v1491_v56, %v1261_v28  ;;  %v10622_v28 = vld [vmem:[%s10714_s18 + $0x28] sm:$0xff]  ;;  %v10625_v33 = vld [vmem:[%s10714_s18 + $0x30] sm:$0xff] }
 0x15e   : > { %v1739_v39 = vadd.f32 %v10618_v34, %v1651_v7  ;;  %v1645_v60 = vadd.f32 %v1644_v59, %v1468_v0  ;;  %v9422_v42 = vpop.f32.mrf.mxu0 }
 0x15f   : > { %v9472_v47 = vpop.f32.mrf.mxu1  ;;  %v1510_v58 = vadd.f32 %v9422_v42, %v1285_v14 }
 0x160   : > { %v1767_v52 = vsel %vm1762_vm1, %v1739_v39, 0  ;;  %v1738_v10 = vadd.f32 %v10619_v48, %v1645_v60  ;;  %v1663_v62 = vadd.f32 %v9472_v47, %v1486_v38  ;;  %v1503_v11 = vpop.f32.mrf.mxu0 }
 0x161   : > { %v11407_v35 = vand.u32 4294901760, %v1767_v52  ;;  %v1656_v17 = vpop.f32.mrf.mxu1  ;;  %v1504_v50 = vadd.f32 %v1503_v11, %v1277_v20 }
 0x162   : > { %v1764_v5 = vsel %vm1762_vm1, %v1738_v10, 0  ;;  %v1741_v8 = vadd.f32 %v10620_v12, %v1663_v62  ;;  %v1657_v9 = vadd.f32 %v1656_v17, %v1480_v23  ;;  %v9425_v43 = vpop.f32.mrf.mxu0 }
 0x163   : > { %v11412_v18 = vsub.f32 %v1767_v52, %v11407_v35  ;;  %v11414_v25 = vand.u32 4294901760, %v1764_v5  ;;  %v9475_v63 = vpop.f32.mrf.mxu1  ;;  %v1522_v41 = vadd.f32 %v9425_v43, %v1301_v36  ;;  %v13998_v36 = vld [vmem:[#allocation2_spill] sm:$0xff] }
 0x164   : > { %v1773_v4 = vsel %vm1762_vm1, %v1741_v8, 0  ;;  %v1740_v44 = vadd.f32 %v10621_v15, %v1657_v9  ;;  %v1675_v40 = vadd.f32 %v9475_v63, %v1498_v27  ;;  %v1515_v61 = vpop.f32.mrf.mxu0  ;;  %v10626_v63 = vld [vmem:[%s10714_s18 + $0x48] sm:$0xff] }
 0x165   : > { %v1893_v21 = vand.u32 4294901760, %v11412_v18  ;;  %v11420_v37 = vsub.f32 %v1764_v5, %v11414_v25  ;;  %v11422_v31 = vand.u32 4294901760, %v1773_v4  ;;  %v1668_v49 = vpop.f32.mrf.mxu1  ;;  %9519 = vmatprep.mubr.f32.mxu1 %v11414_v25  ;;  %v1516_v14 = vadd.f32 %v1515_v61, %v1293_v6  ;;  %v10623_v6 = vld [vmem:[%s10714_s18 + $0x20] sm:$0xff] }
 0x166   : > { %v1770_v51 = vsel %vm1762_vm1, %v1740_v44, 0  ;;  %v1743_v26 = vadd.f32 %v10622_v28, %v1675_v40  ;;  %v1669_v55 = vadd.f32 %v1668_v49, %v1492_v19  ;;  %9520 = vmatmul.mubr.f32.vlgmr.msra.gmra.mxu1 %v11407_v35  ;;  %v9428_v53 = vpop.f32.mrf.mxu0  ;;  %v10627_v28 = vld [vmem:[%s10714_s18 + $0x40] sm:$0xff] }
 0x167   : > { %v1894_v20 = vsub.f32 %v11412_v18, %v1893_v21  ;;  %v11432_v0 = vsub.f32 %v1773_v4, %v11422_v31  ;;  %v11434_v7 = vand.u32 4294901760, %v1770_v51  ;;  %v1534_v56 = vadd.f32 %v9428_v53, %v1317_v54  ;;  %v9478_v32 = vpop.f32.mrf.mxu1  ;;  %9570 = vmatpush3.msra.mxu1 %v13998_v36 }
 0x168   : > { %v1779_v13 = vsel %vm1762_vm1, %v1743_v26, 0  ;;  %v1742_v59 = vadd.f32 %v10623_v6, %v1669_v55  ;;  %v1687_v46 = vadd.f32 %v9478_v32, %v1510_v58  ;;  %v1527_v38 = vpop.f32.mrf.mxu0  ;;  %v1883_v34 = vand.u32 4294901760, %v11420_v37  ;;  %9621 = vmatprep.subr.mxu1 %v13998_v36  ;;  %v13999_v55 = vld [vmem:[#allocation17_spill] sm:$0xff] }
 0x169   : > { %v1895_v39 = vand.u32 4294901760, %v1894_v20  ;;  %v11442_v60 = vsub.f32 %v1770_v51, %v11434_v7  ;;  %v11444_v42 = vand.u32 4294901760, %v1779_v13  ;;  %v1528_v30 = vadd.f32 %v1527_v38, %v1309_v3  ;;  %v1680_v54 = vpop.f32.mrf.mxu1  ;;  %9522 = vmatprep.mubr.f32.mxu1 %v11434_v7 }
 0x16a   : > { %v1776_v45 = vsel %vm1762_vm1, %v1742_v59, 0  ;;  %v1745_v29 = vadd.f32 %v10624_v57, %v1687_v46  ;;  %v1681_v2 = vadd.f32 %v1680_v54, %v1504_v50  ;;  %9523 = vmatmul.mubr.f32.gmra.mxu1 %v11422_v31  ;;  %v9431_v47 = vpop.f32.mrf.mxu0  ;;  %v1884_v23 = vsub.f32 %v11420_v37, %v1883_v34  ;;  %v10628_v46 = vld [vmem:[%s10714_s18 + $0x58] sm:$0xff] }
 0x16b   : > { %v11454_v52 = vsub.f32 %v1779_v13, %v11444_v42  ;;  %v11456_v3 = vand.u32 4294901760, %v1776_v45  ;;  %v1546_v48 = vadd.f32 %v9431_v47, %v11396_v22  ;;  %v9481_v10 = vpop.f32.mrf.mxu1  ;;  %v1903_v62 = vand.u32 4294901760, %v11442_v60 }
 0x16c   : > { %v1785_v11 = vsel %vm1762_vm1, %v1745_v29, 0  ;;  %v1744_v17 = vadd.f32 %v10625_v33, %v1681_v2  ;;  %v1699_v27 = vadd.f32 %v9481_v10, %v1522_v41  ;;  %v1539_v5 = vpop.f32.mrf.mxu0  ;;  %v1885_v12 = vand.u32 4294901760, %v1884_v23  ;;  %v10629_v23 = vld [vmem:[%s10714_s18 + $0x50] sm:$0xff] }
 0x16d   : > { %v11463_v8 = vsub.f32 %v1776_v45, %v11456_v3  ;;  %v11465_v9 = vand.u32 4294901760, %v1785_v11  ;;  %v1540_v43 = vadd.f32 %v1539_v5, %v11401_v1  ;;  %v1692_v19 = vpop.f32.mrf.mxu1  ;;  %9525 = vmatprep.mubr.f32.mxu1 %v11456_v3  ;;  %v1904_v22 = vsub.f32 %v11442_v60, %v1903_v62  ;;  %v14000_v45 = vld [vmem:[#allocation3_spill] sm:$0xff] }
 0x16e   : > { %v1782_v58 = vsel %vm1762_vm1, %v1744_v17, 0  ;;  %v1747_v4 = vadd.f32 %v10626_v63, %v1699_v27  ;;  %v1693_v50 = vadd.f32 %v1692_v19, %v1516_v14  ;;  %9493 = vmatprep.mubr.f32.mxu0 %v1885_v12  ;;  %9526 = vmatmul.mubr.f32.gmra.mxu1 %v11444_v42  ;;  %v9434_v15 = vpop.f32.mrf.mxu0  ;;  %v1913_v44 = vand.u32 4294901760, %v11432_v0 }
 0x16f   : > { %v11477_v1 = vsub.f32 %v1785_v11, %v11465_v9  ;;  %v11479_v40 = vand.u32 4294901760, %v1782_v58  ;;  %9494 = vmatmul.mubr.f32.vlgmr.msra.gmra.mxu0 %v1895_v39  ;;  %v1558_v61 = vadd.f32 %v9434_v15, %v11403_v16  ;;  %v9484_v41 = vpop.f32.mrf.mxu1  ;;  %v1905_v49 = vand.u32 4294901760, %v1904_v22 }
 0x170   : > { %v1791_v51 = vsel %vm1762_vm1, %v1747_v4, 0  ;;  %v1746_v26 = vadd.f32 %v10627_v28, %v1693_v50  ;;  %v1711_v14 = vadd.f32 %v9484_v41, %v1534_v56  ;;  %9544 = vmatpush3.msra.mxu0 %v13999_v55  ;;  %v1551_v53 = vpop.f32.mrf.mxu0  ;;  %v1914_v20 = vsub.f32 %v11432_v0, %v1913_v44 }
 0x171   : > { %v11489_v32 = vsub.f32 %v1782_v58, %v11479_v40  ;;  %v11491_v13 = vand.u32 4294901760, %v1791_v51  ;;  %v1552_v16 = vadd.f32 %v1551_v53, %v11405_v24  ;;  %v1704_v6 = vpop.f32.mrf.mxu1  ;;  %9496 = vmatprep.mubr.f32.mxu0 %v1905_v49  ;;  %9528 = vmatprep.mubr.f32.mxu1 %v11479_v40  ;;  %v1923_v56 = vand.u32 4294901760, %v11463_v8  ;;  %v10630_v58 = vld [vmem:[%s10714_s18 + $0x68] sm:$0xff] }
 0x172   : > { %v1788_v59 = vsel %vm1762_vm1, %v1746_v26, 0  ;;  %v1749_v38 = vadd.f32 %v10628_v46, %v1711_v14  ;;  %v1705_v39 = vadd.f32 %v1704_v6, %v1528_v30  ;;  %v1915_v54 = vand.u32 4294901760, %v1914_v20  ;;  %9529 = vmatmul.mubr.f32.gmra.mxu1 %v11465_v9  ;;  %9595 = vmatprep.subr.mxu0 %v14000_v45 }
 0x173   : > { %v11501_v57 = vsub.f32 %v1791_v51, %v11491_v13  ;;  %v11503_v24 = vand.u32 4294901760, %v1788_v59  ;;  %v9487_v29 = vpop.f32.mrf.mxu1  ;;  %v1924_v2 = vsub.f32 %v11463_v8, %v1923_v56  ;;  %v1933_v47 = vand.u32 4294901760, %v11454_v52 }
 0x174   : > { %v1797_v30 = vsel %vm1762_vm1, %v1749_v38, 0  ;;  %v1748_v10 = vadd.f32 %v10629_v23, %v1705_v39  ;;  %9497 = vmatmul.mubr.f32.gmra.mxu0 %v1915_v54  ;;  %v1723_v11 = vadd.f32 %v9487_v29, %v1546_v48  ;;  %v1943_v33 = vand.u32 4294901760, %v11489_v32 }
 0x175   : > { %v11513_v17 = vsub.f32 %v1788_v59, %v11503_v24  ;;  %v11515_v27 = vand.u32 4294901760, %v1797_v30  ;;  %v1716_v5 = vpop.f32.mrf.mxu1  ;;  %v1925_v12 = vand.u32 4294901760, %v1924_v2  ;;  %9531 = vmatprep.mubr.f32.mxu1 %v11503_v24  ;;  %v1934_v19 = vsub.f32 %v11454_v52, %v1933_v47 }
 0x176   : > { %v1794_v22 = vsel %vm1762_vm1, %v1748_v10, 0  ;;  %v1751_v48 = vadd.f32 %v10630_v58, %v1723_v11  ;;  %v1717_v63 = vadd.f32 %v1716_v5, %v1540_v43  ;;  %9532 = vmatmul.mubr.f32.gmra.mxu1 %v11491_v13  ;;  %v1944_v4 = vsub.f32 %v11489_v32, %v1943_v33  ;;  %v10631_v43 = vld [vmem:[%s10714_s18 + $0x60] sm:$0xff]  ;;  %v10633_v5 = vld [vmem:[%s10714_s18 + $0x70] sm:$0xff] }
 0x177   : > { %v11528_v50 = vsub.f32 %v1797_v30, %v11515_v27  ;;  %v11530_v15 = vand.u32 4294901760, %v1794_v22  ;;  %9499 = vmatprep.mubr.f32.mxu0 %v1925_v12  ;;  %v1935_v41 = vand.u32 4294901760, %v1934_v19  ;;  %v9490_v49 = vpop.f32.mrf.mxu1  ;;  %v1953_v51 = vand.u32 4294901760, %v11477_v1 }
 0x178   : > { %v1803_v28 = vsel %vm1762_vm1, %v1751_v48, 0  ;;  %v1750_v26 = vadd.f32 %v10631_v43, %v1717_v63  ;;  %v1735_v14 = vadd.f32 %v9490_v49, %v1558_v61  ;;  %v1945_v55 = vand.u32 4294901760, %v1944_v4  ;;  %v10632_v61 = vld [vmem:[%s10714_s18 + $0x78] sm:$0xff] }
 0x179   : > { %v11536_v53 = vsub.f32 %v1794_v22, %v11530_v15  ;;  %v11538_v20 = vand.u32 4294901760, %v1803_v28  ;;  %9500 = vmatmul.mubr.f32.gmra.mxu0 %v1935_v41  ;;  %v1728_v6 = vpop.f32.mrf.mxu1  ;;  %9534 = vmatprep.mubr.f32.mxu1 %v11530_v15  ;;  %v1954_v59 = vsub.f32 %v11477_v1, %v1953_v51  ;;  %v1963_v46 = vand.u32 4294901760, %v11513_v17 }
 0x17a   : > { %v1800_v38 = vsel %vm1762_vm1, %v1750_v26, 0  ;;  %v1753_v39 = vadd.f32 %v10632_v61, %v1735_v14  ;;  %v1729_v54 = vadd.f32 %v1728_v6, %v1552_v16  ;;  %9502 = vmatprep.mubr.f32.mxu0 %v1945_v55  ;;  %9535 = vmatmul.mubr.f32.gmra.mxu1 %v11515_v27  ;;  %v1973_v29 = vand.u32 4294901760, %v11501_v57 }
 0x17b   : > { %v11550_v2 = vsub.f32 %v1803_v28, %v11538_v20  ;;  %v11552_v30 = vand.u32 4294901760, %v1800_v38  ;;  %v1955_v23 = vand.u32 4294901760, %v1954_v59  ;;  %v1964_v10 = vsub.f32 %v11513_v17, %v1963_v46 }
 0x17c   : > { %v1809_v11 = vsel %vm1762_vm1, %v1753_v39, 0  ;;  %v1752_v12 = vadd.f32 %v10633_v5, %v1729_v54  ;;  %v1974_v16 = vsub.f32 %v11501_v57, %v1973_v29  ;;  %v1983_v19 = vand.u32 4294901760, %v11536_v53 }
 0x17d   : > { %v11564_v22 = vsub.f32 %v1800_v38, %v11552_v30  ;;  %v11566_v58 = vand.u32 4294901760, %v1809_v11  ;;  %9503 = vmatmul.mubr.f32.gmra.mxu0 %v1955_v23  ;;  %v1965_v48 = vand.u32 4294901760, %v1964_v10  ;;  %9537 = vmatprep.mubr.f32.mxu1 %v11552_v30  ;;  %v1993_v63 = vand.u32 4294901760, %v11528_v50 }
 0x17e   : > { %v1806_v4 = vsel %vm1762_vm1, %v1752_v12, 0  ;;  %v1975_v41 = vand.u32 4294901760, %v1974_v16  ;;  %9538 = vmatmul.mubr.f32.gmra.mxu1 %v11538_v20  ;;  %v1984_v49 = vsub.f32 %v11536_v53, %v1983_v19  ;;  %v2013_v28 = vand.u32 4294901760, %v11550_v2 }
 0x17f   : > { %v11575_v43 = vsub.f32 %v1809_v11, %v11566_v58  ;;  %v11577_v26 = vand.u32 4294901760, %v1806_v4  ;;  %9505 = vmatprep.mubr.f32.mxu0 %v1965_v48  ;;  %v1994_v14 = vsub.f32 %v11528_v50, %v1993_v63  ;;  %v2003_v55 = vand.u32 4294901760, %v11564_v22 }
 0x180   : > { %v1985_v6 = vand.u32 4294901760, %v1984_v49  ;;  %v2014_v61 = vsub.f32 %v11550_v2, %v2013_v28 }
 0x181   : > { %v2022_v59 = vsub.f32 %v1806_v4, %v11577_v26  ;;  %9506 = vmatmul.mubr.f32.gmra.mxu0 %v1975_v41  ;;  %9540 = vmatprep.mubr.f32.mxu1 %v11577_v26  ;;  %v2004_v38 = vsub.f32 %v11564_v22, %v2003_v55  ;;  %v1995_v39 = vand.u32 4294901760, %v1994_v14  ;;  %v2033_v10 = vand.u32 4294901760, %v11575_v43 }
 0x182   : > { %9508 = vmatprep.mubr.f32.mxu0 %v1985_v6  ;;  %9541 = vmatmul.mubr.f32.gmra.mxu1 %v11566_v58  ;;  %v2015_v5 = vand.u32 4294901760, %v2014_v61 }
 0x183   : > { %9571 = vmatprep.mubr.f32.mxu1 %v1883_v34  ;;  %v2005_v54 = vand.u32 4294901760, %v2004_v38  ;;  %v2023_v23 = vand.u32 4294901760, %v2022_v59  ;;  %v2034_v16 = vsub.f32 %v11575_v43, %v2033_v10 }
 0x185   : > { %9509 = vmatmul.mubr.f32.gmra.mxu0 %v1995_v39  ;;  %v2024_v11 = vsub.f32 %v2022_v59, %v2023_v23  ;;  %v2035_v34 = vand.u32 4294901760, %v2034_v16 }
 0x186   : > { %9511 = vmatprep.mubr.f32.mxu0 %v2005_v54  ;;  %9572 = vmatmul.mubr.f32.vlgmr.msra.gmra.mxu1 %v1893_v21 }
 0x187   : > { %9574 = vmatprep.mubr.f32.mxu1 %v1903_v62  ;;  %v2025_v12 = vand.u32 4294901760, %v2024_v11  ;;  %9622 = vmatpush3.msra.mxu1 %v13998_v36 }
 0x189   : > { %9512 = vmatmul.mubr.f32.gmra.mxu0 %v2015_v5 }
 0x18a   : > { %9514 = vmatprep.mubr.f32.mxu0 %v2025_v12  ;;  %9575 = vmatmul.mubr.f32.gmra.mxu1 %v1913_v44 }
 0x18b   : > { %9577 = vmatprep.mubr.f32.mxu1 %v1923_v56 }
 0x18d   : > { %9515 = vmatmul.mubr.f32.gmra.mxu0 %v2035_v34 }
 0x18e   : > { %9545 = vmatprep.mubr.f32.mxu0 %v11420_v37  ;;  %9578 = vmatmul.mubr.f32.gmra.mxu1 %v1933_v47 }
 0x18f   : > { %9580 = vmatprep.mubr.f32.mxu1 %v1943_v33 }
 0x191   : > { %9546 = vmatmul.mubr.f32.vlgmr.msra.gmra.mxu0 %v11412_v18  ;;  %v14002_v18 = vld [vmem:[#allocation32_spill] sm:$0xff] }
 0x192   : > { %9548 = vmatprep.mubr.f32.mxu0 %v11442_v60  ;;  %9596 = vmatpush3.msra.mxu0 %v14000_v45 }
 0x193   : > { %9581 = vmatmul.mubr.f32.gmra.mxu1 %v1953_v51 }
 0x194   : > { %9583 = vmatprep.mubr.f32.mxu1 %v1963_v46 }
 0x195   : > { %9549 = vmatmul.mubr.f32.gmra.mxu0 %v11432_v0  ;;  %v11666_v0 = vld [vmem:[%s13700_s5] ss:$0 sm:$0xff] }
 0x196   : > { %9551 = vmatprep.mubr.f32.mxu0 %v11463_v8 }
 0x197   : > { %9584 = vmatmul.mubr.f32.gmra.mxu1 %v1973_v29 }
 0x198   : > { %9586 = vmatprep.mubr.f32.mxu1 %v1983_v19 }
 0x199   : > { %9552 = vmatmul.mubr.f32.gmra.mxu0 %v11454_v52 }
 0x19a   : > { %9554 = vmatprep.mubr.f32.mxu0 %v11489_v32 }
 0x19b   : > { %9587 = vmatmul.mubr.f32.gmra.mxu1 %v1993_v63 }
 0x19c   : > { %9589 = vmatprep.mubr.f32.mxu1 %v2003_v55 }
 0x19d   : > { %9555 = vmatmul.mubr.f32.gmra.mxu0 %v11477_v1 }
 0x19e   : > { %9557 = vmatprep.mubr.f32.mxu0 %v11513_v17 }
 0x19f   : > { %9590 = vmatmul.mubr.f32.gmra.mxu1 %v2013_v28 }
 0x1a0   : > { %9592 = vmatprep.mubr.f32.mxu1 %v2023_v23 }
 0x1a1   : > { %9558 = vmatmul.mubr.f32.gmra.mxu0 %v11501_v57 }
 0x1a2   : > { %9560 = vmatprep.mubr.f32.mxu0 %v11536_v53 }
 0x1a3   : > { %9593 = vmatmul.mubr.f32.gmra.mxu1 %v2033_v10 }
 0x1a4   : > { %9623 = vmatprep.mubr.f32.mxu1 %v11414_v25 }
 0x1a5   : > { %9561 = vmatmul.mubr.f32.gmra.mxu0 %v11528_v50 }
 0x1a6   : > { %9563 = vmatprep.mubr.f32.mxu0 %v11564_v22 }
 0x1a7   : > { %9624 = vmatmul.mubr.f32.vlgmr.msra.gmra.mxu1 %v11407_v35 }
 0x1a8   : > { %9626 = vmatprep.mubr.f32.mxu1 %v11434_v7 }
 0x1a9   : > { %9564 = vmatmul.mubr.f32.gmra.mxu0 %v11550_v2 }
 0x1aa   : > { %9566 = vmatprep.mubr.f32.mxu0 %v2022_v59 }
 0x1ab   : > { %9627 = vmatmul.mubr.f32.gmra.mxu1 %v11422_v31 }
 0x1ac   : > { %9629 = vmatprep.mubr.f32.mxu1 %v11456_v3 }
 0x1ad   : > { %9567 = vmatmul.mubr.f32.gmra.mxu0 %v11575_v43 }
 0x1ae   : > { %9597 = vmatprep.mubr.f32.mxu0 %v11414_v25 }
 0x1af   : > { %9630 = vmatmul.mubr.f32.gmra.mxu1 %v11444_v42 }
 0x1b0   : > { %9632 = vmatprep.mubr.f32.mxu1 %v11479_v40 }
 0x1b1   : > { %9598 = vmatmul.mubr.f32.vlgmr.msra.gmra.mxu0 %v11407_v35  ;;  %v14001_v35 = vld [vmem:[#allocation9_spill] sm:$0xff] }
 0x1b2   : > { %9600 = vmatprep.mubr.f32.mxu0 %v11434_v7 }
 0x1b3   : > { %9633 = vmatmul.mubr.f32.gmra.mxu1 %v11465_v9 }
 0x1b4   : > { %9635 = vmatprep.mubr.f32.mxu1 %v11503_v24 }
 0x1b5   : > { %9601 = vmatmul.mubr.f32.gmra.mxu0 %v11422_v31 }
 0x1b6   : > { %9603 = vmatprep.mubr.f32.mxu0 %v11456_v3 }
 0x1b7   : > { %9636 = vmatmul.mubr.f32.gmra.mxu1 %v11491_v13 }
 0x1b8   : > { %9638 = vmatprep.mubr.f32.mxu1 %v11530_v15 }
 0x1b9   : > { %9604 = vmatmul.mubr.f32.gmra.mxu0 %v11444_v42 }
 0x1ba   : > { %9606 = vmatprep.mubr.f32.mxu0 %v11479_v40 }
 0x1bb   : > { %9639 = vmatmul.mubr.f32.gmra.mxu1 %v11515_v27 }
 0x1bc   : > { %9641 = vmatprep.mubr.f32.mxu1 %v11552_v30 }
 0x1bd   : > { %9607 = vmatmul.mubr.f32.gmra.mxu0 %v11465_v9 }
 0x1be   : > { %9609 = vmatprep.mubr.f32.mxu0 %v11503_v24 }
 0x1bf   : > { %9642 = vmatmul.mubr.f32.gmra.mxu1 %v11538_v20 }
 0x1c0   : > { %9644 = vmatprep.mubr.f32.mxu1 %v11577_v26 }
 0x1c1   : > { %9610 = vmatmul.mubr.f32.gmra.mxu0 %v11491_v13 }
 0x1c2   : > { %9612 = vmatprep.mubr.f32.mxu0 %v11530_v15 }
 0x1c3   : > { %9645 = vmatmul.mubr.f32.gmra.mxu1 %v11566_v58 }
 0x1c4   : > { %9735 = vmatprep.mubr.f32.mxu1 %v14001_v35 }
 0x1c5   : > { %9613 = vmatmul.mubr.f32.gmra.mxu0 %v11515_v27 }
 0x1c6   : > { %9615 = vmatprep.mubr.f32.mxu0 %v11552_v30 }
 0x1c9   : > { %9616 = vmatmul.mubr.f32.gmra.mxu0 %v11538_v20 }
 0x1ca   : > { %9618 = vmatprep.mubr.f32.mxu0 %v11577_v26 }
 0x1cd   : > { %9619 = vmatmul.mubr.f32.gmra.mxu0 %v11566_v58 }
 0x1ce   : > { %9679 = vmatprep.mubr.f32.mxu0 %v14002_v18 }
 0x226   : > { %v9521_v25 = vpop.f32.mrf.mxu1 }
 0x228   : > { %v11659_v21 = vpop.f32.mrf.mxu1 }
 0x22a   : > { %v9524_v37 = vpop.f32.mrf.mxu1 }
 0x22c   : > { %v11661_v31 = vpop.f32.mrf.mxu1 }
 0x22e   : > { %v9527_v7 = vpop.f32.mrf.mxu1 }
 0x22f   : > { %v9495_v36 = vpop.f32.mrf.mxu0 }
 0x230   : > { %v1898_v60 = vadd.f32 %v9495_v36, %v11666_v0  ;;  %v11669_v42 = vpop.f32.mrf.mxu1 }
 0x231   : > { %v11671_v52 = vpop.f32.mrf.mxu0 }
 0x232   : > { %v9530_v3 = vpop.f32.mrf.mxu1  ;;  %v2120_v62 = vadd.f32 %v9521_v25, %v1898_v60 }
 0x234   : > { %v9498_v8 = vpop.f32.mrf.mxu0  ;;  %v11673_v9 = vpop.f32.mrf.mxu1 }
 0x235   : > { %v1918_v44 = vadd.f32 %v9498_v8, %v11666_v0 }
 0x236   : > { %v11676_v1 = vpop.f32.mrf.mxu0  ;;  %v9533_v40 = vpop.f32.mrf.mxu1 }
 0x237   : > { %v2132_v32 = vadd.f32 %v9524_v37, %v1918_v44 }
 0x238   : > { %v11678_v13 = vpop.f32.mrf.mxu1 }
 0x239   : > { %v9501_v56 = vpop.f32.mrf.mxu0 }
 0x23a   : > { %v1938_v45 = vadd.f32 %v9501_v56, %v11666_v0  ;;  %v9536_v57 = vpop.f32.mrf.mxu1 }
 0x23b   : > { %v11681_v24 = vpop.f32.mrf.mxu0 }
 0x23c   : > { %v11683_v47 = vpop.f32.mrf.mxu1  ;;  %v2144_v33 = vadd.f32 %v9527_v7, %v1938_v45 }
 0x23d   : > { %v9504_v17 = vpop.f32.mrf.mxu0 }
 0x23e   : > { %v1958_v27 = vadd.f32 %v9504_v17, %v11666_v0  ;;  %v9539_v50 = vpop.f32.mrf.mxu1 }
 0x23f   : > { %v11686_v15 = vpop.f32.mrf.mxu0 }
 0x240   : > { %v11688_v51 = vpop.f32.mrf.mxu1  ;;  %v11690_v53 = vadd.f32 %v9530_v3, %v1958_v27 }
 0x241   : > { %v9507_v20 = vpop.f32.mrf.mxu0 }
 0x242   : > { %v1978_v46 = vadd.f32 %v9507_v20, %v11666_v0  ;;  %v11693_v29 = vpop.f32.mrf.mxu1 }
 0x243   : > { %v11695_v2 = vpop.f32.mrf.mxu0 }
 0x244   : > { %v11697_v30 = vpop.f32.mrf.mxu1  ;;  %v11699_v19 = vadd.f32 %v9533_v40, %v1978_v46 }
 0x245   : > { %v9510_v22 = vpop.f32.mrf.mxu0 }
 0x246   : > { %v1998_v58 = vadd.f32 %v9510_v22, %v11666_v0  ;;  %v9573_v48 = vpop.f32.mrf.mxu1 }
 0x247   : > { %v11702_v63 = vpop.f32.mrf.mxu0 }
 0x248   : > { %v11704_v4 = vpop.f32.mrf.mxu1  ;;  %v11706_v41 = vadd.f32 %v9536_v57, %v1998_v58 }
 0x249   : > { %v9513_v49 = vpop.f32.mrf.mxu0 }
 0x24a   : > { %v2018_v28 = vadd.f32 %v9513_v49, %v11666_v0  ;;  %v9576_v43 = vpop.f32.mrf.mxu1 }
 0x24b   : > { %v11709_v26 = vpop.f32.mrf.mxu0 }
 0x24c   : > { %v11711_v14 = vpop.f32.mrf.mxu1  ;;  %v11713_v55 = vadd.f32 %v9539_v50, %v2018_v28 }
 0x24d   : > { %v11715_v6 = vpop.f32.mrf.mxu0 }
 0x24e   : > { %v9579_v59 = vpop.f32.mrf.mxu1 }
 0x24f   : > { %v11717_v38 = vpop.f32.mrf.mxu0 }
 0x250   : > { %v11719_v61 = vpop.f32.mrf.mxu1 }
 0x251   : > { %v9547_v39 = vpop.f32.mrf.mxu0 }
 0x252   : > { %v2285_v54 = vadd.f32 %v9547_v39, %v2120_v62 }
 0x253   : > { %v11721_v23 = vpop.f32.mrf.mxu0  ;;  %v11723_v10 = vpop.f32.mrf.mxu1 }
 0x254   : > { %v11725_v11 = vadd.f32 %v9573_v48, %v2285_v54 }
 0x255   : > { %v9550_v5 = vpop.f32.mrf.mxu0  ;;  %v11727_v12 = vpop.f32.mrf.mxu1 }
 0x256   : > { %v2299_v16 = vadd.f32 %v9550_v5, %v2132_v32 }
 0x257   : > { %v2291_v34 = vpop.f32.mrf.mxu0  ;;  %v11729_v18 = vpop.f32.mrf.mxu1 }
 0x258   : > { %v11731_v25 = vadd.f32 %v9576_v43, %v2299_v16 }
 0x259   : > { %v9553_v37 = vpop.f32.mrf.mxu0  ;;  %v11733_v7 = vpop.f32.mrf.mxu1 }
 0x25a   : > { %v2313_v36 = vadd.f32 %v9553_v37, %v2144_v33 }
 0x25b   : > { %v2305_v60 = vpop.f32.mrf.mxu0  ;;  %v11735_v3 = vpop.f32.mrf.mxu1 }
 0x25c   : > { %v11737_v62 = vadd.f32 %v9579_v59, %v2313_v36 }
 0x25d   : > { %v9556_v8 = vpop.f32.mrf.mxu0  ;;  %v11739_v44 = vpop.f32.mrf.mxu1 }
 0x25e   : > { %14003 = vst [vmem:[#allocation10_spill] sm:$0xff] %v11737_v62 }
 0x25f   : > { %v2319_v40 = vpop.f32.mrf.mxu0  ;;  %v11741_v56 = vpop.f32.mrf.mxu1 }
 0x261   : > { %v9559_v32 = vpop.f32.mrf.mxu0  ;;  %v11743_v45 = vpop.f32.mrf.mxu1 }
 0x262   : > { %14004 = vst [vmem:[#allocation12_spill] sm:$0xff] %v11743_v45 }
 0x263   : > { %v2333_v57 = vpop.f32.mrf.mxu0  ;;  %v11745_v17 = vpop.f32.mrf.mxu1 }
 0x264   : > { %14005 = vst [vmem:[#allocation14_spill] sm:$0xff] %v11745_v17 }
 0x265   : > { %v9562_v27 = vpop.f32.mrf.mxu0  ;;  %v11747_v50 = vpop.f32.mrf.mxu1 }
 0x266   : > { %14006 = vst [vmem:[#allocation18_spill] sm:$0xff] %v11747_v50  ;;  %v1948_v50 = vadd.f32 %v11666_v0, %v11686_v15 }
 0x267   : > { %v2347_v33 = vpop.f32.mrf.mxu0  ;;  %v11749_v20 = vpop.f32.mrf.mxu1 }
 0x268   : > { %14007 = vst [vmem:[#allocation23_spill] sm:$0xff] %v11749_v20 }
 0x269   : > { %v9565_v46 = vpop.f32.mrf.mxu0  ;;  %v11751_v22 = vpop.f32.mrf.mxu1 }
 0x26a   : > { %14008 = vst [vmem:[#allocation26_spill] sm:$0xff] %v11751_v22 }
 0x26b   : > { %v2361_v58 = vpop.f32.mrf.mxu0  ;;  %v11753_v48 = vpop.f32.mrf.mxu1 }
 0x26c   : > { %14009 = vst [vmem:[#allocation29_spill] sm:$0xff] %v11753_v48  ;;  %v1888_v48 = vadd.f32 %v11666_v0, %v11671_v52 }
 0x26d   : > { %v9568_v49 = vpop.f32.mrf.mxu0  ;;  %v11755_v28 = vpop.f32.mrf.mxu1 }
 0x26e   : > { %14010 = vst [vmem:[#allocation36_spill] sm:$0xff] %v11755_v28  ;;  %v2114_v52 = vadd.f32 %v11659_v21, %v1888_v48 }
 0x26f   : > { %v2375_v43 = vpop.f32.mrf.mxu0  ;;  %v11757_v59 = vpop.f32.mrf.mxu1 }
 0x270   : > { %14011 = vst [vmem:[#allocation4_spill] sm:$0xff] %v11757_v59  ;;  %v1908_v59 = vadd.f32 %v11666_v0, %v11676_v1 }
 0x271   : > { %v9599_v39 = vpop.f32.mrf.mxu0  ;;  %v11759_v54 = vpop.f32.mrf.mxu1 }
 0x272   : > { %14012 = vst [vmem:[#allocation5_spill] sm:$0xff] %v11759_v54  ;;  %v1928_v54 = vadd.f32 %v11666_v0, %v11681_v24  ;;  %v2126_v1 = vadd.f32 %v11661_v31, %v1908_v59  ;;  %v2150_v24 = vadd.f32 %v11673_v9, %v1948_v50  ;;  %v2278_v31 = vadd.f32 %v11721_v23, %v2114_v52  ;;  %v14020_v52 = vld [vmem:[#allocation14_spill] sm:$0xff] }
 0x273   : > { %v11761_v5 = vpop.f32.mrf.mxu0  ;;  %v11763_v16 = vpop.f32.mrf.mxu1  ;;  %v2327_v9 = vadd.f32 %v9556_v8, %v11690_v53  ;;  %v2355_v50 = vadd.f32 %v9562_v27, %v11706_v41 }
 0x274   : > { %14013 = vst [vmem:[#allocation6_spill] sm:$0xff] %v11761_v5  ;;  %14014 = vst [vmem:[#allocation7_spill] sm:$0xff] %v11763_v16  ;;  %v1968_v5 = vadd.f32 %v11666_v0, %v11695_v2  ;;  %v2138_v17 = vadd.f32 %v11669_v42, %v1928_v54  ;;  %v2008_v2 = vadd.f32 %v11666_v0, %v11709_v26 }
 0x275   : > { %v9602_v37 = vpop.f32.mrf.mxu0  ;;  %v11765_v36 = vpop.f32.mrf.mxu1  ;;  %v2292_v42 = vadd.f32 %v2291_v34, %v2126_v1  ;;  %v2341_v26 = vadd.f32 %v9559_v32, %v11699_v19  ;;  %v2457_v53 = vadd.f32 %v11704_v4, %v2278_v31  ;;  %v2513_v19 = vadd.f32 %v11723_v10, %v2327_v9 }
 0x276   : > { %14015 = vst [vmem:[#allocation8_spill] sm:$0xff] %v11765_v36  ;;  %v2162_v15 = vadd.f32 %v11678_v13, %v1968_v5  ;;  %v2306_v59 = vadd.f32 %v2305_v60, %v2138_v17  ;;  %v2320_v13 = vadd.f32 %v2319_v40, %v2150_v24 }
 0x277   : > { %v2662_v35 = vpop.f32.mrf.mxu0  ;;  %v11767_v22 = vpop.f32.mrf.mxu1  ;;  %v2473_v60 = vadd.f32 %v11711_v14, %v2292_v42  ;;  %v14026_v42 = vld [vmem:[#allocation36_spill] sm:$0xff] }
 0x278   : > { %14016 = vst [vmem:[#allocation2_spill] sm:$0xff] %v11767_v22  ;;  %v1988_v22 = vadd.f32 %v11666_v0, %v11702_v63  ;;  %v2028_v63 = vadd.f32 %v11666_v0, %v11717_v38  ;;  %v2334_v5 = vadd.f32 %v2333_v57, %v2162_v15  ;;  %v2489_v41 = vadd.f32 %v11719_v61, %v2306_v59  ;;  %v14022_v15 = vld [vmem:[#allocation23_spill] sm:$0xff] }
 0x279   : > { %v9605_v28 = vpop.f32.mrf.mxu0  ;;  %v11779_v36 = vpop.f32.mrf.mxu1  ;;  %v2505_v32 = vadd.f32 %v11727_v12, %v2320_v13  ;;  %v2657_v61 = vadd.f32 %v9599_v39, %v11725_v11  ;;  %v2669_v12 = vadd.f32 %v9602_v37, %v11731_v25 }
 0x27a   : > { %14017 = vst [vmem:[#allocation17_spill] sm:$0xff] %v11779_v36  ;;  %v2038_v36 = vadd.f32 %v11715_v6, %v11666_v0  ;;  %v2174_v21 = vadd.f32 %v11683_v47, %v1988_v22  ;;  %v2369_v0 = vadd.f32 %v9565_v46, %v11713_v55  ;;  %v2186_v47 = vadd.f32 %v11688_v51, %v2008_v2  ;;  %v14024_v2 = vld [vmem:[#allocation18_spill] sm:$0xff] }
 0x27b   : > { %v2674_v20 = vpop.f32.mrf.mxu0  ;;  %v9640_v45 = vpop.f32.mrf.mxu1  ;;  %v2198_v23 = vadd.f32 %v11697_v30, %v2028_v63  ;;  %v2545_v55 = vadd.f32 %v11735_v3, %v2355_v50  ;;  %v2521_v17 = vadd.f32 %v11733_v7, %v2334_v5  ;;  %v2663_v46 = vadd.f32 %v2662_v35, %v2473_v60  ;;  %v14018_v3 = vld [vmem:[#allocation10_spill] sm:$0xff]  ;;  %v14028_v50 = vld [vmem:[#allocation5_spill] sm:$0xff] }
 0x27c   : > { %v2348_v6 = vadd.f32 %v2347_v33, %v2174_v21  ;;  %v2204_v38 = vadd.f32 %v11693_v29, %v2038_v36  ;;  %v2362_v8 = vadd.f32 %v2361_v58, %v2186_v47  ;;  %v2529_v29 = vadd.f32 %v11729_v18, %v2341_v26  ;;  %v14019_v36 = vld [vmem:[#allocation12_spill] sm:$0xff]  ;;  %v14023_v35 = vld [vmem:[#allocation6_spill] sm:$0xff]  ;;  %v14025_v21 = vld [vmem:[#allocation29_spill] sm:$0xff] }
 0x27d   : > { %v9608_v16 = vpop.f32.mrf.mxu0  ;;  %v2872_v62 = vpop.f32.mrf.mxu1  ;;  %v2376_v14 = vadd.f32 %v2375_v43, %v2198_v23  ;;  %v2561_v33 = vadd.f32 %v11741_v56, %v2369_v0  ;;  %v2681_v22 = vadd.f32 %v9605_v28, %v14018_v3  ;;  %v14021_v43 = vld [vmem:[#allocation7_spill] sm:$0xff]  ;;  %v11822_v25 = vadd.f32 %v14022_v15, %v2657_v61  ;;  %v14030_v47 = vld [vmem:[#allocation8_spill] sm:$0xff] }
 0x27e   : > { %v2383_v40 = vadd.f32 %v9568_v49, %v2204_v38  ;;  %v2693_v57 = vadd.f32 %v9608_v16, %v2513_v19  ;;  %v2537_v4 = vadd.f32 %v11739_v44, %v2348_v6  ;;  %v2675_v49 = vadd.f32 %v2674_v20, %v2489_v41 }
 0x27f   : > { %v2686_v48 = vpop.f32.mrf.mxu0  ;;  %v9643_v30 = vpop.f32.mrf.mxu1  ;;  %v2553_v7 = vadd.f32 %v14019_v36, %v2362_v8  ;;  %v11825_v28 = vadd.f32 %v14023_v35, %v2457_v53  ;;  %v2569_v63 = vadd.f32 %v14024_v2, %v2376_v14  ;;  %v11829_v31 = vadd.f32 %v14025_v21, %v2669_v12  ;;  %v14029_v26 = vld [vmem:[#allocation2_spill] sm:$0xff] }
 0x280   : > { %v2577_v44 = vadd.f32 %v14020_v52, %v2383_v40  ;;  %v11819_v1 = vadd.f32 %v14021_v43, %v2693_v57  ;;  %v2687_v11 = vadd.f32 %v2686_v48, %v2505_v32  ;;  %v11832_v59 = vadd.f32 %v14026_v42, %v2663_v46  ;;  %v14027_v48 = vld [vmem:[#allocation4_spill] sm:$0xff] }
 0x281   : > { %v9611_v54 = vpop.f32.mrf.mxu0  ;;  %v2884_v24 = vpop.f32.mrf.mxu1  ;;  %v11835_v9 = vadd.f32 %v14027_v48, %v2681_v22  ;;  %v14031_v23 = vld [vmem:[#allocation17_spill] sm:$0xff]  ;;  %vm2909_vm11 = vcmp.gt.f32.partialorder %v11829_v31, 0.0  ;;  %vm2907_vm1 = vcmp.gt.f32.partialorder %v11822_v25, 0.0 }
 0x282   : > { %v2705_v18 = vadd.f32 %v9611_v54, %v2529_v29  ;;  %v11838_v54 = vadd.f32 %v14028_v50, %v2675_v49  ;;  %vm2913_vm2 = vcmp.gt.f32.partialorder %v11819_v1, 0.0  ;;  %v2849_v38 = vadd.f32 %v14030_v47, %v2687_v11 }
 0x283   : > { %v2698_v34 = vpop.f32.mrf.mxu0  ;;  %v9646_v53 = vpop.f32.mrf.mxu1  ;;  %vm2911_vm13 = vcmp.gt.f32.partialorder %v11835_v9, 0.0  ;;  %vm2908_vm15 = vcmp.gt.f32.partialorder %v11832_v59, 0.0 }
 0x284   : > { %v2699_v39 = vadd.f32 %v2698_v34, %v2521_v17  ;;  %v2867_v5 = vadd.f32 %v14029_v26, %v2705_v18  ;;  %vm2912_vm12 = vcmp.gt.f32.partialorder %v2849_v38, 0.0  ;;  %v2928_v36 = vmul.f32 0.0001, %v2849_v38 }
 0x285   : > { %v9614_v51 = vpop.f32.mrf.mxu0  ;;  %vm2910_vm14 = vcmp.gt.f32.partialorder %v11838_v54, 0.0  ;;  %v2926_v2 = vmul.f32 0.0001, %v11838_v54  ;;  %v2925_v26 = vmul.f32 0.0001, %v11829_v31 }
 0x286   : > { %v2717_v27 = vadd.f32 %v9614_v51, %v2545_v55  ;;  %v2861_v34 = vadd.f32 %v14031_v23, %v2699_v39  ;;  %vm2915_vm5 = vcmp.gt.f32.partialorder %v2867_v5, 0.0  ;;  %v2931_v51 = vmul.f32 0.0001, %v2867_v5 }
 0x287   : > { %v2710_v10 = vpop.f32.mrf.mxu0  ;;  %v2924_v23 = vmul.f32 0.0001, %v11832_v59 }
 0x288   : > { %v2711_v58 = vadd.f32 %v2710_v10, %v2537_v4  ;;  %v2879_v20 = vadd.f32 %v9640_v45, %v2717_v27  ;;  %v2930_v29 = vmul.f32 0.0001, %v2861_v34  ;;  %v2929_v10 = vmul.f32 0.0001, %v11819_v1 }
 0x289   : > { %v9617_v16 = vpop.f32.mrf.mxu0  ;;  %vm2914_vm9 = vcmp.gt.f32.partialorder %v2861_v34, 0.0 }
 0x28a   : > { %v2729_v56 = vadd.f32 %v9617_v16, %v2561_v33  ;;  %v2873_v13 = vadd.f32 %v2872_v62, %v2711_v58  ;;  %vm2917_vm3 = vcmp.gt.f32.partialorder %v2879_v20, 0.0  ;;  %v2933_v41 = vmul.f32 0.0001, %v2879_v20 }
 0x28b   : > { %v2722_v37 = vpop.f32.mrf.mxu0  ;;  %v11864_v58 = vsel %vm2915_vm5, %v2867_v5, %v2931_v51 }
 0x28c   : > { %v2891_v6 = vadd.f32 %v9643_v30, %v2729_v56  ;;  %v2723_v45 = vadd.f32 %v2722_v37, %v2553_v7  ;;  %v2932_v8 = vmul.f32 0.0001, %v2873_v13  ;;  %vm2916_vm6 = vcmp.gt.f32.partialorder %v2873_v13, 0.0  ;;  %v2896_v30 = vpop.f32.mrf.mxu1  ;;  %14037 = vst [vmem:[#allocation7_spill] sm:$0xff] %v11864_v58 }
 0x28d   : > { %v9620_v0 = vpop.f32.mrf.mxu0  ;;  %v11850_v14 = vsel %vm2917_vm3, %v2879_v20, %v2933_v41  ;;  %v11876_v7 = vsel %vm2914_vm9, %v2861_v34, %v2930_v29  ;;  %v11900_v56 = vsel %vm2913_vm2, %v11819_v1, %v2929_v10  ;;  %v11903_v15 = vand.u32 4294901760, %v11864_v58 }
 0x28e   : > { %v2741_v60 = vadd.f32 %v9620_v0, %v2577_v44  ;;  %vm2919_vm4 = vcmp.gt.f32.partialorder %v2891_v6, 0.0  ;;  %v2935_v62 = vmul.f32 0.0001, %v2891_v6  ;;  %v2885_v40 = vadd.f32 %v2884_v24, %v2723_v45  ;;  %14033 = vst [vmem:[#allocation32_spill] sm:$0xff] %v11850_v14  ;;  %14038 = vst [vmem:[#allocation23_spill] sm:$0xff] %v11876_v7 }
 0x28f   : > { %v2734_v19 = vpop.f32.mrf.mxu0  ;;  %v11853_v33 = vsel %vm2916_vm6, %v2873_v13, %v2932_v8  ;;  %v11867_v49 = vand.u32 4294901760, %v11850_v14  ;;  %v2927_v24 = vmul.f32 0.0001, %v11835_v9  ;;  %14040 = vst [vmem:[#allocation18_spill] sm:$0xff] %v11900_v56  ;;  %v11927_v21 = vand.u32 4294901760, %v11876_v7 }
 0x290   : > { %v2903_v32 = vadd.f32 %v9646_v53, %v2741_v60  ;;  %v2735_v55 = vadd.f32 %v2734_v19, %v2569_v63  ;;  %v11844_v57 = vsel %vm2919_vm4, %v2891_v6, %v2935_v62  ;;  %vm2918_vm7 = vcmp.gt.f32.partialorder %v2885_v40, 0.0  ;;  %14034 = vst [vmem:[#allocation10_spill] sm:$0xff] %v11853_v33 }
 0x291   : > { %14032 = vst [vmem:[#allocation3_spill] sm:$0xff] %v11844_v57  ;;  %v11847_v17 = vand.u32 4294901760, %v11844_v57  ;;  %v2934_v4 = vmul.f32 0.0001, %v2885_v40  ;;  %v11881_v44 = vand.u32 4294901760, %v11853_v33  ;;  %v11908_v35 = vsub.f32 %v11850_v14, %v11867_v49 }
 0x292   : > { %vm2921_vm8 = vcmp.gt.f32.partialorder %v2903_v32, 0.0  ;;  %v2937_v61 = vmul.f32 0.0001, %v2903_v32  ;;  %v2897_v27 = vadd.f32 %v2896_v30, %v2735_v55  ;;  %v11924_v63 = vsel %vm2912_vm12, %v2849_v38, %v2928_v36 }
 0x293   : > { %v11855_v12 = vsel %vm2918_vm7, %v2885_v40, %v2934_v4  ;;  %v11871_v18 = vsub.f32 %v11844_v57, %v11847_v17  ;;  %14041 = vst [vmem:[#allocation29_spill] sm:$0xff] %v11924_v63  ;;  %v11932_v42 = vsub.f32 %v11853_v33, %v11881_v44  ;;  %v11947_v5 = vsel %vm2911_vm13, %v11835_v9, %v2927_v24 }
 0x294   : > { %14035 = vst [vmem:[#allocation12_spill] sm:$0xff] %v11855_v12  ;;  %v11858_v46 = vand.u32 4294901760, %v11855_v12  ;;  %v11860_v3 = vsel %vm2921_vm8, %v2903_v32, %v2937_v61  ;;  %vm2920_vm10 = vcmp.gt.f32.partialorder %v2897_v27, 0.0  ;;  %v2936_v22 = vmul.f32 0.0001, %v2897_v27  ;;  %14042 = vst [vmem:[#allocation36_spill] sm:$0xff] %v11947_v5 }
 0x295   : > { %14036 = vst [vmem:[#allocation14_spill] sm:$0xff] %v11860_v3  ;;  %v11874_v16 = vand.u32 4294901760, %v11860_v3  ;;  %v11919_v1 = vand.u32 4294901760, %v11871_v18  ;;  %v11950_v6 = vand.u32 4294901760, %v11900_v56  ;;  %v11954_v45 = vsub.f32 %v11864_v58, %v11903_v15 }
 0x296   : > { %v11878_v52 = vsel %vm2920_vm10, %v2897_v27, %v2936_v22  ;;  %v11885_v43 = vsub.f32 %v11855_v12, %v11858_v46  ;;  %v11963_v9 = vand.u32 4294901760, %v11908_v35  ;;  %v11970_v34 = vsel %vm2910_vm14, %v11838_v54, %v2926_v2  ;;  %v14044_v54 = vld [vmem:[#allocation26_spill] sm:$0xff] }
 0x297   : > { %14039 = vst [vmem:[#allocation6_spill] sm:$0xff] %v11878_v52  ;;  %v11889_v11 = vsub.f32 %v11860_v3, %v11874_v16  ;;  %v11892_v39 = vand.u32 4294901760, %v11878_v52  ;;  %9647 = vmatprep.subr.mxu0 %v11874_v16  ;;  %v3213_v38 = vsub.f32 %v11871_v18, %v11919_v1  ;;  %14043 = vst [vmem:[#allocation4_spill] sm:$0xff] %v11970_v34  ;;  %v11973_v53 = vand.u32 4294901760, %v11924_v63 }
 0x298   : > { %9648 = vmatpush3.msra.mxu0 %v11874_v16  ;;  %v11941_v50 = vand.u32 4294901760, %v11885_v43  ;;  %v11978_v60 = vsub.f32 %v11876_v7, %v11927_v21  ;;  %v11984_v19 = vand.u32 4294901760, %v11932_v42  ;;  %v2813_v8 = vadd.f32 %v14044_v54, %v11825_v28 }
 0x299   : > { %v11912_v20 = vsub.f32 %v11878_v52, %v11892_v39  ;;  %9649 = vmatprep.subr.mxu0 %v11892_v39  ;;  %v11916_v37 = vand.u32 4294901760, %v11889_v11  ;;  %v11991_v40 = vsel %vm2909_vm11, %v11829_v31, %v2925_v26  ;;  %v11994_v32 = vand.u32 4294901760, %v11947_v5 }
 0x29a   : > { %9650 = vmatpush3.msra.mxu0 %v11892_v39  ;;  %v3220_v62 = vsub.f32 %v11885_v43, %v11941_v50  ;;  %14045 = vst [vmem:[#allocation5_spill] sm:$0xff] %v11991_v40  ;;  %v11999_v55 = vsub.f32 %v11900_v56, %v11950_v6  ;;  %v3214_v51 = vand.u32 4294901760, %v3213_v38  ;;  %v3227_v28 = vsub.f32 %v11908_v35, %v11963_v9 }
 0x29b   : > { %9651 = vmatprep.subr.mxu0 %v11847_v17  ;;  %v3199_v48 = vsub.f32 %v11889_v11, %v11916_v37  ;;  %v11938_v13 = vand.u32 4294901760, %v11912_v20  ;;  %v12005_v31 = vand.u32 4294901760, %v11954_v45  ;;  %v2923_v29 = vmul.f32 0.0001, %v11822_v25 }
 0x29c   : > { %9652 = vmatpush3.msra.mxu0 %v11847_v17  ;;  %v12012_v30 = vsel %vm2908_vm15, %v11832_v59, %v2924_v23  ;;  %v12015_v4 = vand.u32 4294901760, %v11970_v34  ;;  %v12020_v61 = vsub.f32 %v11924_v63, %v11973_v53  ;;  %v3221_v27 = vand.u32 4294901760, %v3220_v62 }
 0x29d   : > { %9653 = vmatprep.subr.mxu0 %v11858_v46  ;;  %v3200_v0 = vand.u32 4294901760, %v3199_v48  ;;  %v3206_v47 = vsub.f32 %v11912_v20, %v11938_v13  ;;  %14046 = vst [vmem:[#allocation2_spill] sm:$0xff] %v12012_v30  ;;  %v3234_v10 = vsub.f32 %v11932_v42, %v11984_v19  ;;  %v12026_v59 = vand.u32 4294901760, %v11978_v60 }
 0x29e   : > { %9654 = vmatpush3.msra.mxu0 %v11858_v46  ;;  %vm2906_vm2 = vcmp.gt.f32.partialorder %v2813_v8, 0.0  ;;  %v2922_v22 = vmul.f32 0.0001, %v2813_v8  ;;  %v12029_v36 = vand.u32 4294901760, %v11991_v40  ;;  %v12034_v24 = vsub.f32 %v11947_v5, %v11994_v32 }
 0x29f   : > { %9655 = vmatprep.subr.mxu0 %v11867_v49  ;;  %9703 = vmatprep.subr.mxu1 %v3200_v0  ;;  %v3207_v41 = vand.u32 4294901760, %v3206_v47  ;;  %v3228_v2 = vand.u32 4294901760, %v3227_v28  ;;  %v3241_v48 = vsub.f32 %v11954_v45, %v12005_v31  ;;  %v12040_v26 = vand.u32 4294901760, %v11999_v55 }
 0x2a0   : > { %9656 = vmatpush3.msra.mxu0 %v11867_v49  ;;  %9704 = vmatpush3.msra.mxu1 %v3200_v0  ;;  %v12045_v0 = vsel %vm2907_vm1, %v11822_v25, %v2923_v29  ;;  %v12048_v47 = vand.u32 4294901760, %v12012_v30  ;;  %v12053_v38 = vsub.f32 %v11970_v34, %v12015_v4  ;;  %v3235_v23 = vand.u32 4294901760, %v3234_v10 }
 0x2a1   : > { %9657 = vmatprep.subr.mxu0 %v11881_v44  ;;  %9705 = vmatprep.subr.mxu1 %v3207_v41  ;;  %14047 = vst [vmem:[#allocation8_spill] sm:$0xff] %v12045_v0  ;;  %v12059_v25 = vand.u32 4294901760, %v12020_v61  ;;  %v12062_v62 = vsel %vm2906_vm2, %v2813_v8, %v2922_v22  ;;  %v12067_v54 = vsub.f32 %v11991_v40, %v12029_v36  ;;  %v12073_v29 = vand.u32 4294901760, %v12034_v24 }
 0x2a2   : > { %9658 = vmatpush3.msra.mxu0 %v11881_v44  ;;  %9706 = vmatpush3.msra.mxu1 %v3207_v41  ;;  %v3248_v41 = vsub.f32 %v11978_v60, %v12026_v59  ;;  %14048 = vst [vmem:[#allocation17_spill] sm:$0xff] %v12062_v62  ;;  %v3255_v28 = vsub.f32 %v11999_v55, %v12040_v26  ;;  %v12076_v8 = vand.u32 4294901760, %v12045_v0  ;;  %vm4266_vm3 = vcmask 162816  }
 0x2a3   : > { %9659 = vmatprep.subr.mxu0 %v11903_v15  ;;  %9707 = vmatprep.subr.mxu1 %v3214_v51  ;;  %v3262_v22 = vsub.f32 %v12020_v61, %v12059_v25  ;;  %v3269_v52 = vsub.f32 %v12034_v24, %v12073_v29 }
 0x2a4   : > { %9660 = vmatpush3.msra.mxu0 %v11903_v15  ;;  %9708 = vmatpush3.msra.mxu1 %v3214_v51  ;;  %v3242_v51 = vand.u32 4294901760, %v3241_v48  ;;  %v3249_v10 = vand.u32 4294901760, %v3248_v41  ;;  %v12090_v48 = vand.u32 4294901760, %v12062_v62  ;;  %v12097_v41 = vand.u32 4294901760, %v12067_v54 }
 0x2a5   : > { %9661 = vmatprep.subr.mxu0 %v11927_v21  ;;  %9709 = vmatprep.subr.mxu1 %v3221_v27  ;;  %v12101_v3 = vsub.f32 %v12045_v0, %v12076_v8 }
 0x2a6   : > { %9662 = vmatpush3.msra.mxu0 %v11927_v21  ;;  %9710 = vmatpush3.msra.mxu1 %v3221_v27  ;;  %v12081_v27 = vsub.f32 %v12012_v30, %v12048_v47  ;;  %v12112_v57 = vsub.f32 %v12062_v62, %v12090_v48 }
 0x2a7   : > { %9663 = vmatprep.subr.mxu0 %v11950_v6  ;;  %9711 = vmatprep.subr.mxu1 %v3228_v2  ;;  %v12120_v33 = vand.u32 4294901760, %v12101_v3 }
 0x2a8   : > { %9664 = vmatpush3.msra.mxu0 %v11950_v6  ;;  %9712 = vmatpush3.msra.mxu1 %v3228_v2  ;;  %v12087_v2 = vand.u32 4294901760, %v12053_v38  ;;  %v12108_v12 = vand.u32 4294901760, %v12081_v27 }
 0x2a9   : > { %9665 = vmatprep.subr.mxu0 %v11973_v53  ;;  %9713 = vmatprep.subr.mxu1 %v3235_v23  ;;  %v3297_v7 = vsub.f32 %v12101_v3, %v12120_v33 }
 0x2aa   : > { %9666 = vmatpush3.msra.mxu0 %v11973_v53  ;;  %9714 = vmatpush3.msra.mxu1 %v3235_v23  ;;  %v3256_v23 = vand.u32 4294901760, %v3255_v28  ;;  %v3276_v28 = vsub.f32 %v12053_v38, %v12087_v2 }
 0x2ab   : > { %9667 = vmatprep.subr.mxu0 %v11994_v32  ;;  %9715 = vmatprep.subr.mxu1 %v3242_v51 }
 0x2ac   : > { %9668 = vmatpush3.msra.mxu0 %v11994_v32  ;;  %9716 = vmatpush3.msra.mxu1 %v3242_v51  ;;  %v3263_v51 = vand.u32 4294901760, %v3262_v22  ;;  %v3283_v22 = vsub.f32 %v12067_v54, %v12097_v41  ;;  %v3277_v14 = vand.u32 4294901760, %v3276_v28  ;;  %v14049_v28 = vld [vmem:[#allocation35_spill] sm:$0xff] }
 0x2ad   : > { %9669 = vmatprep.subr.mxu0 %v12015_v4  ;;  %9717 = vmatprep.subr.mxu1 %v3249_v10 }
 0x2ae   : > { %9670 = vmatpush3.msra.mxu0 %v12015_v4  ;;  %9718 = vmatpush3.msra.mxu1 %v3249_v10  ;;  %v3270_v10 = vand.u32 4294901760, %v3269_v52  ;;  %v12127_v52 = vand.u32 4294901760, %v12112_v57 }
 0x2af   : > { %9671 = vmatprep.subr.mxu0 %v12029_v36  ;;  %9719 = vmatprep.subr.mxu1 %v3256_v23 }
 0x2b0   : > { %9672 = vmatpush3.msra.mxu0 %v12029_v36  ;;  %9720 = vmatpush3.msra.mxu1 %v3256_v23  ;;  %v3290_v23 = vsub.f32 %v12081_v27, %v12108_v12 }
 0x2b1   : > { %9673 = vmatprep.subr.mxu0 %v12048_v47  ;;  %9721 = vmatprep.subr.mxu1 %v3263_v51 }
 0x2b2   : > { %9674 = vmatpush3.msra.mxu0 %v12048_v47  ;;  %9722 = vmatpush3.msra.mxu1 %v3263_v51  ;;  %v3284_v51 = vand.u32 4294901760, %v3283_v22  ;;  %v3291_v58 = vand.u32 4294901760, %v3290_v23  ;;  %v14050_v22 = vld [vmem:[#allocation41_spill] sm:$0xff] }
 0x2b3   : > { %9675 = vmatprep.subr.mxu0 %v12076_v8  ;;  %9723 = vmatprep.subr.mxu1 %v3270_v10 }
 0x2b4   : > { %9676 = vmatpush3.msra.mxu0 %v12076_v8  ;;  %9724 = vmatpush3.msra.mxu1 %v3270_v10  ;;  %v3304_v10 = vsub.f32 %v12112_v57, %v12127_v52 }
 0x2b5   : > { %9677 = vmatprep.subr.mxu0 %v12090_v48  ;;  %9725 = vmatprep.subr.mxu1 %v3277_v14 }
 0x2b6   : > { %9678 = vmatpush3.msra.mxu0 %v12090_v48  ;;  %9726 = vmatpush3.msra.mxu1 %v3277_v14  ;;  %v3298_v14 = vand.u32 4294901760, %v3297_v7  ;;  %v3305_v23 = vand.u32 4294901760, %v3304_v10  ;;  %v14054_v7 = vld [vmem:[#allocation11_spill] sm:$0xff]  ;;  %v14061_v10 = vld [vmem:[#allocation66_spill] sm:$0xff] }
 0x2b7   : > { %9680 = vmatmul.mubr.f32.vlgmr.msra.gmra.mxu0 %v14049_v28  ;;  %9727 = vmatprep.subr.mxu1 %v3284_v51  ;;  %v14051_v28 = vld [vmem:[#allocation44_spill] sm:$0xff] }
 0x2b8   : > { %9759 = vmatprep.subr.mxu0 %v11889_v11  ;;  %9728 = vmatpush3.msra.mxu1 %v3284_v51  ;;  %v14058_v51 = vld [vmem:[#allocation19_spill] sm:$0xff] }
 0x2b9   : > { %9760 = vmatpush3.msra.mxu0 %v11889_v11  ;;  %9729 = vmatprep.subr.mxu1 %v3291_v58  ;;  %v14052_v11 = vld [vmem:[#allocation47_spill] sm:$0xff] }
 0x2ba   : > { %9761 = vmatprep.subr.mxu0 %v11912_v20  ;;  %9682 = vmatprep.mubr.f32.mxu0 %v14050_v22  ;;  %v14062_v22 = vld [vmem:[#allocation27_spill] sm:$0xff] }
 0x2bb   : > { %9730 = vmatpush3.msra.mxu1 %v3291_v58  ;;  %9762 = vmatpush3.msra.mxu0 %v11912_v20  ;;  %v14053_v58 = vld [vmem:[#allocation50_spill] sm:$0xff]  ;;  %v14056_v20 = vld [vmem:[#allocation16_spill] sm:$0xff] }
 0x2bc   : > { %9683 = vmatmul.mubr.f32.gmra.mxu0 %v14051_v28  ;;  %9731 = vmatprep.subr.mxu1 %v3298_v14  ;;  %v14066_v28 = vld [vmem:[#allocation38_spill] sm:$0xff] }
 0x2bd   : > { %9763 = vmatprep.subr.mxu0 %v11871_v18  ;;  %9732 = vmatpush3.msra.mxu1 %v3298_v14  ;;  %v14065_v14 = vld [vmem:[#allocation74_spill] sm:$0xff] }
 0x2be   : > { %9764 = vmatpush3.msra.mxu0 %v11871_v18  ;;  %9733 = vmatprep.subr.mxu1 %v3305_v23  ;;  %v14055_v18 = vld [vmem:[#allocation55_spill] sm:$0xff] }
 0x2bf   : > { %9765 = vmatprep.subr.mxu0 %v11885_v43  ;;  %9685 = vmatprep.mubr.f32.mxu0 %v14052_v11  ;;  %v14070_v11 = vld [vmem:[#allocation46_spill] sm:$0xff] }
 0x2c0   : > { %9734 = vmatpush3.msra.mxu1 %v3305_v23  ;;  %9766 = vmatpush3.msra.mxu0 %v11885_v43  ;;  %v14057_v43 = vld [vmem:[#allocation58_spill] sm:$0xff]  ;;  %v14069_v23 = vld [vmem:[#allocation79_spill] sm:$0xff] }
 0x2c1   : > { %9686 = vmatmul.mubr.f32.gmra.mxu0 %v14053_v58  ;;  %9736 = vmatmul.mubr.f32.vlgmr.msra.gmra.mxu1 %v14054_v7  ;;  %v14073_v58 = vld [vmem:[#allocation81_spill] sm:$0xff] }
 0x2c2   : > { %9767 = vmatprep.subr.mxu0 %v11908_v35  ;;  %9815 = vmatprep.subr.mxu1 %v11874_v16 }
 0x2c3   : > { %9768 = vmatpush3.msra.mxu0 %v11908_v35  ;;  %9816 = vmatpush3.msra.mxu1 %v11874_v16  ;;  %v14059_v35 = vld [vmem:[#allocation63_spill] sm:$0xff] }
 0x2c4   : > { %9769 = vmatprep.subr.mxu0 %v11932_v42  ;;  %9817 = vmatprep.subr.mxu1 %v11892_v39 }
 0x2c5   : > { %9688 = vmatprep.mubr.f32.mxu0 %v14055_v18  ;;  %9738 = vmatprep.mubr.f32.mxu1 %v14056_v20  ;;  %v14074_v18 = vld [vmem:[#allocation54_spill] sm:$0xff] }
 0x2c6   : > { %9770 = vmatpush3.msra.mxu0 %v11932_v42  ;;  %9818 = vmatpush3.msra.mxu1 %v11892_v39  ;;  %v14060_v42 = vld [vmem:[#allocation24_spill] sm:$0xff] }
 0x2c7   : > { %9689 = vmatmul.mubr.f32.gmra.mxu0 %v14057_v43  ;;  %9739 = vmatmul.mubr.f32.gmra.mxu1 %v14058_v51  ;;  %v14077_v43 = vld [vmem:[#allocation62_spill] sm:$0xff] }
 0x2c8   : > { %9771 = vmatprep.subr.mxu0 %v11954_v45  ;;  %9819 = vmatprep.subr.mxu1 %v11847_v17 }
 0x2c9   : > { %9772 = vmatpush3.msra.mxu0 %v11954_v45  ;;  %9820 = vmatpush3.msra.mxu1 %v11847_v17  ;;  %v14063_v45 = vld [vmem:[#allocation71_spill] sm:$0xff] }
 0x2ca   : > { %9773 = vmatprep.subr.mxu0 %v11978_v60  ;;  %9821 = vmatprep.subr.mxu1 %v11858_v46 }
 0x2cb   : > { %9691 = vmatprep.mubr.f32.mxu0 %v14059_v35  ;;  %9741 = vmatprep.mubr.f32.mxu1 %v14060_v42  ;;  %v14078_v35 = vld [vmem:[#allocation15_spill] sm:$0xff] }
 0x2cc   : > { %9774 = vmatpush3.msra.mxu0 %v11978_v60  ;;  %9822 = vmatpush3.msra.mxu1 %v11858_v46  ;;  %v14064_v60 = vld [vmem:[#allocation34_spill] sm:$0xff] }
 0x2cd   : > { %9692 = vmatmul.mubr.f32.gmra.mxu0 %v14061_v10  ;;  %9742 = vmatmul.mubr.f32.gmra.mxu1 %v14062_v22  ;;  %v14081_v10 = vld [vmem:[#allocation70_spill] sm:$0xff] }
 0x2ce   : > { %9775 = vmatprep.subr.mxu0 %v11999_v55  ;;  %9823 = vmatprep.subr.mxu1 %v11867_v49 }
 0x2cf   : > { %9776 = vmatpush3.msra.mxu0 %v11999_v55  ;;  %9824 = vmatpush3.msra.mxu1 %v11867_v49  ;;  %v14067_v55 = vld [vmem:[#allocation77_spill] sm:$0xff] }
 0x2d0   : > { %9777 = vmatprep.subr.mxu0 %v12020_v61  ;;  %9825 = vmatprep.subr.mxu1 %v11881_v44 }
 0x2d1   : > { %9694 = vmatprep.mubr.f32.mxu0 %v14063_v45  ;;  %9744 = vmatprep.mubr.f32.mxu1 %v14064_v60  ;;  %v14082_v45 = vld [vmem:[#allocation25_spill] sm:$0xff] }
 0x2d2   : > { %9778 = vmatpush3.msra.mxu0 %v12020_v61  ;;  %9826 = vmatpush3.msra.mxu1 %v11881_v44  ;;  %v14068_v61 = vld [vmem:[#allocation43_spill] sm:$0xff] }
 0x2d3   : > { %9695 = vmatmul.mubr.f32.gmra.mxu0 %v14065_v14  ;;  %9745 = vmatmul.mubr.f32.gmra.mxu1 %v14066_v28  ;;  %v14085_v14 = vld [vmem:[#allocation33_spill] sm:$0xff] }
 0x2d4   : > { %9779 = vmatprep.subr.mxu0 %v12034_v24  ;;  %9827 = vmatprep.subr.mxu1 %v11903_v15 }
 0x2d5   : > { %9780 = vmatpush3.msra.mxu0 %v12034_v24  ;;  %9828 = vmatpush3.msra.mxu1 %v11903_v15  ;;  %v14071_v24 = vld [vmem:[#allocation80_spill] sm:$0xff] }
 0x2d6   : > { %9781 = vmatprep.subr.mxu0 %v12053_v38  ;;  %9829 = vmatprep.subr.mxu1 %v11927_v21 }
 0x2d7   : > { %9697 = vmatprep.mubr.f32.mxu0 %v14067_v55  ;;  %9747 = vmatprep.mubr.f32.mxu1 %v14068_v61  ;;  %v14086_v55 = vld [vmem:[#allocation21_spill] sm:$0xff] }
 0x2d8   : > { %9782 = vmatpush3.msra.mxu0 %v12053_v38  ;;  %9830 = vmatpush3.msra.mxu1 %v11927_v21  ;;  %v14072_v38 = vld [vmem:[#allocation52_spill] sm:$0xff] }
 0x2d9   : > { %9698 = vmatmul.mubr.f32.gmra.mxu0 %v14069_v23  ;;  %9748 = vmatmul.mubr.f32.gmra.mxu1 %v14070_v11  ;;  %v14088_v23 = vld [vmem:[#allocation28_spill] sm:$0xff] }
 0x2da   : > { %9783 = vmatprep.subr.mxu0 %v12067_v54  ;;  %9831 = vmatprep.subr.mxu1 %v11950_v6 }
 0x2db   : > { %9784 = vmatpush3.msra.mxu0 %v12067_v54  ;;  %9832 = vmatpush3.msra.mxu1 %v11950_v6  ;;  %v14075_v54 = vld [vmem:[#allocation60_spill] sm:$0xff] }
 0x2dc   : > { %9785 = vmatprep.subr.mxu0 %v12081_v27  ;;  %9833 = vmatprep.subr.mxu1 %v11973_v53 }
 0x2dd   : > { %9700 = vmatprep.mubr.f32.mxu0 %v14071_v24  ;;  %9750 = vmatprep.mubr.f32.mxu1 %v14072_v38  ;;  %v14090_v24 = vld [vmem:[#allocation31_spill] sm:$0xff] }
 0x2de   : > { %9786 = vmatpush3.msra.mxu0 %v12081_v27  ;;  %9834 = vmatpush3.msra.mxu1 %v11973_v53  ;;  %v14076_v27 = vld [vmem:[#allocation13_spill] sm:$0xff] }
 0x2df   : > { %9701 = vmatmul.mubr.f32.gmra.mxu0 %v14073_v58  ;;  %9751 = vmatmul.mubr.f32.gmra.mxu1 %v14074_v18 }
 0x2e0   : > { %9787 = vmatprep.subr.mxu0 %v12101_v3  ;;  %9835 = vmatprep.subr.mxu1 %v11994_v32 }
 0x2e1   : > { %9788 = vmatpush3.msra.mxu0 %v12101_v3  ;;  %9836 = vmatpush3.msra.mxu1 %v11994_v32  ;;  %v14080_v3 = vld [vmem:[#allocation22_spill] sm:$0xff] }
 0x2e2   : > { %9789 = vmatprep.subr.mxu0 %v12112_v57  ;;  %9837 = vmatprep.subr.mxu1 %v12015_v4 }
 0x2e3   : > { %9753 = vmatprep.mubr.f32.mxu1 %v14075_v54  ;;  %9790 = vmatpush3.msra.mxu0 %v12112_v57  ;;  %v14079_v57 = vld [vmem:[#allocation68_spill] sm:$0xff] }
 0x2e4   : > { %9791 = vmatprep.mubr.f32.mxu0 %v14076_v27  ;;  %9838 = vmatpush3.msra.mxu1 %v12015_v4 }
 0x2e5   : > { %9754 = vmatmul.mubr.f32.gmra.mxu1 %v14077_v43  ;;  %9792 = vmatmul.mubr.f32.vlgmr.msra.gmra.mxu0 %v14078_v35 }
 0x2e6   : > { %9839 = vmatprep.subr.mxu1 %v12029_v36  ;;  %9871 = vmatprep.subr.mxu0 %v11916_v37 }
 0x2e7   : > { %9840 = vmatpush3.msra.mxu1 %v12029_v36  ;;  %9872 = vmatpush3.msra.mxu0 %v11916_v37  ;;  %v14083_v37 = vld [vmem:[#allocation30_spill] sm:$0xff] }
 0x2e8   : > { %9841 = vmatprep.subr.mxu1 %v12048_v47  ;;  %9873 = vmatprep.subr.mxu0 %v11938_v13 }
 0x2e9   : > { %9756 = vmatprep.mubr.f32.mxu1 %v14079_v57  ;;  %9794 = vmatprep.mubr.f32.mxu0 %v14080_v3 }
 0x2ea   : > { %9842 = vmatpush3.msra.mxu1 %v12048_v47  ;;  %9874 = vmatpush3.msra.mxu0 %v11938_v13  ;;  %v14084_v13 = vld [vmem:[#allocation20_spill] sm:$0xff] }
 0x2eb   : > { %9757 = vmatmul.mubr.f32.gmra.mxu1 %v14081_v10  ;;  %9795 = vmatmul.mubr.f32.gmra.mxu0 %v14082_v45 }
 0x2ec   : > { %9843 = vmatprep.subr.mxu1 %v12076_v8  ;;  %9875 = vmatprep.subr.mxu0 %v11919_v1 }
 0x2ed   : > { %9844 = vmatpush3.msra.mxu1 %v12076_v8  ;;  %9876 = vmatpush3.msra.mxu0 %v11919_v1  ;;  %v14087_v1 = vld [vmem:[#allocation40_spill] sm:$0xff] }
 0x2ee   : > { %9845 = vmatprep.subr.mxu1 %v12090_v48  ;;  %9877 = vmatprep.subr.mxu0 %v11941_v50 }
 0x2ef   : > { %9797 = vmatprep.mubr.f32.mxu0 %v14083_v37  ;;  %9846 = vmatpush3.msra.mxu1 %v12090_v48 }
 0x2f0   : > { %9847 = vmatprep.mubr.f32.mxu1 %v14084_v13  ;;  %9878 = vmatpush3.msra.mxu0 %v11941_v50  ;;  %v14089_v50 = vld [vmem:[#allocation42_spill] sm:$0xff] }
 0x2f1   : > { %9798 = vmatmul.mubr.f32.gmra.mxu0 %v14085_v14  ;;  %9848 = vmatmul.mubr.f32.vlgmr.msra.gmra.mxu1 %v14086_v55 }
 0x2f2   : > { %9879 = vmatprep.subr.mxu0 %v11963_v9  ;;  %9927 = vmatprep.subr.mxu1 %v11874_v16 }
 0x2f3   : > { %9880 = vmatpush3.msra.mxu0 %v11963_v9  ;;  %9928 = vmatpush3.msra.mxu1 %v11874_v16  ;;  %v14091_v16 = vld [vmem:[#allocation49_spill] sm:$0xff] }
 0x2f4   : > { %9881 = vmatprep.subr.mxu0 %v11984_v19  ;;  %9929 = vmatprep.subr.mxu1 %v11892_v39  ;;  %v14092_v9 = vld [vmem:[#allocation37_spill] sm:$0xff] }
 0x2f5   : > { %9800 = vmatprep.mubr.f32.mxu0 %v14087_v1  ;;  %9850 = vmatprep.mubr.f32.mxu1 %v14088_v23 }
 0x2f6   : > { %9882 = vmatpush3.msra.mxu0 %v11984_v19  ;;  %9930 = vmatpush3.msra.mxu1 %v11892_v39  ;;  %v14093_v39 = vld [vmem:[#allocation51_spill] sm:$0xff] }
 0x2f7   : > { %9801 = vmatmul.mubr.f32.gmra.mxu0 %v14089_v50  ;;  %9851 = vmatmul.mubr.f32.gmra.mxu1 %v14090_v24  ;;  %v14094_v19 = vld [vmem:[#allocation39_spill] sm:$0xff] }
 0x2f8   : > { %9883 = vmatprep.subr.mxu0 %v12005_v31  ;;  %9931 = vmatprep.subr.mxu1 %v11847_v17 }
 0x2f9   : > { %9884 = vmatpush3.msra.mxu0 %v12005_v31  ;;  %9932 = vmatpush3.msra.mxu1 %v11847_v17  ;;  %v14095_v17 = vld [vmem:[#allocation57_spill] sm:$0xff] }
 0x2fa   : > { %9885 = vmatprep.subr.mxu0 %v12026_v59  ;;  %9933 = vmatprep.subr.mxu1 %v11858_v46  ;;  %v14096_v31 = vld [vmem:[#allocation45_spill] sm:$0xff] }
 0x2fb   : > { %9803 = vmatprep.mubr.f32.mxu0 %v14091_v16  ;;  %9853 = vmatprep.mubr.f32.mxu1 %v14092_v9 }
 0x2fc   : > { %9886 = vmatpush3.msra.mxu0 %v12026_v59  ;;  %9934 = vmatpush3.msra.mxu1 %v11858_v46  ;;  %v14097_v46 = vld [vmem:[#allocation59_spill] sm:$0xff]  ;;  %v14098_v59 = vld [vmem:[#allocation48_spill] sm:$0xff] }
 0x2fd   : > { %9804 = vmatmul.mubr.f32.gmra.mxu0 %v14093_v39  ;;  %9854 = vmatmul.mubr.f32.gmra.mxu1 %v14094_v19 }
 0x2fe   : > { %9887 = vmatprep.subr.mxu0 %v12040_v26  ;;  %9935 = vmatprep.subr.mxu1 %v11867_v49 }
 0x2ff   : > { %9888 = vmatpush3.msra.mxu0 %v12040_v26  ;;  %9936 = vmatpush3.msra.mxu1 %v11867_v49  ;;  %v14099_v49 = vld [vmem:[#allocation65_spill] sm:$0xff] }
 0x300   : > { %9889 = vmatprep.subr.mxu0 %v12059_v25  ;;  %9937 = vmatprep.subr.mxu1 %v11881_v44  ;;  %v14100_v26 = vld [vmem:[#allocation53_spill] sm:$0xff] }
 0x301   : > { %9806 = vmatprep.mubr.f32.mxu0 %v14095_v17  ;;  %9856 = vmatprep.mubr.f32.mxu1 %v14096_v31 }
 0x302   : > { %9890 = vmatpush3.msra.mxu0 %v12059_v25  ;;  %9938 = vmatpush3.msra.mxu1 %v11881_v44  ;;  %v14101_v44 = vld [vmem:[#allocation67_spill] sm:$0xff]  ;;  %v14102_v25 = vld [vmem:[#allocation56_spill] sm:$0xff] }
 0x303   : > { %9807 = vmatmul.mubr.f32.gmra.mxu0 %v14097_v46  ;;  %9857 = vmatmul.mubr.f32.gmra.mxu1 %v14098_v59 }
 0x304   : > { %9891 = vmatprep.subr.mxu0 %v12073_v29  ;;  %9939 = vmatprep.subr.mxu1 %v11903_v15 }
 0x305   : > { %9892 = vmatpush3.msra.mxu0 %v12073_v29  ;;  %9940 = vmatpush3.msra.mxu1 %v11903_v15  ;;  %v14103_v15 = vld [vmem:[#allocation73_spill] sm:$0xff] }
 0x306   : > { %9893 = vmatprep.subr.mxu0 %v12087_v2  ;;  %9941 = vmatprep.subr.mxu1 %v11927_v21  ;;  %v14104_v29 = vld [vmem:[#allocation61_spill] sm:$0xff] }
 0x307   : > { %9809 = vmatprep.mubr.f32.mxu0 %v14099_v49  ;;  %9859 = vmatprep.mubr.f32.mxu1 %v14100_v26 }
 0x308   : > { %9894 = vmatpush3.msra.mxu0 %v12087_v2  ;;  %9942 = vmatpush3.msra.mxu1 %v11927_v21  ;;  %v14105_v21 = vld [vmem:[#allocation75_spill] sm:$0xff]  ;;  %v14106_v2 = vld [vmem:[#allocation64_spill] sm:$0xff] }
 0x309   : > { %9810 = vmatmul.mubr.f32.gmra.mxu0 %v14101_v44  ;;  %9860 = vmatmul.mubr.f32.gmra.mxu1 %v14102_v25 }
 0x30a   : > { %9895 = vmatprep.subr.mxu0 %v12097_v41  ;;  %9943 = vmatprep.subr.mxu1 %v11950_v6 }
 0x30b   : > { %9896 = vmatpush3.msra.mxu0 %v12097_v41  ;;  %9944 = vmatpush3.msra.mxu1 %v11950_v6  ;;  %v14107_v6 = vld [vmem:[#allocation69_spill] sm:$0xff] }
 0x30c   : > { %9897 = vmatprep.subr.mxu0 %v12108_v12  ;;  %9945 = vmatprep.subr.mxu1 %v11973_v53 }
 0x30d   : > { %9812 = vmatprep.mubr.f32.mxu0 %v14103_v15  ;;  %9862 = vmatprep.mubr.f32.mxu1 %v14104_v29 }
 0x30e   : > { %9898 = vmatpush3.msra.mxu0 %v12108_v12  ;;  %9946 = vmatpush3.msra.mxu1 %v11973_v53  ;;  %v14108_v12 = vld [vmem:[#allocation9_spill] sm:$0xff]  ;;  %v14109_v53 = vld [vmem:[#allocation72_spill] sm:$0xff] }
 0x30f   : > { %9813 = vmatmul.mubr.f32.gmra.mxu0 %v14105_v21  ;;  %9863 = vmatmul.mubr.f32.gmra.mxu1 %v14106_v2 }
 0x310   : > { %9899 = vmatprep.subr.mxu0 %v12120_v33  ;;  %9947 = vmatprep.subr.mxu1 %v11994_v32 }
 0x311   : > { %9900 = vmatpush3.msra.mxu0 %v12120_v33  ;;  %9948 = vmatpush3.msra.mxu1 %v11994_v32  ;;  %v14110_v33 = vld [vmem:[#allocation76_spill] sm:$0xff]  ;;  %v14111_v32 = vld [vmem:[#allocation78_spill] sm:$0xff] }
 0x312   : > { %9901 = vmatprep.subr.mxu0 %v12127_v52  ;;  %9949 = vmatprep.subr.mxu1 %v12015_v4 }
 0x313   : > { %9865 = vmatprep.mubr.f32.mxu1 %v14107_v6  ;;  %9902 = vmatpush3.msra.mxu0 %v12127_v52 }
 0x314   : > { %9903 = vmatprep.mubr.f32.mxu0 %v14108_v12  ;;  %9950 = vmatpush3.msra.mxu1 %v12015_v4  ;;  %v4258_v4 = vld [vmem:[%s13701_s6 + $0x10] sm:$0xf] }
 0x315   : > { %9866 = vmatmul.mubr.f32.gmra.mxu1 %v14109_v53  ;;  %9904 = vmatmul.mubr.f32.vlgmr.msra.gmra.mxu0 %v14054_v7 }
 0x316   : > { %9951 = vmatprep.subr.mxu1 %v12029_v36  ;;  %9868 = vmatprep.mubr.f32.mxu1 %v14110_v33 }
 0x317   : > { %9952 = vmatpush3.msra.mxu1 %v12029_v36  ;;  %9906 = vmatprep.mubr.f32.mxu0 %v14056_v20  ;;  %v4316_v36 = vsel %vm1811_vm0, %v4258_v4, 0 }
 0x318   : > { %9953 = vmatprep.subr.mxu1 %v12048_v47 }
 0x319   : > { %9954 = vmatpush3.msra.mxu1 %v12048_v47  ;;  %9907 = vmatmul.mubr.f32.gmra.mxu0 %v14058_v51  ;;  %v12361_v47 = vand.u32 4294901760, %v4316_v36 }
 0x31a   : > { %9869 = vmatmul.mubr.f32.gmra.mxu1 %v14111_v32  ;;  %9955 = vmatprep.subr.mxu1 %v12076_v8 }
 0x31b   : > { %9956 = vmatpush3.msra.mxu1 %v12076_v8  ;;  %9909 = vmatprep.mubr.f32.mxu0 %v14060_v42  ;;  %14112 = vst [vmem:[#allocation26_spill] sm:$0xff] %v12361_v47  ;;  %v12365_v8 = vsub.f32 %v4316_v36, %v12361_v47 }
 0x31c   : > { %9957 = vmatprep.subr.mxu1 %v12090_v48  ;;  %9959 = vmatprep.mubr.f32.mxu1 %v14108_v12 }
 0x31d   : > { %9958 = vmatpush3.msra.mxu1 %v12090_v48  ;;  %9910 = vmatmul.mubr.f32.gmra.mxu0 %v14062_v22  ;;  %14113 = vst [vmem:[#allocation35_spill] sm:$0xff] %v12365_v8  ;;  %v12369_v48 = vand.u32 4294901760, %v12365_v8 }
 0x31e   : > { %9960 = vmatmul.mubr.f32.vlgmr.msra.gmra.mxu1 %v14054_v7  ;;  %9912 = vmatprep.mubr.f32.mxu0 %v14064_v60  ;;  %v4257_v7 = vld [vmem:[%s13701_s6 + $0x8] sm:$0xff] }
 0x31f   : > { %9962 = vmatprep.mubr.f32.mxu1 %v14056_v20  ;;  %9983 = vmatprep.subr.mxu0 %v12361_v47  ;;  %14114 = vst [vmem:[#allocation41_spill] sm:$0xff] %v12369_v48  ;;  %v4576_v41 = vsub.f32 %v12365_v8, %v12369_v48  ;;  %v12376_v20 = vand.u32 4294901760, %v4257_v7 }
 0x320   : > { %9984 = vmatpush3.msra.mxu0 %v12361_v47 }
 0x321   : > { %9913 = vmatmul.mubr.f32.gmra.mxu0 %v14066_v28  ;;  %v4577_v52 = vand.u32 4294901760, %v4576_v41  ;;  %14115 = vst [vmem:[#allocation44_spill] sm:$0xff] %v12376_v20  ;;  %9985 = vmatprep.subr.mxu0 %v12376_v20 }
 0x322   : > { %9963 = vmatmul.mubr.f32.gmra.mxu1 %v14058_v51  ;;  %9915 = vmatprep.mubr.f32.mxu0 %v14068_v61  ;;  %v4256_v51 = vld [vmem:[%s13701_s6] sm:$0xff] }
 0x323   : > { %9965 = vmatprep.mubr.f32.mxu1 %v14060_v42  ;;  %10013 = vmatprep.subr.mxu1 %v4577_v52  ;;  %v12383_v42 = vsub.f32 %v4257_v7, %v12376_v20 }
 0x324   : > { %10014 = vmatpush3.msra.mxu1 %v4577_v52  ;;  %9986 = vmatpush3.msra.mxu0 %v12376_v20 }
 0x325   : > { %9916 = vmatmul.mubr.f32.gmra.mxu0 %v14070_v11  ;;  %14116 = vst [vmem:[#allocation47_spill] sm:$0xff] %v12383_v42 }
 0x326   : > { %9966 = vmatmul.mubr.f32.gmra.mxu1 %v14062_v22  ;;  %9918 = vmatprep.mubr.f32.mxu0 %v14072_v38  ;;  %v12385_v22 = vand.u32 4294901760, %v4256_v51 }
 0x327   : > { %9968 = vmatprep.mubr.f32.mxu1 %v14064_v60  ;;  %v12389_v60 = vand.u32 4294901760, %v12383_v42 }
 0x328   : > { %14117 = vst [vmem:[#allocation50_spill] sm:$0xff] %v12385_v22  ;;  %9987 = vmatprep.subr.mxu0 %v12385_v22 }
 0x329   : > { %9919 = vmatmul.mubr.f32.gmra.mxu0 %v14074_v18  ;;  %14118 = vst [vmem:[#allocation11_spill] sm:$0xff] %v12389_v60 }
 0x32a   : > { %9969 = vmatmul.mubr.f32.gmra.mxu1 %v14066_v28  ;;  %9921 = vmatprep.mubr.f32.mxu0 %v14075_v54  ;;  %v12393_v28 = vsub.f32 %v4256_v51, %v12385_v22 }
 0x32b   : > { %9971 = vmatprep.mubr.f32.mxu1 %v14068_v61  ;;  %9988 = vmatpush3.msra.mxu0 %v12385_v22  ;;  %v4583_v61 = vsub.f32 %v12383_v42, %v12389_v60 }
 0x32c   : > { %14119 = vst [vmem:[#allocation55_spill] sm:$0xff] %v12393_v28  ;;  %10043 = vmatprep.subr.mxu0 %v12365_v8 }
 0x32d   : > { %9922 = vmatmul.mubr.f32.gmra.mxu0 %v14077_v43 }
 0x32e   : > { %9972 = vmatmul.mubr.f32.gmra.mxu1 %v14070_v11  ;;  %9924 = vmatprep.mubr.f32.mxu0 %v14079_v57  ;;  %v12399_v11 = vand.u32 4294901760, %v12393_v28 }
 0x32f   : > { %9974 = vmatprep.mubr.f32.mxu1 %v14072_v38  ;;  %v4584_v38 = vand.u32 4294901760, %v4583_v61 }
 0x330   : > { %14120 = vst [vmem:[#allocation16_spill] sm:$0xff] %v12399_v11  ;;  %v4590_v58 = vsub.f32 %v12393_v28, %v12399_v11 }
 0x331   : > { %9925 = vmatmul.mubr.f32.gmra.mxu0 %v14081_v10  ;;  %10015 = vmatprep.subr.mxu1 %v4584_v38 }
 0x332   : > { %9975 = vmatmul.mubr.f32.gmra.mxu1 %v14074_v18  ;;  %v4591_v18 = vand.u32 4294901760, %v4590_v58 }
 0x333   : > { %9977 = vmatprep.mubr.f32.mxu1 %v14075_v54  ;;  %10016 = vmatpush3.msra.mxu1 %v4584_v38 }
 0x334   : > { %10017 = vmatprep.subr.mxu1 %v4591_v18 }
 0x335   : > { %10018 = vmatpush3.msra.mxu1 %v4591_v18 }
 0x336   : > { %9978 = vmatmul.mubr.f32.gmra.mxu1 %v14077_v43  ;;  %10073 = vmatprep.subr.mxu1 %v12361_v47 }
 0x337   : > { %9980 = vmatprep.mubr.f32.mxu1 %v14079_v57 }
 0x33a   : > { %9981 = vmatmul.mubr.f32.gmra.mxu1 %v14081_v10 }
 0x377   : > { %v9681_v54 = vpop.f32.mrf.mxu0 }
 0x379   : > { %v3041_v27 = vpop.f32.mrf.mxu0 }
 0x37c   : > { %v9684_v43 = vpop.f32.mrf.mxu0 }
 0x37e   : > { %v3061_v35 = vpop.f32.mrf.mxu0 }
 0x381   : > { %v9687_v57 = vpop.f32.mrf.mxu0  ;;  %v9737_v3 = vpop.f32.mrf.mxu1 }
 0x382   : > { %v3349_v62 = vadd.f32 %v9737_v3, %v9681_v54 }
 0x383   : > { %v3081_v10 = vpop.f32.mrf.mxu0  ;;  %v3342_v45 = vpop.f32.mrf.mxu1 }
 0x384   : > { %v3343_v0 = vadd.f32 %v3342_v45, %v3041_v27 }
 0x387   : > { %v9690_v37 = vpop.f32.mrf.mxu0  ;;  %v9740_v13 = vpop.f32.mrf.mxu1 }
 0x389   : > { %v3101_v14 = vpop.f32.mrf.mxu0  ;;  %v3354_v55 = vpop.f32.mrf.mxu1 }
 0x38d   : > { %v9693_v1 = vpop.f32.mrf.mxu0  ;;  %v9743_v23 = vpop.f32.mrf.mxu1 }
 0x38f   : > { %v3121_v50 = vpop.f32.mrf.mxu0  ;;  %v3366_v24 = vpop.f32.mrf.mxu1 }
 0x393   : > { %v9696_v16 = vpop.f32.mrf.mxu0  ;;  %v9746_v9 = vpop.f32.mrf.mxu1 }
 0x394   : > { %v3385_v3 = vadd.f32 %v9746_v9, %v9690_v37 }
 0x395   : > { %v3141_v39 = vpop.f32.mrf.mxu0  ;;  %v3378_v19 = vpop.f32.mrf.mxu1 }
 0x396   : > { %v3379_v45 = vadd.f32 %v3378_v19, %v3101_v14 }
 0x399   : > { %v9699_v17 = vpop.f32.mrf.mxu0  ;;  %v9749_v31 = vpop.f32.mrf.mxu1 }
 0x39b   : > { %v3161_v46 = vpop.f32.mrf.mxu0  ;;  %v3390_v59 = vpop.f32.mrf.mxu1 }
 0x39f   : > { %v9702_v49 = vpop.f32.mrf.mxu0  ;;  %v9752_v26 = vpop.f32.mrf.mxu1 }
 0x3a1   : > { %v3181_v44 = vpop.f32.mrf.mxu0  ;;  %v3402_v25 = vpop.f32.mrf.mxu1 }
 0x3a5   : > { %v9755_v15 = vpop.f32.mrf.mxu1  ;;  %v9793_v29 = vpop.f32.mrf.mxu0 }
 0x3a7   : > { %v3414_v21 = vpop.f32.mrf.mxu1  ;;  %v3536_v2 = vpop.f32.mrf.mxu0 }
 0x3a8   : > { %v3537_v9 = vadd.f32 %v3536_v2, %v3343_v0 }
 0x3ab   : > { %v9758_v6 = vpop.f32.mrf.mxu1  ;;  %v9796_v12 = vpop.f32.mrf.mxu0 }
 0x3ac   : > { %v3433_v37 = vadd.f32 %v9758_v6, %v9702_v49 }
 0x3ad   : > { %v3426_v53 = vpop.f32.mrf.mxu1  ;;  %v3550_v33 = vpop.f32.mrf.mxu0 }
 0x3ae   : > { %v3427_v19 = vadd.f32 %v3426_v53, %v3181_v44 }
 0x3b1   : > { %v9799_v32 = vpop.f32.mrf.mxu0  ;;  %v9849_v4 = vpop.f32.mrf.mxu1 }
 0x3b3   : > { %v3564_v36 = vpop.f32.mrf.mxu0  ;;  %v3730_v41 = vpop.f32.mrf.mxu1 }
 0x3b7   : > { %v9802_v52 = vpop.f32.mrf.mxu0  ;;  %v9852_v7 = vpop.f32.mrf.mxu1 }
 0x3b9   : > { %v3578_v51 = vpop.f32.mrf.mxu0  ;;  %v3746_v61 = vpop.f32.mrf.mxu1 }
 0x3bd   : > { %v9805_v38 = vpop.f32.mrf.mxu0  ;;  %v9855_v58 = vpop.f32.mrf.mxu1 }
 0x3bf   : > { %v3592_v18 = vpop.f32.mrf.mxu0  ;;  %v3762_v11 = vpop.f32.mrf.mxu1 }
 0x3c3   : > { %v9808_v60 = vpop.f32.mrf.mxu0  ;;  %v9858_v48 = vpop.f32.mrf.mxu1 }
 0x3c5   : > { %v3606_v28 = vpop.f32.mrf.mxu0  ;;  %v3778_v42 = vpop.f32.mrf.mxu1 }
 0x3c9   : > { %v9811_v8 = vpop.f32.mrf.mxu0  ;;  %v9861_v63 = vpop.f32.mrf.mxu1 }
 0x3cb   : > { %v3620_v22 = vpop.f32.mrf.mxu0  ;;  %v3794_v56 = vpop.f32.mrf.mxu1 }
 0x3cf   : > { %v9814_v20 = vpop.f32.mrf.mxu0  ;;  %v12405_v34 = vpop.f32.mrf.mxu1 }
 0x3d0   : > { %14121 = vst [vmem:[#allocation58_spill] sm:$0xff] %v12405_v34  ;;  %v3361_v34 = vadd.f32 %v9740_v13, %v9684_v43  ;;  %v3397_v13 = vadd.f32 %v9749_v31, %v9693_v1  ;;  %v3391_v43 = vadd.f32 %v3390_v59, %v3121_v50 }
 0x3d1   : > { %v12407_v47 = vpop.f32.mrf.mxu0  ;;  %v12409_v5 = vpop.f32.mrf.mxu1 }
 0x3d2   : > { %14122 = vst [vmem:[#allocation19_spill] sm:$0xff] %v12407_v47  ;;  %14123 = vst [vmem:[#allocation63_spill] sm:$0xff] %v12409_v5  ;;  %v3355_v47 = vadd.f32 %v3354_v55, %v3061_v35  ;;  %v3373_v5 = vadd.f32 %v9743_v23, %v9687_v57  ;;  %v3409_v35 = vadd.f32 %v9752_v26, %v9696_v16 }
 0x3d3   : > { %v3403_v55 = vadd.f32 %v3402_v25, %v3141_v39  ;;  %v3421_v23 = vadd.f32 %v9755_v15, %v9699_v17  ;;  %v3544_v57 = vadd.f32 %v9793_v29, %v3349_v62  ;;  %v3558_v14 = vadd.f32 %v9796_v12, %v3361_v34 }
 0x3d4   : > { %v3551_v31 = vadd.f32 %v3550_v33, %v3355_v47  ;;  %v3572_v50 = vadd.f32 %v9799_v32, %v3373_v5  ;;  %v3731_v25 = vadd.f32 %v3730_v41, %v3537_v9  ;;  %v3586_v39 = vadd.f32 %v9802_v52, %v3385_v3  ;;  %v14131_v9 = vld [vmem:[#allocation5_spill] sm:$0xff] }
 0x3d5   : > { %v12411_v30 = vpop.f32.mrf.mxu1  ;;  %v9905_v40 = vpop.f32.mrf.mxu0  ;;  %v3739_v59 = vadd.f32 %v9849_v4, %v3544_v57  ;;  %v3755_v15 = vadd.f32 %v9852_v7, %v3558_v14  ;;  %v3579_v17 = vadd.f32 %v3578_v51, %v3379_v45  ;;  %v3593_v6 = vadd.f32 %v3592_v18, %v3391_v43 }
 0x3d6   : > { %14124 = vst [vmem:[#allocation24_spill] sm:$0xff] %v12411_v30  ;;  %v3367_v30 = vadd.f32 %v3366_v24, %v3081_v10  ;;  %v3415_v10 = vadd.f32 %v3414_v21, %v3161_v46  ;;  %v3747_v62 = vadd.f32 %v3746_v61, %v3551_v31  ;;  %v3600_v21 = vadd.f32 %v9805_v38, %v3397_v13  ;;  %v14125_v61 = vld [vmem:[#allocation8_spill] sm:$0xff] }
 0x3d7   : > { %v3826_v54 = vpop.f32.mrf.mxu1  ;;  %v3969_v27 = vpop.f32.mrf.mxu0  ;;  %v3771_v46 = vadd.f32 %v9855_v58, %v3572_v50  ;;  %v3976_v0 = vadd.f32 %v9905_v40, %v3739_v59  ;;  %v3614_v34 = vadd.f32 %v9808_v60, %v3409_v35  ;;  %v3787_v44 = vadd.f32 %v9858_v48, %v3586_v39 }
 0x3d8   : > { %v3565_v16 = vadd.f32 %v3564_v36, %v3367_v30  ;;  %v3607_v47 = vadd.f32 %v3606_v28, %v3403_v55  ;;  %v3779_v5 = vadd.f32 %v3778_v42, %v3579_v17  ;;  %v3970_v53 = vadd.f32 %v3969_v27, %v3731_v25  ;;  %v14132_v25 = vld [vmem:[#allocation2_spill] sm:$0xff] }
 0x3d9   : > { %v9908_v24 = vpop.f32.mrf.mxu0  ;;  %v3628_v32 = vadd.f32 %v9811_v8, %v3421_v23  ;;  %v3803_v4 = vadd.f32 %v9861_v63, %v3600_v21  ;;  %v3621_v36 = vadd.f32 %v3620_v22, %v3415_v10  ;;  %v3795_v41 = vadd.f32 %v3794_v56, %v3593_v6  ;;  %v14127_v48 = vld [vmem:[#allocation19_spill] sm:$0xff]  ;;  %v14130_v22 = vld [vmem:[#allocation17_spill] sm:$0xff]  ;;  %v14133_v6 = vld [vmem:[#allocation36_spill] sm:$0xff] }
 0x3da   : > { %v9870_v1 = vpop.f32.mrf.mxu1  ;;  %v3763_v49 = vadd.f32 %v3762_v11, %v3565_v16  ;;  %v3642_v7 = vadd.f32 %v9814_v20, %v3433_v37  ;;  %v3988_v51 = vadd.f32 %v9908_v24, %v3755_v15  ;;  %v14126_v11 = vld [vmem:[#allocation58_spill] sm:$0xff]  ;;  %v3635_v18 = vadd.f32 %v14127_v48, %v3427_v19  ;;  %v14128_v28 = vld [vmem:[#allocation63_spill] sm:$0xff] }
 0x3db   : > { %v3981_v26 = vpop.f32.mrf.mxu0  ;;  %v3819_v60 = vadd.f32 %v14126_v11, %v3614_v34  ;;  %v3811_v42 = vadd.f32 %v14128_v28, %v3607_v47  ;;  %v12422_v43 = vadd.f32 %v3826_v54, %v3621_v36  ;;  %v14135_v36 = vld [vmem:[#allocation4_spill] sm:$0xff] }
 0x3dc   : > { %v3842_v29 = vpop.f32.mrf.mxu1  ;;  %v3982_v63 = vadd.f32 %v3981_v26, %v3747_v62  ;;  %v12424_v35 = vadd.f32 %v9870_v1, %v3642_v7 }
 0x3dd   : > { %v9911_v2 = vpop.f32.mrf.mxu0  ;;  %v14129_v3 = vld [vmem:[#allocation24_spill] sm:$0xff]  ;;  %v12426_v55 = vadd.f32 %v3842_v29, %v3635_v18  ;;  %v14137_v18 = vld [vmem:[#allocation18_spill] sm:$0xff] }
 0x3de   : > { %v9961_v12 = vpop.f32.mrf.mxu1  ;;  %v12418_v27 = vadd.f32 %v14129_v3, %v3628_v32  ;;  %v4000_v10 = vadd.f32 %v9911_v2, %v3771_v46  ;;  %v14134_v32 = vld [vmem:[#allocation26_spill] sm:$0xff] }
 0x3df   : > { %v4153_v30 = vadd.f32 %v9961_v12, %v3976_v0  ;;  %v3993_v33 = vpop.f32.mrf.mxu0 }
 0x3e0   : > { %v4146_v52 = vpop.f32.mrf.mxu1  ;;  %v3994_v50 = vadd.f32 %v3993_v33, %v3763_v49 }
 0x3e1   : > { %v4241_v40 = vadd.f32 %v4153_v30, %v14125_v61  ;;  %v4147_v38 = vadd.f32 %v4146_v52, %v3970_v53  ;;  %v9914_v58 = vpop.f32.mrf.mxu0  ;;  %v14136_v61 = vld [vmem:[#allocation44_spill] sm:$0xff] }
 0x3e2   : > { %v9964_v8 = vpop.f32.mrf.mxu1  ;;  %v4012_v1 = vadd.f32 %v9914_v58, %v3787_v44 }
 0x3e3   : > { %v4271_v56 = vsel %vm4266_vm3, %v4241_v40, 0  ;;  %v4240_v20 = vadd.f32 %v4147_v38, %v14130_v22  ;;  %v4165_v45 = vadd.f32 %v9964_v8, %v3988_v51  ;;  %v4005_v13 = vpop.f32.mrf.mxu0 }
 0x3e4   : > { %v12428_v23 = vand.u32 4294901760, %v4271_v56  ;;  %v4158_v57 = vpop.f32.mrf.mxu1  ;;  %v4006_v26 = vadd.f32 %v4005_v13, %v3779_v5 }
 0x3e5   : > { %v4268_v24 = vsel %vm4266_vm3, %v4240_v20, 0  ;;  %v4243_v37 = vadd.f32 %v4165_v45, %v14131_v9  ;;  %v4159_v14 = vadd.f32 %v4158_v57, %v3982_v63  ;;  %v9917_v19 = vpop.f32.mrf.mxu0 }
 0x3e6   : > { %v12433_v31 = vsub.f32 %v4271_v56, %v12428_v23  ;;  %v12435_v54 = vand.u32 4294901760, %v4268_v24  ;;  %v9967_v59 = vpop.f32.mrf.mxu1  ;;  %v4024_v46 = vadd.f32 %v9917_v19, %v3803_v4  ;;  %v14138_v56 = vld [vmem:[#allocation50_spill] sm:$0xff] }
 0x3e7   : > { %v4277_v16 = vsel %vm4266_vm3, %v4243_v37, 0  ;;  %v4242_v39 = vadd.f32 %v4159_v14, %v14132_v25  ;;  %v4177_v15 = vadd.f32 %v9967_v59, %v4000_v10  ;;  %v4017_v17 = vpop.f32.mrf.mxu0  ;;  %v14139_v10 = vld [vmem:[#allocation29_spill] sm:$0xff] }
 0x3e8   : > { %v4398_v29 = vand.u32 4294901760, %v12433_v31  ;;  %v12441_v62 = vsub.f32 %v4268_v24, %v12435_v54  ;;  %v12443_v21 = vand.u32 4294901760, %v4277_v16  ;;  %v4170_v0 = vpop.f32.mrf.mxu1  ;;  %10019 = vmatprep.mubr.f32.mxu1 %v12435_v54  ;;  %v4018_v34 = vadd.f32 %v4017_v17, %v3795_v41 }
 0x3e9   : > { %v4274_v2 = vsel %vm4266_vm3, %v4242_v39, 0  ;;  %v4245_v49 = vadd.f32 %v4177_v15, %v14133_v6  ;;  %v4171_v44 = vadd.f32 %v4170_v0, %v3994_v50  ;;  %10020 = vmatmul.mubr.f32.vlgmr.msra.gmra.mxu1 %v12428_v23  ;;  %v9920_v12 = vpop.f32.mrf.mxu0 }
 0x3ea   : > { %v4399_v47 = vsub.f32 %v12433_v31, %v4398_v29  ;;  %v12453_v5 = vsub.f32 %v4277_v16, %v12443_v21  ;;  %v12455_v53 = vand.u32 4294901760, %v4274_v2  ;;  %v4036_v30 = vadd.f32 %v9920_v12, %v3819_v60  ;;  %v9970_v33 = vpop.f32.mrf.mxu1  ;;  %10074 = vmatpush3.msra.mxu1 %v14134_v32 }
 0x3eb   : > { %v4283_v4 = vsel %vm4266_vm3, %v4245_v49, 0  ;;  %v4244_v41 = vadd.f32 %v4171_v44, %v14135_v36  ;;  %v4189_v52 = vadd.f32 %v9970_v33, %v4012_v1  ;;  %v4029_v7 = vpop.f32.mrf.mxu0  ;;  %v4388_v51 = vand.u32 4294901760, %v12441_v62  ;;  %10075 = vmatprep.subr.mxu1 %v14136_v61  ;;  %v14141_v44 = vld [vmem:[#allocation23_spill] sm:$0xff] }
 0x3ec   : > { %v4400_v40 = vand.u32 4294901760, %v4399_v47  ;;  %v12463_v38 = vsub.f32 %v4274_v2, %v12455_v53  ;;  %v12465_v58 = vand.u32 4294901760, %v4283_v4  ;;  %v4030_v11 = vadd.f32 %v4029_v7, %v3811_v42  ;;  %v4182_v60 = vpop.f32.mrf.mxu1  ;;  %10022 = vmatprep.mubr.f32.mxu1 %v12455_v53  ;;  %10076 = vmatpush3.msra.mxu1 %v14136_v61  ;;  %v14142_v47 = vld [vmem:[#allocation35_spill] sm:$0xff] }
 0x3ed   : > { %v4280_v48 = vsel %vm4266_vm3, %v4244_v41, 0  ;;  %v4247_v28 = vadd.f32 %v4189_v52, %v14137_v18  ;;  %v4183_v3 = vadd.f32 %v4182_v60, %v4006_v26  ;;  %10023 = vmatmul.mubr.f32.gmra.mxu1 %v12443_v21  ;;  %v9923_v8 = vpop.f32.mrf.mxu0  ;;  %v4389_v63 = vsub.f32 %v12441_v62, %v4388_v51  ;;  %10077 = vmatprep.subr.mxu1 %v14138_v56  ;;  %v14140_v26 = vld [vmem:[#allocation7_spill] sm:$0xff] }
 0x3ee   : > { %v12477_v42 = vsub.f32 %v4283_v4, %v12465_v58  ;;  %v12479_v22 = vand.u32 4294901760, %v4280_v48  ;;  %v4048_v20 = vadd.f32 %v9923_v8, %v12418_v27  ;;  %v9973_v45 = vpop.f32.mrf.mxu1  ;;  %v4408_v13 = vand.u32 4294901760, %v12463_v38  ;;  %10078 = vmatpush3.msra.mxu1 %v14138_v56 }
 0x3ef   : > { %v4289_v57 = vsel %vm4266_vm3, %v4247_v28, 0  ;;  %v4246_v24 = vadd.f32 %v4183_v3, %v14139_v10  ;;  %v4201_v9 = vadd.f32 %v9973_v45, %v4024_v46  ;;  %v4041_v37 = vpop.f32.mrf.mxu0  ;;  %v4390_v14 = vand.u32 4294901760, %v4389_v63  ;;  %10133 = vmatprep.subr.mxu1 %v14134_v32  ;;  %v14144_v28 = vld [vmem:[#allocation47_spill] sm:$0xff] }
 0x3f0   : > { %v12488_v19 = vsub.f32 %v4280_v48, %v12479_v22  ;;  %v12490_v50 = vand.u32 4294901760, %v4289_v57  ;;  %v4042_v27 = vadd.f32 %v4041_v37, %v12422_v43  ;;  %v4194_v1 = vpop.f32.mrf.mxu1  ;;  %10025 = vmatprep.mubr.f32.mxu1 %v12479_v22  ;;  %v4409_v59 = vsub.f32 %v12463_v38, %v4408_v13  ;;  %v14146_v37 = vld [vmem:[#allocation55_spill] sm:$0xff] }
 0x3f1   : > { %v4286_v16 = vsel %vm4266_vm3, %v4246_v24, 0  ;;  %v4249_v25 = vadd.f32 %v4201_v9, %v14140_v26  ;;  %v4195_v39 = vadd.f32 %v4194_v1, %v4018_v34  ;;  %9989 = vmatprep.mubr.f32.mxu0 %v4390_v14  ;;  %10026 = vmatmul.mubr.f32.gmra.mxu1 %v12465_v58  ;;  %v9926_v15 = vpop.f32.mrf.mxu0  ;;  %v4418_v17 = vand.u32 4294901760, %v12453_v5 }
 0x3f2   : > { %v12502_v43 = vsub.f32 %v4289_v57, %v12490_v50  ;;  %v12504_v46 = vand.u32 4294901760, %v4286_v16  ;;  %9990 = vmatmul.mubr.f32.vlgmr.msra.gmra.mxu0 %v4400_v40  ;;  %v4060_v0 = vadd.f32 %v9926_v15, %v12424_v35  ;;  %v9976_v2 = vpop.f32.mrf.mxu1  ;;  %v4410_v6 = vand.u32 4294901760, %v4409_v59  ;;  %v14143_v40 = vld [vmem:[#allocation32_spill] sm:$0xff]  ;;  %v14145_v57 = vld [vmem:[#allocation10_spill] sm:$0xff] }
 0x3f3   : > { %v4295_v49 = vsel %vm4266_vm3, %v4249_v25, 0  ;;  %v4248_v34 = vadd.f32 %v4195_v39, %v14141_v44  ;;  %v4213_v12 = vadd.f32 %v9976_v2, %v4036_v30  ;;  %10044 = vmatpush3.msra.mxu0 %v14142_v47  ;;  %v4053_v33 = vpop.f32.mrf.mxu0  ;;  %v4419_v4 = vsub.f32 %v12453_v5, %v4418_v17  ;;  %v14147_v25 = vld [vmem:[#allocation3_spill] sm:$0xff] }
 0x3f4   : > { %v12514_v36 = vsub.f32 %v4286_v16, %v12504_v46  ;;  %v12516_v41 = vand.u32 4294901760, %v4295_v49  ;;  %v4054_v35 = vadd.f32 %v4053_v33, %v12426_v55  ;;  %v4206_v52 = vpop.f32.mrf.mxu1  ;;  %9992 = vmatprep.mubr.f32.mxu0 %v4410_v6  ;;  %10028 = vmatprep.mubr.f32.mxu1 %v12504_v46  ;;  %v4428_v30 = vand.u32 4294901760, %v12488_v19  ;;  %v14148_v6 = vld [vmem:[#allocation41_spill] sm:$0xff]  ;;  %v14149_v33 = vld [vmem:[#allocation12_spill] sm:$0xff] }
 0x3f5   : > { %v4292_v7 = vsel %vm4266_vm3, %v4248_v34, 0  ;;  %v4251_v60 = vadd.f32 %v4213_v12, %v14143_v40  ;;  %v4207_v48 = vadd.f32 %v4206_v52, %v4030_v11  ;;  %v4420_v18 = vand.u32 4294901760, %v4419_v4  ;;  %10029 = vmatmul.mubr.f32.gmra.mxu1 %v12490_v50  ;;  %10045 = vmatprep.subr.mxu0 %v14144_v28 }
 0x3f6   : > { %v12526_v3 = vsub.f32 %v4295_v49, %v12516_v41  ;;  %v12528_v55 = vand.u32 4294901760, %v4292_v7  ;;  %v9979_v8 = vpop.f32.mrf.mxu1  ;;  %v4429_v63 = vsub.f32 %v12488_v19, %v4428_v30  ;;  %v4438_v45 = vand.u32 4294901760, %v12477_v42  ;;  %10046 = vmatpush3.msra.mxu0 %v14144_v28 }
 0x3f7   : > { %v4301_v11 = vsel %vm4266_vm3, %v4251_v60, 0  ;;  %v4250_v10 = vadd.f32 %v4207_v48, %v14145_v57  ;;  %9993 = vmatmul.mubr.f32.gmra.mxu0 %v4420_v18  ;;  %v4225_v24 = vadd.f32 %v9979_v8, %v4048_v20  ;;  %v4448_v9 = vand.u32 4294901760, %v12514_v36  ;;  %10047 = vmatprep.subr.mxu0 %v14146_v37 }
 0x3f8   : > { %v12540_v14 = vsub.f32 %v4292_v7, %v12528_v55  ;;  %v12542_v1 = vand.u32 4294901760, %v4301_v11  ;;  %v4218_v59 = vpop.f32.mrf.mxu1  ;;  %v4430_v16 = vand.u32 4294901760, %v4429_v63  ;;  %10031 = vmatprep.mubr.f32.mxu1 %v12528_v55  ;;  %v4439_v26 = vsub.f32 %v12477_v42, %v4438_v45  ;;  %10048 = vmatpush3.msra.mxu0 %v14146_v37  ;;  %v14150_v63 = vld [vmem:[#allocation14_spill] sm:$0xff] }
 0x3f9   : > { %v4298_v20 = vsel %vm4266_vm3, %v4250_v10, 0  ;;  %v4253_v39 = vadd.f32 %v4225_v24, %v14147_v25  ;;  %v4219_v15 = vadd.f32 %v4218_v59, %v4042_v27  ;;  %10032 = vmatmul.mubr.f32.gmra.mxu1 %v12516_v41  ;;  %v4449_v2 = vsub.f32 %v12514_v36, %v4448_v9  ;;  %10103 = vmatprep.subr.mxu0 %v14148_v6 }
 0x3fa   : > { %v12557_v49 = vsub.f32 %v4301_v11, %v12542_v1  ;;  %v12559_v44 = vand.u32 4294901760, %v4298_v20  ;;  %9995 = vmatprep.mubr.f32.mxu0 %v4430_v16  ;;  %v4440_v34 = vand.u32 4294901760, %v4439_v26  ;;  %v9982_v12 = vpop.f32.mrf.mxu1  ;;  %v4458_v47 = vand.u32 4294901760, %v12502_v43  ;;  %v14151_v26 = vld [vmem:[#allocation6_spill] sm:$0xff] }
 0x3fb   : > { %v4307_v27 = vsel %vm4266_vm3, %v4253_v39, 0  ;;  %v4252_v4 = vadd.f32 %v4219_v15, %v14149_v33  ;;  %v4237_v52 = vadd.f32 %v9982_v12, %v4060_v0  ;;  %v4450_v7 = vand.u32 4294901760, %v4449_v2 }
 0x3fc   : > { %v12565_v40 = vsub.f32 %v4298_v20, %v12559_v44  ;;  %v12567_v60 = vand.u32 4294901760, %v4307_v27  ;;  %9996 = vmatmul.mubr.f32.gmra.mxu0 %v4440_v34  ;;  %v4230_v48 = vpop.f32.mrf.mxu1  ;;  %10034 = vmatprep.mubr.f32.mxu1 %v12559_v44  ;;  %v4459_v18 = vsub.f32 %v12502_v43, %v4458_v47  ;;  %v4468_v28 = vand.u32 4294901760, %v12540_v14 }
 0x3fd   : > { %v4304_v8 = vsel %vm4266_vm3, %v4252_v4, 0  ;;  %v4255_v0 = vadd.f32 %v4237_v52, %v14150_v63  ;;  %v4231_v11 = vadd.f32 %v4230_v48, %v4054_v35  ;;  %9998 = vmatprep.mubr.f32.mxu0 %v4450_v7  ;;  %10035 = vmatmul.mubr.f32.gmra.mxu1 %v12542_v1  ;;  %v4478_v57 = vand.u32 4294901760, %v12526_v3 }
 0x3fe   : > { %v12579_v10 = vsub.f32 %v4307_v27, %v12567_v60  ;;  %v12581_v24 = vand.u32 4294901760, %v4304_v8  ;;  %v4460_v37 = vand.u32 4294901760, %v4459_v18  ;;  %v4469_v59 = vsub.f32 %v12540_v14, %v4468_v28 }
 0x3ff   : > { %v4313_v16 = vsel %vm4266_vm3, %v4255_v0, 0  ;;  %v4254_v20 = vadd.f32 %v4231_v11, %v14151_v26  ;;  %v4479_v35 = vsub.f32 %v12526_v3, %v4478_v57  ;;  %v4488_v25 = vand.u32 4294901760, %v12565_v40 }
 0x400   : > { %v12593_v39 = vsub.f32 %v4304_v8, %v12581_v24  ;;  %v12595_v15 = vand.u32 4294901760, %v4313_v16  ;;  %9999 = vmatmul.mubr.f32.gmra.mxu0 %v4460_v37  ;;  %v4470_v2 = vand.u32 4294901760, %v4469_v59  ;;  %10037 = vmatprep.mubr.f32.mxu1 %v12581_v24  ;;  %v4498_v34 = vand.u32 4294901760, %v12557_v49 }
 0x401   : > { %v4310_v12 = vsel %vm4266_vm3, %v4254_v20, 0  ;;  %v4480_v27 = vand.u32 4294901760, %v4479_v35  ;;  %10038 = vmatmul.mubr.f32.gmra.mxu1 %v12567_v60  ;;  %v4489_v33 = vsub.f32 %v12565_v40, %v4488_v25  ;;  %v4518_v4 = vand.u32 4294901760, %v12579_v10 }
 0x402   : > { %v12606_v52 = vsub.f32 %v4313_v16, %v12595_v15  ;;  %v12608_v7 = vand.u32 4294901760, %v4310_v12  ;;  %10001 = vmatprep.mubr.f32.mxu0 %v4470_v2  ;;  %v4499_v48 = vsub.f32 %v12557_v49, %v4498_v34  ;;  %v4508_v18 = vand.u32 4294901760, %v12593_v39 }
 0x403   : > { %v4490_v8 = vand.u32 4294901760, %v4489_v33  ;;  %v4519_v11 = vsub.f32 %v12579_v10, %v4518_v4 }
 0x404   : > { %v12613_v63 = vsub.f32 %v4310_v12, %v12608_v7  ;;  %10002 = vmatmul.mubr.f32.gmra.mxu0 %v4480_v27  ;;  %10040 = vmatprep.mubr.f32.mxu1 %v12608_v7  ;;  %v4509_v0 = vsub.f32 %v12593_v39, %v4508_v18  ;;  %v4500_v37 = vand.u32 4294901760, %v4499_v48  ;;  %v4538_v26 = vand.u32 4294901760, %v12606_v52 }
 0x405   : > { %10004 = vmatprep.mubr.f32.mxu0 %v4490_v8  ;;  %10041 = vmatmul.mubr.f32.gmra.mxu1 %v12595_v15  ;;  %v4520_v35 = vand.u32 4294901760, %v4519_v11 }
 0x406   : > { %10079 = vmatprep.mubr.f32.mxu1 %v4388_v51  ;;  %v4510_v59 = vand.u32 4294901760, %v4509_v0  ;;  %v4528_v16 = vand.u32 4294901760, %v12613_v63  ;;  %v4539_v12 = vsub.f32 %v12606_v52, %v4538_v26 }
 0x408   : > { %10005 = vmatmul.mubr.f32.gmra.mxu0 %v4500_v37  ;;  %v4529_v20 = vsub.f32 %v12613_v63, %v4528_v16  ;;  %v4540_v51 = vand.u32 4294901760, %v4539_v12 }
 0x409   : > { %10007 = vmatprep.mubr.f32.mxu0 %v4510_v59  ;;  %10080 = vmatmul.mubr.f32.vlgmr.msra.gmra.mxu1 %v4398_v29  ;;  %v14152_v29 = vld [vmem:[#allocation11_spill] sm:$0xff] }
 0x40a   : > { %10082 = vmatprep.mubr.f32.mxu1 %v4408_v13  ;;  %v4530_v2 = vand.u32 4294901760, %v4529_v20  ;;  %10134 = vmatpush3.msra.mxu1 %v14134_v32 }
 0x40b   : > { %10135 = vmatprep.subr.mxu1 %v14136_v61 }
 0x40c   : > { %10008 = vmatmul.mubr.f32.gmra.mxu0 %v4520_v35  ;;  %10136 = vmatpush3.msra.mxu1 %v14136_v61 }
 0x40d   : > { %10010 = vmatprep.mubr.f32.mxu0 %v4530_v2  ;;  %10083 = vmatmul.mubr.f32.gmra.mxu1 %v4418_v17 }
 0x40e   : > { %10085 = vmatprep.mubr.f32.mxu1 %v4428_v30  ;;  %10137 = vmatprep.subr.mxu1 %v14138_v56 }
 0x40f   : > { %10138 = vmatpush3.msra.mxu1 %v14138_v56 }
 0x410   : > { %10011 = vmatmul.mubr.f32.gmra.mxu0 %v4540_v51 }
 0x411   : > { %10049 = vmatprep.mubr.f32.mxu0 %v12441_v62  ;;  %10086 = vmatmul.mubr.f32.gmra.mxu1 %v4438_v45  ;;  %v14153_v62 = vld [vmem:[#allocation16_spill] sm:$0xff] }
 0x412   : > { %10088 = vmatprep.mubr.f32.mxu1 %v4448_v9 }
 0x414   : > { %10050 = vmatmul.mubr.f32.vlgmr.msra.gmra.mxu0 %v12433_v31 }
 0x415   : > { %10052 = vmatprep.mubr.f32.mxu0 %v12463_v38  ;;  %10104 = vmatpush3.msra.mxu0 %v14148_v6 }
 0x416   : > { %10089 = vmatmul.mubr.f32.gmra.mxu1 %v4458_v47  ;;  %10105 = vmatprep.subr.mxu0 %v14152_v29 }
 0x417   : > { %10091 = vmatprep.mubr.f32.mxu1 %v4468_v28  ;;  %10106 = vmatpush3.msra.mxu0 %v14152_v29 }
 0x418   : > { %10053 = vmatmul.mubr.f32.gmra.mxu0 %v12453_v5  ;;  %10107 = vmatprep.subr.mxu0 %v14153_v62  ;;  %v12706_v5 = vld [vmem:[%s13702_s7] ss:$0 sm:$0xff] }
 0x419   : > { %10055 = vmatprep.mubr.f32.mxu0 %v12488_v19  ;;  %10108 = vmatpush3.msra.mxu0 %v14153_v62 }
 0x41a   : > { %10092 = vmatmul.mubr.f32.gmra.mxu1 %v4478_v57 }
 0x41b   : > { %10094 = vmatprep.mubr.f32.mxu1 %v4488_v25 }
 0x41c   : > { %10056 = vmatmul.mubr.f32.gmra.mxu0 %v12477_v42 }
 0x41d   : > { %10058 = vmatprep.mubr.f32.mxu0 %v12514_v36 }
 0x41e   : > { %10095 = vmatmul.mubr.f32.gmra.mxu1 %v4498_v34 }
 0x41f   : > { %10097 = vmatprep.mubr.f32.mxu1 %v4508_v18 }
 0x420   : > { %10059 = vmatmul.mubr.f32.gmra.mxu0 %v12502_v43 }
 0x421   : > { %10061 = vmatprep.mubr.f32.mxu0 %v12540_v14 }
 0x422   : > { %10098 = vmatmul.mubr.f32.gmra.mxu1 %v4518_v4 }
 0x423   : > { %10100 = vmatprep.mubr.f32.mxu1 %v4528_v16 }
 0x424   : > { %10062 = vmatmul.mubr.f32.gmra.mxu0 %v12526_v3 }
 0x425   : > { %10064 = vmatprep.mubr.f32.mxu0 %v12565_v40 }
 0x426   : > { %10101 = vmatmul.mubr.f32.gmra.mxu1 %v4538_v26 }
 0x427   : > { %10139 = vmatprep.mubr.f32.mxu1 %v12435_v54 }
 0x428   : > { %10065 = vmatmul.mubr.f32.gmra.mxu0 %v12557_v49 }
 0x429   : > { %10067 = vmatprep.mubr.f32.mxu0 %v12593_v39 }
 0x42a   : > { %10140 = vmatmul.mubr.f32.vlgmr.msra.gmra.mxu1 %v12428_v23 }
 0x42b   : > { %10142 = vmatprep.mubr.f32.mxu1 %v12455_v53 }
 0x42c   : > { %10068 = vmatmul.mubr.f32.gmra.mxu0 %v12579_v10 }
 0x42d   : > { %10070 = vmatprep.mubr.f32.mxu0 %v12613_v63 }
 0x42e   : > { %10143 = vmatmul.mubr.f32.gmra.mxu1 %v12443_v21 }
 0x42f   : > { %10145 = vmatprep.mubr.f32.mxu1 %v12479_v22 }
 0x430   : > { %10071 = vmatmul.mubr.f32.gmra.mxu0 %v12606_v52 }
 0x431   : > { %10109 = vmatprep.mubr.f32.mxu0 %v12435_v54 }
 0x432   : > { %10146 = vmatmul.mubr.f32.gmra.mxu1 %v12465_v58 }
 0x433   : > { %10148 = vmatprep.mubr.f32.mxu1 %v12504_v46 }
 0x434   : > { %10110 = vmatmul.mubr.f32.vlgmr.msra.gmra.mxu0 %v12428_v23 }
 0x435   : > { %10112 = vmatprep.mubr.f32.mxu0 %v12455_v53 }
 0x436   : > { %10149 = vmatmul.mubr.f32.gmra.mxu1 %v12490_v50 }
 0x437   : > { %10151 = vmatprep.mubr.f32.mxu1 %v12528_v55 }
 0x438   : > { %10113 = vmatmul.mubr.f32.gmra.mxu0 %v12443_v21 }
 0x439   : > { %10115 = vmatprep.mubr.f32.mxu0 %v12479_v22 }
 0x43a   : > { %10152 = vmatmul.mubr.f32.gmra.mxu1 %v12516_v41 }
 0x43b   : > { %10154 = vmatprep.mubr.f32.mxu1 %v12559_v44 }
 0x43c   : > { %10116 = vmatmul.mubr.f32.gmra.mxu0 %v12465_v58 }
 0x43d   : > { %10118 = vmatprep.mubr.f32.mxu0 %v12504_v46 }
 0x43e   : > { %10155 = vmatmul.mubr.f32.gmra.mxu1 %v12542_v1 }
 0x43f   : > { %10157 = vmatprep.mubr.f32.mxu1 %v12581_v24 }
 0x440   : > { %10119 = vmatmul.mubr.f32.gmra.mxu0 %v12490_v50 }
 0x441   : > { %10121 = vmatprep.mubr.f32.mxu0 %v12528_v55 }
 0x442   : > { %10158 = vmatmul.mubr.f32.gmra.mxu1 %v12567_v60 }
 0x443   : > { %10160 = vmatprep.mubr.f32.mxu1 %v12608_v7 }
 0x444   : > { %10122 = vmatmul.mubr.f32.gmra.mxu0 %v12516_v41 }
 0x445   : > { %10124 = vmatprep.mubr.f32.mxu0 %v12559_v44  ;;  %v5483_v44 = vld [vmem:[%s12728_s19] sm:$0xff] }
 0x446   : > { %10161 = vmatmul.mubr.f32.gmra.mxu1 %v12595_v15  ;;  %v12732_v40 = vand.u32 4294901760, %v5483_v44 }
 0x448   : > { %10125 = vmatmul.mubr.f32.gmra.mxu0 %v12542_v1  ;;  %14154 = vst [vmem:[#allocation66_spill] sm:$0xff] %v12732_v40  ;;  %10233 = vmatprep.mubr.f32.mxu1 %v12732_v40 }
 0x449   : > { %10127 = vmatprep.mubr.f32.mxu0 %v12581_v24  ;;  %v12736_v24 = vsub.f32 %v5483_v44, %v12732_v40 }
 0x44b   : > { %v13868_v27 = vand.u32 4294901760, %v12736_v24 }
 0x44c   : > { %10128 = vmatmul.mubr.f32.gmra.mxu0 %v12567_v60 }
 0x44d   : > { %10130 = vmatprep.mubr.f32.mxu0 %v12608_v7  ;;  %v5571_v48 = vsub.f32 %v12736_v24, %v13868_v27 }
 0x44f   : > { %v5572_v11 = vand.u32 4294901760, %v5571_v48 }
 0x450   : > { %10131 = vmatmul.mubr.f32.gmra.mxu0 %v12595_v15 }
 0x451   : > { %10195 = vmatprep.mubr.f32.mxu0 %v5572_v11 }
 0x4a9   : > { %v10021_v23 = vpop.f32.mrf.mxu1 }
 0x4ab   : > { %v4628_v31 = vpop.f32.mrf.mxu1 }
 0x4ad   : > { %v10024_v54 = vpop.f32.mrf.mxu1 }
 0x4af   : > { %v4640_v21 = vpop.f32.mrf.mxu1 }
 0x4b1   : > { %v10027_v53 = vpop.f32.mrf.mxu1 }
 0x4b2   : > { %v9991_v32 = vpop.f32.mrf.mxu0 }
 0x4b3   : > { %v4403_v61 = vadd.f32 %v9991_v32, %v12706_v5  ;;  %v4652_v38 = vpop.f32.mrf.mxu1 }
 0x4b4   : > { %v4392_v58 = vpop.f32.mrf.mxu0 }
 0x4b5   : > { %v4393_v56 = vadd.f32 %v12706_v5, %v4392_v58  ;;  %v10030_v42 = vpop.f32.mrf.mxu1  ;;  %v12710_v22 = vadd.f32 %v10021_v23, %v4403_v61 }
 0x4b7   : > { %v9994_v13 = vpop.f32.mrf.mxu0  ;;  %v4664_v19 = vpop.f32.mrf.mxu1  ;;  %v12712_v50 = vadd.f32 %v4628_v31, %v4393_v56 }
 0x4b8   : > { %v4423_v17 = vadd.f32 %v9994_v13, %v12706_v5 }
 0x4b9   : > { %v4412_v43 = vpop.f32.mrf.mxu0  ;;  %v10033_v46 = vpop.f32.mrf.mxu1 }
 0x4ba   : > { %v4413_v36 = vadd.f32 %v12706_v5, %v4412_v43  ;;  %v12716_v41 = vadd.f32 %v10024_v54, %v4423_v17 }
 0x4bb   : > { %v4676_v30 = vpop.f32.mrf.mxu1 }
 0x4bc   : > { %v9997_v3 = vpop.f32.mrf.mxu0  ;;  %v12718_v55 = vadd.f32 %v4640_v21, %v4413_v36 }
 0x4bd   : > { %v4443_v45 = vadd.f32 %v9997_v3, %v12706_v5  ;;  %v10036_v9 = vpop.f32.mrf.mxu1 }
 0x4be   : > { %v4432_v14 = vpop.f32.mrf.mxu0 }
 0x4bf   : > { %v4433_v1 = vadd.f32 %v12706_v5, %v4432_v14  ;;  %v4688_v6 = vpop.f32.mrf.mxu1  ;;  %v4659_v49 = vadd.f32 %v10027_v53, %v4443_v45 }
 0x4c0   : > { %v10000_v47 = vpop.f32.mrf.mxu0 }
 0x4c1   : > { %v4463_v60 = vadd.f32 %v10000_v47, %v12706_v5  ;;  %v10039_v28 = vpop.f32.mrf.mxu1  ;;  %v4653_v57 = vadd.f32 %v4652_v38, %v4433_v1 }
 0x4c2   : > { %v4452_v10 = vpop.f32.mrf.mxu0 }
 0x4c3   : > { %v4453_v25 = vadd.f32 %v12706_v5, %v4452_v10  ;;  %v4700_v39 = vpop.f32.mrf.mxu1  ;;  %v12740_v15 = vadd.f32 %v10030_v42, %v4463_v60 }
 0x4c4   : > { %v10003_v34 = vpop.f32.mrf.mxu0 }
 0x4c5   : > { %v4483_v33 = vadd.f32 %v10003_v34, %v12706_v5  ;;  %v12744_v4 = vpop.f32.mrf.mxu1  ;;  %v12746_v52 = vadd.f32 %v4664_v19, %v4453_v25 }
 0x4c6   : > { %v4472_v7 = vpop.f32.mrf.mxu0 }
 0x4c7   : > { %v4473_v18 = vadd.f32 %v12706_v5, %v4472_v7  ;;  %v12752_v8 = vpop.f32.mrf.mxu1  ;;  %v12754_v63 = vadd.f32 %v10033_v46, %v4483_v33 }
 0x4c8   : > { %v10006_v0 = vpop.f32.mrf.mxu0 }
 0x4c9   : > { %v4503_v37 = vadd.f32 %v10006_v0, %v12706_v5  ;;  %v10081_v59 = vpop.f32.mrf.mxu1  ;;  %v12757_v16 = vadd.f32 %v4676_v30, %v4473_v18 }
 0x4ca   : > { %v4492_v26 = vpop.f32.mrf.mxu0 }
 0x4cb   : > { %v4493_v20 = vadd.f32 %v12706_v5, %v4492_v26  ;;  %v4977_v35 = vpop.f32.mrf.mxu1  ;;  %v12760_v2 = vadd.f32 %v10036_v9, %v4503_v37 }
 0x4cc   : > { %v10009_v12 = vpop.f32.mrf.mxu0 }
 0x4cd   : > { %v4523_v51 = vadd.f32 %v10009_v12, %v12706_v5  ;;  %v10084_v29 = vpop.f32.mrf.mxu1  ;;  %v12763_v62 = vadd.f32 %v4688_v6, %v4493_v20 }
 0x4ce   : > { %v4512_v23 = vpop.f32.mrf.mxu0 }
 0x4cf   : > { %v4513_v31 = vadd.f32 %v12706_v5, %v4512_v23  ;;  %v4993_v54 = vpop.f32.mrf.mxu1  ;;  %v12766_v21 = vadd.f32 %v10039_v28, %v4523_v51 }
 0x4d0   : > { %v10012_v53 = vpop.f32.mrf.mxu0 }
 0x4d1   : > { %v10087_v32 = vpop.f32.mrf.mxu1  ;;  %v12768_v61 = vadd.f32 %v4700_v39, %v4513_v31 }
 0x4d2   : > { %v12770_v38 = vpop.f32.mrf.mxu0 }
 0x4d3   : > { %v5009_v58 = vpop.f32.mrf.mxu1 }
 0x4d4   : > { %v10051_v56 = vpop.f32.mrf.mxu0 }
 0x4d5   : > { %v4804_v42 = vadd.f32 %v10051_v56, %v12710_v22 }
 0x4d6   : > { %v4796_v13 = vpop.f32.mrf.mxu0  ;;  %v12773_v19 = vpop.f32.mrf.mxu1 }
 0x4d7   : > { %v4797_v17 = vadd.f32 %v4796_v13, %v12712_v50  ;;  %v4986_v43 = vadd.f32 %v10081_v59, %v4804_v42 }
 0x4d8   : > { %v10054_v46 = vpop.f32.mrf.mxu0  ;;  %v5025_v36 = vpop.f32.mrf.mxu1 }
 0x4d9   : > { %v4818_v30 = vadd.f32 %v10054_v46, %v12716_v41  ;;  %v4978_v3 = vadd.f32 %v4977_v35, %v4797_v17  ;;  %v4543_v17 = vadd.f32 %v10012_v53, %v12706_v5 }
 0x4da   : > { %v4810_v45 = vpop.f32.mrf.mxu0  ;;  %v12777_v9 = vpop.f32.mrf.mxu1 }
 0x4db   : > { %v4811_v14 = vadd.f32 %v4810_v45, %v12718_v55  ;;  %v5002_v1 = vadd.f32 %v10084_v29, %v4818_v30 }
 0x4dc   : > { %v10057_v6 = vpop.f32.mrf.mxu0  ;;  %v12780_v44 = vpop.f32.mrf.mxu1 }
 0x4dd   : > { %v4832_v22 = vadd.f32 %v10057_v6, %v4659_v49  ;;  %v4994_v47 = vadd.f32 %v4993_v54, %v4811_v14 }
 0x4de   : > { %v4824_v60 = vpop.f32.mrf.mxu0  ;;  %v12782_v28 = vpop.f32.mrf.mxu1 }
 0x4df   : > { %v4825_v50 = vadd.f32 %v4824_v60, %v4653_v57  ;;  %v5018_v10 = vadd.f32 %v10087_v32, %v4832_v22 }
 0x4e0   : > { %v10060_v25 = vpop.f32.mrf.mxu0  ;;  %v12784_v39 = vpop.f32.mrf.mxu1 }
 0x4e1   : > { %v5010_v41 = vadd.f32 %v5009_v58, %v4825_v50  ;;  %v4846_v46 = vadd.f32 %v10060_v25, %v12740_v15 }
 0x4e2   : > { %v4838_v34 = vpop.f32.mrf.mxu0  ;;  %v12786_v33 = vpop.f32.mrf.mxu1 }
 0x4e3   : > { %v4839_v30 = vadd.f32 %v4838_v34, %v12746_v52 }
 0x4e4   : > { %v10063_v7 = vpop.f32.mrf.mxu0  ;;  %v12788_v55 = vpop.f32.mrf.mxu1 }
 0x4e5   : > { %v4860_v14 = vadd.f32 %v10063_v7, %v12754_v63  ;;  %v5034_v63 = vadd.f32 %v12773_v19, %v4846_v46  ;;  %v5026_v34 = vadd.f32 %v5025_v36, %v4839_v30 }
 0x4e6   : > { %v4852_v48 = vpop.f32.mrf.mxu0  ;;  %v12790_v18 = vpop.f32.mrf.mxu1 }
 0x4e7   : > { %v4853_v60 = vadd.f32 %v4852_v48, %v12757_v16 }
 0x4e8   : > { %v10066_v49 = vpop.f32.mrf.mxu0  ;;  %v12792_v0 = vpop.f32.mrf.mxu1 }
 0x4e9   : > { %v4874_v15 = vadd.f32 %v10066_v49, %v12760_v2 }
 0x4ea   : > { %v4866_v11 = vpop.f32.mrf.mxu0  ;;  %v10141_v37 = vpop.f32.mrf.mxu1 }
 0x4ec   : > { %v12794_v57 = vpop.f32.mrf.mxu0  ;;  %v5341_v59 = vpop.f32.mrf.mxu1 }
 0x4ee   : > { %v12796_v26 = vpop.f32.mrf.mxu0  ;;  %v10144_v20 = vpop.f32.mrf.mxu1 }
 0x4f0   : > { %v12798_v35 = vpop.f32.mrf.mxu0  ;;  %v5353_v12 = vpop.f32.mrf.mxu1 }
 0x4f2   : > { %v12800_v51 = vpop.f32.mrf.mxu0  ;;  %v10147_v29 = vpop.f32.mrf.mxu1 }
 0x4f4   : > { %v10111_v23 = vpop.f32.mrf.mxu0  ;;  %v5365_v31 = vpop.f32.mrf.mxu1 }
 0x4f5   : > { %v5184_v58 = vadd.f32 %v10111_v23, %v4986_v43  ;;  %v4533_v43 = vadd.f32 %v12706_v5, %v12770_v38 }
 0x4f6   : > { %v5177_v54 = vpop.f32.mrf.mxu0  ;;  %v10150_v32 = vpop.f32.mrf.mxu1 }
 0x4f7   : > { %v5178_v56 = vadd.f32 %v5177_v54, %v4978_v3  ;;  %v5348_v6 = vadd.f32 %v10141_v37, %v5184_v58  ;;  %v12810_v3 = vadd.f32 %v12744_v4, %v4543_v17  ;;  %v5042_v4 = vadd.f32 %v12780_v44, %v4853_v60 }
 0x4f8   : > { %v10114_v42 = vpop.f32.mrf.mxu0  ;;  %v5377_v13 = vpop.f32.mrf.mxu1 }
 0x4f9   : > { %v5342_v50 = vadd.f32 %v5341_v59, %v5178_v56  ;;  %v5196_v27 = vadd.f32 %v10114_v42, %v5002_v1  ;;  %v5452_v7 = vmul.f32 0.0001, %v5348_v6  ;;  %v5050_v1 = vadd.f32 %v12777_v9, %v4860_v14 }
 0x4fa   : > { %v5189_v45 = vpop.f32.mrf.mxu0  ;;  %v10153_v22 = vpop.f32.mrf.mxu1  ;;  %vm5436_vm4 = vcmp.gt.f32.partialorder %v5348_v6, 0.0  ;;  %v4881_v14 = vadd.f32 %v12796_v26, %v12768_v61 }
 0x4fb   : > { %v5190_v52 = vadd.f32 %v5189_v45, %v4994_v47  ;;  %v5451_v59 = vmul.f32 0.0001, %v5342_v50  ;;  %v5360_v5 = vadd.f32 %v10144_v20, %v5196_v27  ;;  %vm5435_vm6 = vcmp.gt.f32.partialorder %v5342_v50, 0.0 }
 0x4fc   : > { %v10117_v40 = vpop.f32.mrf.mxu0  ;;  %v5389_v48 = vpop.f32.mrf.mxu1  ;;  %v12818_v49 = vsel %vm5436_vm4, %v5348_v6, %v5452_v7 }
 0x4fd   : > { %v5208_v53 = vadd.f32 %v10117_v40, %v5018_v10  ;;  %v4867_v10 = vadd.f32 %v4866_v11, %v12763_v62  ;;  %v5354_v19 = vadd.f32 %v5353_v12, %v5190_v52  ;;  %v12824_v62 = vsel %vm5435_vm6, %v5342_v50, %v5451_v59 }
 0x4fe   : > { %v5201_v25 = vpop.f32.mrf.mxu0  ;;  %v10156_v20 = vpop.f32.mrf.mxu1  ;;  %vm5438_vm8 = vcmp.gt.f32.partialorder %v5360_v5, 0.0  ;;  %v4888_v12 = vadd.f32 %v12794_v57, %v12766_v21 }
 0x4ff   : > { %v5372_v37 = vadd.f32 %v10147_v29, %v5208_v53  ;;  %v5202_v16 = vadd.f32 %v5201_v25, %v5010_v41  ;;  %v5066_v41 = vadd.f32 %v12782_v28, %v4874_v15  ;;  %v5454_v29 = vmul.f32 0.0001, %v5360_v5 }
 0x500   : > { %v10120_v38 = vpop.f32.mrf.mxu0  ;;  %v5453_v58 = vmul.f32 0.0001, %v5354_v19  ;;  %vm5437_vm10 = vcmp.gt.f32.partialorder %v5354_v19, 0.0  ;;  %v5058_v21 = vadd.f32 %v12784_v39, %v4867_v10  ;;  %v4713_v53 = vadd.f32 %v12752_v8, %v4533_v43 }
 0x501   : > { %vm5440_vm5 = vcmp.gt.f32.partialorder %v5372_v37, 0.0  ;;  %v5456_v40 = vmul.f32 0.0001, %v5372_v37  ;;  %v5366_v2 = vadd.f32 %v5365_v31, %v5202_v16  ;;  %v5220_v47 = vadd.f32 %v10120_v38, %v5034_v63 }
 0x502   : > { %v5213_v36 = vpop.f32.mrf.mxu0  ;;  %v12834_v6 = vsel %vm5438_vm8, %v5360_v5, %v5454_v29  ;;  %v12842_v61 = vsel %vm5437_vm10, %v5354_v19, %v5453_v58  ;;  %v5082_v43 = vadd.f32 %v12786_v33, %v4888_v12 }
 0x503   : > { %v12820_v9 = vsel %vm5440_vm5, %v5372_v37, %v5456_v40  ;;  %vm5439_vm7 = vcmp.gt.f32.partialorder %v5366_v2, 0.0  ;;  %v5455_v27 = vmul.f32 0.0001, %v5366_v2  ;;  %v5384_v23 = vadd.f32 %v10150_v32, %v5220_v47  ;;  %v5401_v32 = vpop.f32.mrf.mxu1 }
 0x504   : > { %v6286_v44 = vmax.f32 %v12818_v49, %v12820_v9  ;;  %v5214_v31 = vadd.f32 %v5213_v36, %v5026_v34  ;;  %v10123_v54 = vpop.f32.mrf.mxu0  ;;  %v4902_v34 = vadd.f32 %v12798_v35, %v12810_v3  ;;  %v4895_v35 = vadd.f32 %v12800_v51, %v4713_v53 }
 0x505   : > { %v12826_v11 = vsel %vm5439_vm7, %v5366_v2, %v5455_v27  ;;  %v5232_v28 = vadd.f32 %v10123_v54, %v5050_v1  ;;  %vm5442_vm9 = vcmp.gt.f32.partialorder %v5384_v23, 0.0  ;;  %v5458_v17 = vmul.f32 0.0001, %v5384_v23  ;;  %v10159_v25 = vpop.f32.mrf.mxu1 }
 0x506   : > { %v6285_v56 = vmax.f32 %v12824_v62, %v12826_v11  ;;  %v5225_v42 = vpop.f32.mrf.mxu0  ;;  %v5378_v46 = vadd.f32 %v5377_v13, %v5214_v31  ;;  %v5074_v1 = vadd.f32 %v12788_v55, %v4881_v14  ;;  %v5098_v10 = vadd.f32 %v12790_v18, %v4902_v34 }
 0x507   : > { %v5396_v30 = vadd.f32 %v10153_v22, %v5232_v28  ;;  %v5226_v45 = vadd.f32 %v5225_v42, %v5042_v4  ;;  %v12837_v57 = vsel %vm5442_vm9, %v5384_v23, %v5458_v17  ;;  %v5413_v40 = vpop.f32.mrf.mxu1  ;;  %v5090_v31 = vadd.f32 %v12792_v0, %v4895_v35 }
 0x508   : > { %v10126_v60 = vpop.f32.mrf.mxu0  ;;  %vm5441_vm11 = vcmp.gt.f32.partialorder %v5378_v46, 0.0  ;;  %v5457_v50 = vmul.f32 0.0001, %v5378_v46  ;;  %v6288_v13 = vmax.f32 %v12834_v6, %v12837_v57  ;;  %v13056_v17 = vand.u32 4294901760, %v12824_v62 }
 0x509   : > { %vm5444_vm12 = vcmp.gt.f32.partialorder %v5396_v30, 0.0  ;;  %v5460_v22 = vmul.f32 0.0001, %v5396_v30  ;;  %v5390_v15 = vadd.f32 %v5389_v48, %v5226_v45  ;;  %v5244_v63 = vadd.f32 %v10126_v60, %v5066_v41 }
 0x50a   : > { %v5237_v52 = vpop.f32.mrf.mxu0  ;;  %v12844_v26 = vsel %vm5441_vm11, %v5378_v46, %v5457_v50 }
 0x50b   : > { %v5238_v39 = vadd.f32 %v5237_v52, %v5058_v21  ;;  %v6287_v7 = vmax.f32 %v12842_v61, %v12844_v26  ;;  %v12850_v8 = vsel %vm5444_vm12, %v5396_v30, %v5460_v22  ;;  %vm5443_vm13 = vcmp.gt.f32.partialorder %v5390_v15, 0.0 }
 0x50c   : > { %v10129_v37 = vpop.f32.mrf.mxu0  ;;  %v12854_v16 = vmax.f32 %v6286_v44, %v12850_v8  ;;  %v5459_v48 = vmul.f32 0.0001, %v5390_v15  ;;  %v5408_v59 = vadd.f32 %v10156_v20, %v5244_v63  ;;  %v10162_v44 = vpop.f32.mrf.mxu1 }
 0x50d   : > { %v5402_v5 = vadd.f32 %v5401_v32, %v5238_v39  ;;  %v5256_v38 = vadd.f32 %v10129_v37, %v5082_v43  ;;  %v12919_v43 = vand.u32 4294901760, %v12850_v8 }
 0x50e   : > { %v5249_v4 = vpop.f32.mrf.mxu0  ;;  %v12858_v3 = vsel %vm5443_vm13, %v5390_v15, %v5459_v48  ;;  %vm5446_vm14 = vcmp.gt.f32.partialorder %v5408_v59, 0.0  ;;  %v5462_v47 = vmul.f32 0.0001, %v5408_v59  ;;  %v5425_v42 = vpop.f32.mrf.mxu1 }
 0x50f   : > { %v5250_v2 = vadd.f32 %v5249_v4, %v5074_v1  ;;  %v12861_v33 = vmax.f32 %v6285_v56, %v12858_v3  ;;  %vm5445_vm15 = vcmp.gt.f32.partialorder %v5402_v5, 0.0  ;;  %v5461_v55 = vmul.f32 0.0001, %v5402_v5 }
 0x510   : > { %v10132_v19 = vpop.f32.mrf.mxu0  ;;  %v5420_v36 = vadd.f32 %v10159_v25, %v5256_v38  ;;  %v5478_v27 = vsel %vm5446_vm14, %v5408_v59, %v5462_v47  ;;  %v12954_v47 = vsub.f32 %v12850_v8, %v12919_v43 }
 0x511   : > { %v5414_v41 = vadd.f32 %v5413_v40, %v5250_v2  ;;  %v5268_v20 = vadd.f32 %v10132_v19, %v5098_v10  ;;  %v12864_v51 = vmax.f32 %v6288_v13, %v5478_v27  ;;  %v5477_v23 = vsel %vm5445_vm15, %v5402_v5, %v5461_v55 }
 0x512   : > { %v5261_v29 = vpop.f32.mrf.mxu0  ;;  %vm5448_vm1 = vcmp.gt.f32.partialorder %v5420_v36, 0.0  ;;  %v12867_v54 = vmax.f32 %v6287_v7, %v5477_v23  ;;  %v5464_v28 = vmul.f32 0.0001, %v5420_v36  ;;  %v12890_v13 = vand.u32 4294901760, %v5478_v27 }
 0x513   : > { %14155 = vst [vmem:[#allocation27_spill] sm:$0xff] %v12864_v51  ;;  %vm5447_vm2 = vcmp.gt.f32.partialorder %v5414_v41, 0.0  ;;  %v5463_v18 = vmul.f32 0.0001, %v5414_v41  ;;  %v5432_v12 = vadd.f32 %v10162_v44, %v5268_v20  ;;  %v5262_v58 = vadd.f32 %v5261_v29, %v5090_v31 }
 0x514   : > { %14156 = vst [vmem:[#allocation71_spill] sm:$0xff] %v12867_v54  ;;  %v12869_v56 = vsel %vm5448_vm1, %v5420_v36, %v5464_v28  ;;  %v12903_v25 = vand.u32 4294901760, %v5477_v23  ;;  %v12922_v37 = vsub.f32 %v5478_v27, %v12890_v13  ;;  %v12936_v5 = vand.u32 4294901760, %v12858_v3 }
 0x515   : > { %14157 = vst [vmem:[#allocation34_spill] sm:$0xff] %v12869_v56  ;;  %v12873_v46 = vsel %vm5447_vm2, %v5414_v41, %v5463_v18  ;;  %vm5450_vm4 = vcmp.gt.f32.partialorder %v5432_v12, 0.0  ;;  %v12876_v32 = vand.u32 4294901760, %v12869_v56  ;;  %v5466_v30 = vmul.f32 0.0001, %v5432_v12  ;;  %v5484_v18 = vld [vmem:[%s12728_s19 + $0x8] sm:$0xff] }
 0x516   : > { %v5426_v45 = vadd.f32 %v5425_v42, %v5262_v58  ;;  %v12881_v14 = vand.u32 4294901760, %v12873_v46  ;;  %v12939_v38 = vsub.f32 %v5477_v23, %v12903_v25  ;;  %v12949_v40 = vand.u32 4294901760, %v12837_v57 }
 0x517   : > { %v12883_v60 = vsel %vm5450_vm4, %v5432_v12, %v5466_v30  ;;  %v12894_v22 = vsub.f32 %v12869_v56, %v12876_v32  ;;  %v12962_v55 = vand.u32 4294901760, %v12922_v37  ;;  %v12965_v36 = vand.u32 4294901760, %v12844_v26 }
 0x518   : > { %14158 = vst [vmem:[#allocation74_spill] sm:$0xff] %v12883_v60  ;;  %vm5449_vm5 = vcmp.gt.f32.partialorder %v5426_v45, 0.0  ;;  %v12886_v21 = vand.u32 4294901760, %v12883_v60  ;;  %v5465_v53 = vmul.f32 0.0001, %v5426_v45  ;;  %v12907_v63 = vsub.f32 %v12873_v46, %v12881_v14 }
 0x519   : > { %v12930_v1 = vand.u32 4294901760, %v12894_v22  ;;  %v12970_v8 = vsub.f32 %v12858_v3, %v12936_v5  ;;  %v12976_v20 = vand.u32 4294901760, %v12939_v38  ;;  %v12979_v29 = vand.u32 4294901760, %v12820_v9 }
 0x51a   : > { %v12898_v15 = vsub.f32 %v12883_v60, %v12886_v21  ;;  %v12900_v52 = vsel %vm5449_vm5, %v5426_v45, %v5465_v53  ;;  %10163 = vmatprep.subr.mxu0 %v12886_v21  ;;  %v12946_v35 = vand.u32 4294901760, %v12907_v63  ;;  %v13871_v44 = vmov 0  }
 0x51b   : > { %14159 = vst [vmem:[#allocation38_spill] sm:$0xff] %v12900_v52  ;;  %v12910_v39 = vand.u32 4294901760, %v12900_v52  ;;  %10164 = vmatpush3.msra.mxu0 %v12886_v21  ;;  %v5626_v19 = vsub.f32 %v12894_v22, %v12930_v1  ;;  %10616 = vset.pattern.permute.xlu0 %v13871_v44  ;;  %v12985_v3 = vsub.f32 %v12837_v57, %v12949_v40  ;;  %v12991_v28 = vand.u32 4294901760, %v12954_v47 }
 0x51c   : > { %v12916_v7 = vand.u32 4294901760, %v12898_v15  ;;  %v5633_v27 = vsub.f32 %v12907_v63, %v12946_v35  ;;  %v5640_v31 = vsub.f32 %v12922_v37, %v12962_v55  ;;  %v12995_v12 = vand.u32 4294901760, %v12826_v11 }
 0x51d   : > { %v12926_v48 = vsub.f32 %v12900_v52, %v12910_v39  ;;  %10165 = vmatprep.subr.mxu0 %v12910_v39  ;;  %v5627_v23 = vand.u32 4294901760, %v5626_v19  ;;  %v13000_v57 = vsub.f32 %v12844_v26, %v12965_v36  ;;  %v5647_v42 = vsub.f32 %v12939_v38, %v12976_v20 }
 0x51e   : > { %10166 = vmatpush3.msra.mxu0 %v12910_v39  ;;  %v5612_v59 = vsub.f32 %v12898_v15, %v12916_v7  ;;  %v5634_v58 = vand.u32 4294901760, %v5633_v27  ;;  %v13006_v30 = vand.u32 4294901760, %v12970_v8  ;;  %v13009_v45 = vand.u32 4294901760, %v12834_v6 }
 0x51f   : > { %10167 = vmatprep.subr.mxu0 %v12876_v32  ;;  %v12943_v4 = vand.u32 4294901760, %v12926_v48  ;;  %v13012_v53 = vand.u32 4294901760, %v5484_v18  ;;  %v13016_v26 = vsub.f32 %v12820_v9, %v12979_v29  ;;  %v13025_v19 = vand.u32 4294901760, %v12842_v61 }
 0x520   : > { %10168 = vmatpush3.msra.mxu0 %v12876_v32  ;;  %v5613_v2 = vand.u32 4294901760, %v5612_v59  ;;  %v5641_v59 = vand.u32 4294901760, %v5640_v31  ;;  %v13030_v9 = vsub.f32 %v12826_v11, %v12995_v12  ;;  %v5661_v27 = vsub.f32 %v12970_v8, %v13006_v30 }
 0x521   : > { %10169 = vmatprep.subr.mxu0 %v12881_v14  ;;  %v5619_v10 = vsub.f32 %v12926_v48, %v12943_v4  ;;  %v13039_v31 = vand.u32 4294901760, %v12818_v49  ;;  %v13047_v11 = vsub.f32 %v12834_v6, %v13009_v45  ;;  %v13053_v34 = vand.u32 4294901760, %v13016_v26 }
 0x522   : > { %10170 = vmatpush3.msra.mxu0 %v12881_v14  ;;  %10201 = vmatprep.subr.mxu1 %v5613_v2  ;;  %v13061_v6 = vsub.f32 %v12842_v61, %v13025_v19 }
 0x523   : > { %10171 = vmatprep.subr.mxu0 %v12890_v13  ;;  %10202 = vmatpush3.msra.mxu1 %v5613_v2  ;;  %v5620_v41 = vand.u32 4294901760, %v5619_v10  ;;  %v5654_v2 = vsub.f32 %v12954_v47, %v12991_v28  ;;  %v13022_v10 = vand.u32 4294901760, %v12985_v3  ;;  %v13079_v44 = vand.u32 4294901760, %v13047_v11 }
 0x524   : > { %10172 = vmatpush3.msra.mxu0 %v12890_v13  ;;  %v13090_v0 = vand.u32 4294901760, %v13061_v6 }
 0x525   : > { %10173 = vmatprep.subr.mxu0 %v12903_v25  ;;  %10203 = vmatprep.subr.mxu1 %v5620_v41  ;;  %v5668_v50 = vsub.f32 %v12985_v3, %v13022_v10 }
 0x526   : > { %10174 = vmatpush3.msra.mxu0 %v12903_v25  ;;  %10204 = vmatpush3.msra.mxu1 %v5620_v41  ;;  %v5648_v41 = vand.u32 4294901760, %v5647_v42  ;;  %v5655_v42 = vand.u32 4294901760, %v5654_v2  ;;  %v13067_v2 = vand.u32 4294901760, %v13030_v9 }
 0x527   : > { %10175 = vmatprep.subr.mxu0 %v12919_v43  ;;  %10205 = vmatprep.subr.mxu1 %v5627_v23  ;;  %v5669_v61 = vand.u32 4294901760, %v5668_v50 }
 0x528   : > { %10176 = vmatpush3.msra.mxu0 %v12919_v43  ;;  %10206 = vmatpush3.msra.mxu1 %v5627_v23  ;;  %v13036_v23 = vand.u32 4294901760, %v13000_v57  ;;  %v5689_v50 = vsub.f32 %v13030_v9, %v13067_v2 }
 0x529   : > { %10177 = vmatprep.subr.mxu0 %v12936_v5  ;;  %10207 = vmatprep.subr.mxu1 %v5634_v58 }
 0x52a   : > { %10178 = vmatpush3.msra.mxu0 %v12936_v5  ;;  %10208 = vmatpush3.msra.mxu1 %v5634_v58  ;;  %v13043_v58 = vsub.f32 %v5484_v18, %v13012_v53  ;;  %v5662_v18 = vand.u32 4294901760, %v5661_v27  ;;  %v5682_v27 = vsub.f32 %v13016_v26, %v13053_v34 }
 0x52b   : > { %10179 = vmatprep.subr.mxu0 %v12949_v40  ;;  %10209 = vmatprep.subr.mxu1 %v5641_v59 }
 0x52c   : > { %10180 = vmatpush3.msra.mxu0 %v12949_v40  ;;  %10210 = vmatpush3.msra.mxu1 %v5641_v59  ;;  %v5675_v59 = vsub.f32 %v13000_v57, %v13036_v23  ;;  %v14160_v60 = vand.u32 4294901760, %v13043_v58 }
 0x52d   : > { %10181 = vmatprep.subr.mxu0 %v12965_v36  ;;  %10211 = vmatprep.subr.mxu1 %v5648_v41 }
 0x52e   : > { %10182 = vmatpush3.msra.mxu0 %v12965_v36  ;;  %10212 = vmatpush3.msra.mxu1 %v5648_v41  ;;  %v13073_v41 = vsub.f32 %v12818_v49, %v13039_v31  ;;  %v5676_v49 = vand.u32 4294901760, %v5675_v59  ;;  %v5696_v59 = vsub.f32 %v13047_v11, %v13079_v44 }
 0x52f   : > { %10183 = vmatprep.subr.mxu0 %v12979_v29  ;;  %10213 = vmatprep.subr.mxu1 %v5655_v42 }
 0x530   : > { %10184 = vmatpush3.msra.mxu0 %v12979_v29  ;;  %10214 = vmatpush3.msra.mxu1 %v5655_v42  ;;  %v13084_v42 = vsub.f32 %v12824_v62, %v13056_v17  ;;  %v5683_v62 = vand.u32 4294901760, %v5682_v27  ;;  %v13100_v51 = vand.u32 4294901760, %v13073_v41  ;;  %v5697_v54 = vand.u32 4294901760, %v5696_v59  ;;  %v5485_v59 = vld [vmem:[%s12728_s19 + $0x10] sm:$0xff] }
 0x531   : > { %10185 = vmatprep.subr.mxu0 %v12995_v12  ;;  %10215 = vmatprep.subr.mxu1 %v5662_v18 }
 0x532   : > { %10186 = vmatpush3.msra.mxu0 %v12995_v12  ;;  %10216 = vmatpush3.msra.mxu1 %v5662_v18  ;;  %v5581_v18 = vsub.f32 %v13043_v58, %v14160_v60  ;;  %v5703_v60 = vsub.f32 %v13061_v6, %v13090_v0  ;;  %v13107_v52 = vand.u32 4294901760, %v13084_v42 }
 0x533   : > { %10187 = vmatprep.subr.mxu0 %v13009_v45  ;;  %10217 = vmatprep.subr.mxu1 %v5669_v61 }
 0x534   : > { %10188 = vmatpush3.msra.mxu0 %v13009_v45  ;;  %10218 = vmatpush3.msra.mxu1 %v5669_v61  ;;  %v5690_v61 = vand.u32 4294901760, %v5689_v50  ;;  %v5582_v27 = vand.u32 4294901760, %v5581_v18  ;;  %v5704_v50 = vand.u32 4294901760, %v5703_v60  ;;  %v5717_v56 = vsub.f32 %v13084_v42, %v13107_v52 }
 0x535   : > { %10189 = vmatprep.subr.mxu0 %v13025_v19  ;;  %10219 = vmatprep.subr.mxu1 %v5676_v49 }
 0x536   : > { %10190 = vmatpush3.msra.mxu0 %v13025_v19  ;;  %10220 = vmatpush3.msra.mxu1 %v5676_v49  ;;  %v5710_v49 = vsub.f32 %v13073_v41, %v13100_v51 }
 0x537   : > { %10191 = vmatprep.subr.mxu0 %v13039_v31  ;;  %10221 = vmatprep.subr.mxu1 %v5683_v62 }
 0x538   : > { %10192 = vmatpush3.msra.mxu0 %v13039_v31  ;;  %10222 = vmatpush3.msra.mxu1 %v5683_v62  ;;  %v5711_v18 = vand.u32 4294901760, %v5710_v49  ;;  %v5718_v62 = vand.u32 4294901760, %v5717_v56 }
 0x539   : > { %10193 = vmatprep.subr.mxu0 %v13056_v17  ;;  %10223 = vmatprep.subr.mxu1 %v5690_v61 }
 0x53a   : > { %10194 = vmatpush3.msra.mxu0 %v13056_v17  ;;  %10224 = vmatpush3.msra.mxu1 %v5690_v61  ;;  %v5486_v61 = vld [vmem:[%s12728_s19 + $0x18] sm:$0xff] }
 0x53b   : > { %10225 = vmatprep.subr.mxu1 %v5697_v54  ;;  %10239 = vmatprep.subr.mxu0 %v12898_v15  ;;  %v13131_v56 = vand.u32 4294901760, %v5486_v61 }
 0x53c   : > { %10196 = vmatmul.mubr.f32.vlgmr.msra.gmra.mxu0 %v5582_v27  ;;  %10226 = vmatpush3.msra.mxu1 %v5697_v54  ;;  %v13127_v54 = vand.u32 4294901760, %v5485_v59 }
 0x53d   : > { %10240 = vmatpush3.msra.mxu0 %v12898_v15  ;;  %10227 = vmatprep.subr.mxu1 %v5704_v50  ;;  %v13145_v15 = vsub.f32 %v5486_v61, %v13131_v56 }
 0x53e   : > { %10241 = vmatprep.subr.mxu0 %v12926_v48  ;;  %10228 = vmatpush3.msra.mxu1 %v5704_v50 }
 0x53f   : > { %10242 = vmatpush3.msra.mxu0 %v12926_v48  ;;  %10229 = vmatprep.subr.mxu1 %v5711_v18 }
 0x540   : > { %10243 = vmatprep.subr.mxu0 %v12894_v22  ;;  %10230 = vmatpush3.msra.mxu1 %v5711_v18 }
 0x541   : > { %10244 = vmatpush3.msra.mxu0 %v12894_v22  ;;  %10231 = vmatprep.subr.mxu1 %v5718_v62  ;;  %v13140_v22 = vsub.f32 %v5485_v59, %v13127_v54 }
 0x542   : > { %10245 = vmatprep.subr.mxu0 %v12907_v63  ;;  %10232 = vmatpush3.msra.mxu1 %v5718_v62 }
 0x543   : > { %10246 = vmatpush3.msra.mxu0 %v12907_v63  ;;  %10234 = vmatmul.mubr.f32.vlgmr.msra.gmra.mxu1 %v13012_v53  ;;  %v5590_v63 = vand.u32 4294901760, %v13140_v22 }
 0x544   : > { %10247 = vmatprep.subr.mxu0 %v12922_v37  ;;  %10277 = vmatprep.subr.mxu1 %v12886_v21 }
 0x545   : > { %10248 = vmatpush3.msra.mxu0 %v12922_v37  ;;  %10278 = vmatpush3.msra.mxu1 %v12886_v21  ;;  %v5600_v37 = vand.u32 4294901760, %v13145_v15  ;;  %v5591_v48 = vsub.f32 %v13140_v22, %v5590_v63 }
 0x546   : > { %10249 = vmatprep.subr.mxu0 %v12939_v38  ;;  %10279 = vmatprep.subr.mxu1 %v12910_v39 }
 0x547   : > { %10250 = vmatpush3.msra.mxu0 %v12939_v38  ;;  %10280 = vmatpush3.msra.mxu1 %v12910_v39  ;;  %v5601_v38 = vsub.f32 %v13145_v15, %v5600_v37 }
 0x548   : > { %10251 = vmatprep.subr.mxu0 %v12954_v47  ;;  %10281 = vmatprep.subr.mxu1 %v12876_v32 }
 0x549   : > { %10252 = vmatpush3.msra.mxu0 %v12954_v47  ;;  %10282 = vmatpush3.msra.mxu1 %v12876_v32  ;;  %v5592_v47 = vand.u32 4294901760, %v5591_v48 }
 0x54a   : > { %10253 = vmatprep.subr.mxu0 %v12970_v8  ;;  %10283 = vmatprep.subr.mxu1 %v12881_v14 }
 0x54b   : > { %10254 = vmatpush3.msra.mxu0 %v12970_v8  ;;  %10284 = vmatpush3.msra.mxu1 %v12881_v14  ;;  %v5602_v8 = vand.u32 4294901760, %v5601_v38 }
 0x54c   : > { %10255 = vmatprep.subr.mxu0 %v12985_v3  ;;  %10285 = vmatprep.subr.mxu1 %v12890_v13 }
 0x54d   : > { %10256 = vmatpush3.msra.mxu0 %v12985_v3  ;;  %10286 = vmatpush3.msra.mxu1 %v12890_v13 }
 0x54e   : > { %10257 = vmatprep.subr.mxu0 %v13000_v57  ;;  %10287 = vmatprep.subr.mxu1 %v12903_v25 }
 0x54f   : > { %10258 = vmatpush3.msra.mxu0 %v13000_v57  ;;  %10288 = vmatpush3.msra.mxu1 %v12903_v25 }
 0x550   : > { %10259 = vmatprep.subr.mxu0 %v13016_v26  ;;  %10289 = vmatprep.subr.mxu1 %v12919_v43 }
 0x551   : > { %10260 = vmatpush3.msra.mxu0 %v13016_v26  ;;  %10290 = vmatpush3.msra.mxu1 %v12919_v43 }
 0x552   : > { %10261 = vmatprep.subr.mxu0 %v13030_v9  ;;  %10291 = vmatprep.subr.mxu1 %v12936_v5 }
 0x553   : > { %10262 = vmatpush3.msra.mxu0 %v13030_v9  ;;  %10292 = vmatpush3.msra.mxu1 %v12936_v5 }
 0x554   : > { %10263 = vmatprep.subr.mxu0 %v13047_v11  ;;  %10293 = vmatprep.subr.mxu1 %v12949_v40 }
 0x555   : > { %10264 = vmatpush3.msra.mxu0 %v13047_v11  ;;  %10294 = vmatpush3.msra.mxu1 %v12949_v40 }
 0x556   : > { %10265 = vmatprep.subr.mxu0 %v13061_v6  ;;  %10295 = vmatprep.subr.mxu1 %v12965_v36 }
 0x557   : > { %10198 = vmatprep.mubr.f32.mxu0 %v5592_v47  ;;  %10266 = vmatpush3.msra.mxu0 %v13061_v6 }
 0x558   : > { %10296 = vmatpush3.msra.mxu1 %v12965_v36  ;;  %10199 = vmatmul.mubr.f32.gmra.mxu0 %v5602_v8 }
 0x559   : > { %10267 = vmatprep.subr.mxu0 %v13073_v41  ;;  %10297 = vmatprep.subr.mxu1 %v12979_v29 }
 0x55a   : > { %10268 = vmatpush3.msra.mxu0 %v13073_v41  ;;  %10298 = vmatpush3.msra.mxu1 %v12979_v29 }
 0x55b   : > { %10269 = vmatprep.subr.mxu0 %v13084_v42  ;;  %10299 = vmatprep.subr.mxu1 %v12995_v12 }
 0x55c   : > { %10270 = vmatpush3.msra.mxu0 %v13084_v42  ;;  %10271 = vmatprep.mubr.f32.mxu0 %v12736_v24 }
 0x55d   : > { %10300 = vmatpush3.msra.mxu1 %v12995_v12  ;;  %10272 = vmatmul.mubr.f32.vlgmr.msra.gmra.mxu0 %v13043_v58 }
 0x55e   : > { %10301 = vmatprep.subr.mxu1 %v13009_v45  ;;  %10315 = vmatprep.subr.mxu0 %v12916_v7 }
 0x55f   : > { %10236 = vmatprep.mubr.f32.mxu1 %v13127_v54  ;;  %10302 = vmatpush3.msra.mxu1 %v13009_v45 }
 0x560   : > { %10316 = vmatpush3.msra.mxu0 %v12916_v7  ;;  %10237 = vmatmul.mubr.f32.gmra.mxu1 %v13131_v56  ;;  %v14161_v7 = vand.u32 4294901760, %v12736_v24  ;;  %v14163_v24 = vld [vmem:[#allocation66_spill] sm:$0xff] }
 0x561   : > { %10303 = vmatprep.subr.mxu1 %v13025_v19  ;;  %10317 = vmatprep.subr.mxu0 %v12943_v4 }
 0x562   : > { %10274 = vmatprep.mubr.f32.mxu0 %v13140_v22  ;;  %10304 = vmatpush3.msra.mxu1 %v13025_v19 }
 0x563   : > { %10318 = vmatpush3.msra.mxu0 %v12943_v4  ;;  %10305 = vmatprep.subr.mxu1 %v13039_v31  ;;  %v14162_v4 = vand.u32 4294901760, %v13043_v58 }
 0x564   : > { %10275 = vmatmul.mubr.f32.gmra.mxu0 %v13145_v15  ;;  %10319 = vmatprep.subr.mxu0 %v12930_v1 }
 0x565   : > { %10306 = vmatpush3.msra.mxu1 %v13039_v31  ;;  %10320 = vmatpush3.msra.mxu0 %v12930_v1 }
 0x566   : > { %10307 = vmatprep.subr.mxu1 %v13056_v17  ;;  %10321 = vmatprep.subr.mxu0 %v12946_v35 }
 0x567   : > { %10308 = vmatpush3.msra.mxu1 %v13056_v17  ;;  %10309 = vmatprep.mubr.f32.mxu1 %v14161_v7 }
 0x568   : > { %10322 = vmatpush3.msra.mxu0 %v12946_v35  ;;  %10310 = vmatmul.mubr.f32.vlgmr.msra.gmra.mxu1 %v14162_v4 }
 0x569   : > { %10323 = vmatprep.subr.mxu0 %v12962_v55  ;;  %10353 = vmatprep.subr.mxu1 %v12886_v21 }
 0x56a   : > { %10324 = vmatpush3.msra.mxu0 %v12962_v55  ;;  %10354 = vmatpush3.msra.mxu1 %v12886_v21  ;;  %v6260_v21 = vld [vmem:[%s414_s21 + $0x18] sm:$0xff] }
 0x56b   : > { %10325 = vmatprep.subr.mxu0 %v12976_v20  ;;  %10355 = vmatprep.subr.mxu1 %v12910_v39 }
 0x56c   : > { %10312 = vmatprep.mubr.f32.mxu1 %v5590_v63  ;;  %10326 = vmatpush3.msra.mxu0 %v12976_v20 }
 0x56d   : > { %10356 = vmatpush3.msra.mxu1 %v12910_v39  ;;  %10327 = vmatprep.subr.mxu0 %v12991_v28 }
 0x56e   : > { %10313 = vmatmul.mubr.f32.gmra.mxu1 %v5600_v37  ;;  %10357 = vmatprep.subr.mxu1 %v12876_v32 }
 0x56f   : > { %10328 = vmatpush3.msra.mxu0 %v12991_v28  ;;  %10358 = vmatpush3.msra.mxu1 %v12876_v32  ;;  %v6257_v32 = vld [vmem:[%s414_s21] sm:$0xff] }
 0x570   : > { %10329 = vmatprep.subr.mxu0 %v13006_v30  ;;  %10359 = vmatprep.subr.mxu1 %v12881_v14 }
 0x571   : > { %10330 = vmatpush3.msra.mxu0 %v13006_v30  ;;  %10360 = vmatpush3.msra.mxu1 %v12881_v14  ;;  %v14164_v14 = vmov 0  }
 0x572   : > { %10331 = vmatprep.subr.mxu0 %v13022_v10  ;;  %10361 = vmatprep.subr.mxu1 %v12890_v13 }
 0x573   : > { %10332 = vmatpush3.msra.mxu0 %v13022_v10  ;;  %10362 = vmatpush3.msra.mxu1 %v12890_v13  ;;  %v8297_v13 = vld [vmem:[%s13703_s8 + $0x28] sm:$0xf] }
 0x574   : > { %10333 = vmatprep.subr.mxu0 %v13036_v23  ;;  %10363 = vmatprep.subr.mxu1 %v12903_v25 }
 0x575   : > { %10334 = vmatpush3.msra.mxu0 %v13036_v23  ;;  %10364 = vmatpush3.msra.mxu1 %v12903_v25  ;;  %v8296_v25 = vld [vmem:[%s13703_s8 + $0x20] sm:$0xff] }
 0x576   : > { %10335 = vmatprep.subr.mxu0 %v13053_v34  ;;  %10365 = vmatprep.subr.mxu1 %v12919_v43 }
 0x577   : > { %10336 = vmatpush3.msra.mxu0 %v13053_v34  ;;  %10366 = vmatpush3.msra.mxu1 %v12919_v43  ;;  %v13304_v34 = vand.u32 4294901760, %v8296_v25 }
 0x578   : > { %10337 = vmatprep.subr.mxu0 %v13067_v2  ;;  %10367 = vmatprep.subr.mxu1 %v12936_v5 }
 0x579   : > { %10338 = vmatpush3.msra.mxu0 %v13067_v2  ;;  %10368 = vmatpush3.msra.mxu1 %v12936_v5  ;;  %v13312_v5 = vsub.f32 %v8296_v25, %v13304_v34 }
 0x57a   : > { %10339 = vmatprep.subr.mxu0 %v13079_v44  ;;  %10369 = vmatprep.subr.mxu1 %v12949_v40 }
 0x57b   : > { %10340 = vmatpush3.msra.mxu0 %v13079_v44  ;;  %10370 = vmatpush3.msra.mxu1 %v12949_v40  ;;  %v13323_v55 = vand.u32 4294901760, %v13312_v5 }
 0x57c   : > { %10341 = vmatprep.subr.mxu0 %v13090_v0  ;;  %10371 = vmatprep.subr.mxu1 %v12965_v36 }
 0x57d   : > { %10342 = vmatpush3.msra.mxu0 %v13090_v0  ;;  %10372 = vmatpush3.msra.mxu1 %v12965_v36  ;;  %v6258_v0 = vld [vmem:[%s414_s21 + $0x8] sm:$0xff] }
 0x57e   : > { %10343 = vmatprep.subr.mxu0 %v13100_v51  ;;  %10373 = vmatprep.subr.mxu1 %v12979_v29 }
 0x57f   : > { %10344 = vmatpush3.msra.mxu0 %v13100_v51  ;;  %10374 = vmatpush3.msra.mxu1 %v12979_v29  ;;  %v6259_v51 = vld [vmem:[%s414_s21 + $0x10] sm:$0xff]  ;;  %v6464_v29 = vsub.f32 %v13312_v5, %v13323_v55 }
 0x580   : > { %10345 = vmatprep.subr.mxu0 %v13107_v52  ;;  %10375 = vmatprep.subr.mxu1 %v12995_v12 }
 0x581   : > { %10346 = vmatpush3.msra.mxu0 %v13107_v52  ;;  %10347 = vmatprep.mubr.f32.mxu0 %v14163_v24  ;;  %v6317_v52 = vsel %vm1811_vm0, %v8297_v13, 0  ;;  %v6465_v28 = vand.u32 4294901760, %v6464_v29  ;;  %v6299_v13 = vld [vmem:[%s13703_s8 + $0x10] sm:$0xf] }
 0x582   : > { %10376 = vmatpush3.msra.mxu1 %v12995_v12  ;;  %10348 = vmatmul.mubr.f32.vlgmr.msra.gmra.mxu0 %v13012_v53  ;;  %v13302_v39 = vand.u32 4294901760, %v6317_v52 }
 0x583   : > { %10377 = vmatprep.subr.mxu1 %v13009_v45  ;;  %10350 = vmatprep.mubr.f32.mxu0 %v13127_v54 }
 0x584   : > { %10378 = vmatpush3.msra.mxu1 %v13009_v45  ;;  %10385 = vmatprep.mubr.f32.mxu1 %v14163_v24  ;;  %v13309_v1 = vsub.f32 %v6317_v52, %v13302_v39 }
 0x585   : > { %10379 = vmatprep.subr.mxu1 %v13025_v19  ;;  %6263 = vperm.xlu0 %10616, %v6257_v32  }
 0x586   : > { %10380 = vmatpush3.msra.mxu1 %v13025_v19  ;;  %10351 = vmatmul.mubr.f32.gmra.mxu0 %v13131_v56  ;;  %v13320_v40 = vand.u32 4294901760, %v13309_v1 }
 0x587   : > { %10381 = vmatprep.subr.mxu1 %v13039_v31  ;;  %10617 = vset.pattern.permute.xlu1 %v14164_v14 }
 0x588   : > { %10382 = vmatpush3.msra.mxu1 %v13039_v31  ;;  %6273 = vperm.xlu1 %10617, %v6259_v51   ;;  %v6457_v20 = vsub.f32 %v13309_v1, %v13320_v40 }
 0x589   : > { %10383 = vmatprep.subr.mxu1 %v13056_v17  ;;  %6268 = vperm.xlu0 %10616, %v6258_v0  }
 0x58a   : > { %10384 = vmatpush3.msra.mxu1 %v13056_v17  ;;  %v8295_v17 = vld [vmem:[%s13703_s8 + $0x18] sm:$0xff]  ;;  %10391 = vmatprep.subr.mxu0 %v13302_v39  ;;  %v6458_v3 = vand.u32 4294901760, %v6457_v20 }
 0x58b   : > { %10386 = vmatmul.mubr.f32.vlgmr.msra.gmra.mxu1 %v13012_v53  ;;  %v13306_v43 = vand.u32 4294901760, %v8295_v17  ;;  %10392 = vmatpush3.msra.mxu0 %v13302_v39 }
 0x58c   : > { %10388 = vmatprep.mubr.f32.mxu1 %v13127_v54  ;;  %6278 = vperm.xlu1 %10617, %v6260_v21  }
 0x58d   : > { %v13315_v35 = vsub.f32 %v8295_v17, %v13306_v43  ;;  %10393 = vmatprep.subr.mxu0 %v13304_v34  ;;  %10403 = vmatprep.subr.mxu1 %v6458_v3 }
 0x58e   : > { %10394 = vmatpush3.msra.mxu0 %v13304_v34  ;;  %10404 = vmatpush3.msra.mxu1 %v6458_v3 }
 0x58f   : > { %10389 = vmatmul.mubr.f32.gmra.mxu1 %v13131_v56  ;;  %v13326_v36 = vand.u32 4294901760, %v13315_v35  ;;  %10395 = vmatprep.subr.mxu0 %v13306_v43 }
 0x590   : > { %10396 = vmatpush3.msra.mxu0 %v13306_v43  ;;  %10405 = vmatprep.subr.mxu1 %v6465_v28 }
 0x591   : > { %v6471_v44 = vsub.f32 %v13315_v35, %v13326_v36  ;;  %10415 = vmatprep.subr.mxu0 %v13309_v1  ;;  %10406 = vmatpush3.msra.mxu1 %v6465_v28 }
 0x593   : > { %v6472_v12 = vand.u32 4294901760, %v6471_v44 }
 0x595   : > { %10407 = vmatprep.subr.mxu1 %v6472_v12 }
 0x596   : > { %10408 = vmatpush3.msra.mxu1 %v6472_v12  ;;  %v6933_v12 = vsel %vm1811_vm0, %v6299_v13, 0 }
 0x597   : > { %10427 = vmatprep.subr.mxu1 %v13302_v39 }
 0x5fc   : > { %v10197_v57 = vpop.f32.mrf.mxu0 }
 0x5fe   : > { %v5574_v30 = vpop.f32.mrf.mxu0 }
 0x603   : > { %v10235_v26 = vpop.f32.mrf.mxu1 }
 0x604   : > { %v5762_v42 = vadd.f32 %v10235_v26, %v10197_v57  ;;  %v13368_v26 = vand.u32 4294901760, %v6933_v12 }
 0x605   : > { %v5755_v19 = vpop.f32.mrf.mxu1 }
 0x606   : > { %v5756_v49 = vadd.f32 %v5755_v19, %v5574_v30 }
 0x618   : > { %v10200_v45 = vpop.f32.mrf.mxu0 }
 0x61a   : > { %v5594_v53 = vpop.f32.mrf.mxu0 }
 0x61d   : > { %v10273_v10 = vpop.f32.mrf.mxu0 }
 0x61e   : > { %v5885_v50 = vadd.f32 %v10273_v10, %v5762_v42  ;;  %v6298_v10 = vld [vmem:[%s13703_s8 + $0x8] sm:$0xff] }
 0x61f   : > { %v5877_v23 = vpop.f32.mrf.mxu0  ;;  %v13388_v42 = vand.u32 4294901760, %v6298_v10 }
 0x620   : > { %v10238_v9 = vpop.f32.mrf.mxu1  ;;  %v5878_v62 = vadd.f32 %v5877_v23, %v5756_v49 }
 0x621   : > { %v5774_v18 = vadd.f32 %v10238_v9, %v10200_v45 }
 0x622   : > { %v5767_v31 = vpop.f32.mrf.mxu1 }
 0x623   : > { %v5768_v59 = vadd.f32 %v5767_v31, %v5594_v53 }
 0x624   : > { %v10276_v58 = vpop.f32.mrf.mxu0 }
 0x625   : > { %v5899_v22 = vadd.f32 %v10276_v58, %v5774_v18  ;;  %v6297_v58 = vld [vmem:[%s13703_s8] sm:$0xff] }
 0x626   : > { %v5891_v6 = vpop.f32.mrf.mxu0 }
 0x627   : > { %v5892_v48 = vadd.f32 %v5891_v6, %v5768_v59  ;;  %v6274_v59 = vpop.permute.xlu1 %6273 }
 0x628   : > { %v10311_v11 = vpop.f32.mrf.mxu1 }
 0x629   : > { %v5996_v61 = vadd.f32 %v10311_v11, %v5885_v50  ;;  %v6264_v11 = vpop.permute.xlu0 %6263  ;;  %v13395_v50 = vand.u32 4294901760, %v6297_v58 }
 0x62a   : > { %v5987_v2 = vpop.f32.mrf.mxu1 }
 0x62b   : > { %v5988_v15 = vadd.f32 %v5987_v2, %v5878_v62 }
 0x62e   : > { %v10314_v60 = vpop.f32.mrf.mxu1 }
 0x62f   : > { %v6012_v38 = vadd.f32 %v10314_v60, %v5899_v22  ;;  %v13392_v60 = vsub.f32 %v6933_v12, %v13368_v26 }
 0x630   : > { %v6003_v54 = vpop.f32.mrf.mxu1 }
 0x631   : > { %v6004_v24 = vadd.f32 %v6003_v54, %v5892_v48  ;;  %v13400_v54 = vsub.f32 %v6298_v10, %v13388_v42  ;;  %v13403_v22 = vand.u32 4294901760, %v13392_v60 }
 0x642   : > { %v10349_v41 = vpop.f32.mrf.mxu0 }
 0x643   : > { %v6137_v63 = vadd.f32 %v10349_v41, %v5996_v61 }
 0x644   : > { %v6130_v27 = vpop.f32.mrf.mxu0 }
 0x645   : > { %v6131_v47 = vadd.f32 %v6130_v27, %v5988_v15  ;;  %v6269_v15 = vpop.permute.xlu0 %6268 }
 0x646   : > { %v10352_v56 = vpop.f32.mrf.mxu0 }
 0x647   : > { %v6149_v32 = vadd.f32 %v10352_v56, %v6012_v38  ;;  %v13413_v38 = vand.u32 4294901760, %v13400_v54 }
 0x648   : > { %v6142_v7 = vpop.f32.mrf.mxu0 }
 0x649   : > { %v6143_v52 = vadd.f32 %v6142_v7, %v6004_v24  ;;  %v7073_v7 = vsub.f32 %v13392_v60, %v13403_v22 }
 0x64b   : > { %v10387_v37 = vpop.f32.mrf.mxu1 }
 0x64c   : > { %v13340_v8 = vadd.f32 %v10387_v37, %v6137_v63  ;;  %v13407_v37 = vsub.f32 %v6297_v58, %v13395_v50 }
 0x64d   : > { %v6235_v4 = vpop.f32.mrf.mxu1 }
 0x64e   : > { %v6308_v51 = vsel %vm4266_vm3, %v13340_v8, 0  ;;  %v6236_v0 = vadd.f32 %v6235_v4, %v6131_v47  ;;  %v6282_v47 = vmul.f32 %v6269_v15, %v13340_v8  ;;  %v6279_v4 = vpop.permute.xlu1 %6278  ;;  %v7080_v8 = vsub.f32 %v13400_v54, %v13413_v38 }
 0x64f   : > { %v13344_v14 = vand.u32 4294901760, %v6308_v51  ;;  %v10390_v21 = vpop.f32.mrf.mxu1 }
 0x650   : > { %v6305_v25 = vsel %vm4266_vm3, %v6236_v0, 0  ;;  %v13350_v17 = vadd.f32 %v10390_v21, %v6149_v32  ;;  %v6281_v56 = vmul.f32 %v6264_v11, %v6236_v0  ;;  %v6924_v32 = vsel %vm4266_vm3, %v6282_v47, 0  ;;  %v14169_v47 = vld [vmem:[#allocation38_spill] sm:$0xff] }
 0x651   : > { %v13353_v20 = vsub.f32 %v6308_v51, %v13344_v14  ;;  %v13355_v29 = vand.u32 4294901760, %v6305_v25  ;;  %v6247_v44 = vpop.f32.mrf.mxu1  ;;  %v13441_v13 = vand.u32 4294901760, %v6924_v32 }
 0x652   : > { %v6314_v3 = vsel %vm4266_vm3, %v13350_v17, 0  ;;  %v6248_v28 = vadd.f32 %v6247_v44, %v6143_v52  ;;  %v6284_v51 = vmul.f32 %v6279_v4, %v13350_v17 }
 0x653   : > { %v6399_v57 = vand.u32 4294901760, %v13353_v20  ;;  %v6388_v30 = vsub.f32 %v6305_v25, %v13355_v29  ;;  %10409 = vmatprep.mubr.f32.mxu1 %v13355_v29  ;;  %v13363_v45 = vand.u32 4294901760, %v6314_v3 }
 0x654   : > { %v6311_v53 = vsel %vm4266_vm3, %v6248_v28, 0  ;;  %10410 = vmatmul.mubr.f32.vlgmr.msra.gmra.mxu1 %v13344_v14  ;;  %v6283_v24 = vmul.f32 %v6274_v59, %v6248_v28  ;;  %v14165_v59 = vmax.f32 %v12861_v33, %v12873_v46 }
 0x655   : > { %10428 = vmatpush3.msra.mxu1 %v13302_v39  ;;  %v13374_v19 = vsub.f32 %v6314_v3, %v13363_v45  ;;  %v13376_v9 = vand.u32 4294901760, %v6311_v53  ;;  %v6389_v23 = vand.u32 4294901760, %v6388_v30  ;;  %v6400_v31 = vsub.f32 %v13353_v20, %v6399_v57 }
 0x656   : > { %10429 = vmatprep.subr.mxu1 %v13304_v34  ;;  %v6927_v0 = vsel %vm4266_vm3, %v6283_v24, 0  ;;  %v14171_v24 = vld [vmem:[#allocation27_spill] sm:$0xff] }
 0x657   : > { %10430 = vmatpush3.msra.mxu1 %v13304_v34  ;;  %v6419_v6 = vand.u32 4294901760, %v13374_v19  ;;  %v6408_v2 = vsub.f32 %v6311_v53, %v13376_v9  ;;  %10412 = vmatprep.mubr.f32.mxu1 %v13376_v9  ;;  %v6390_v41 = vsub.f32 %v6388_v30, %v6389_v23  ;;  %v6401_v18 = vand.u32 4294901760, %v6400_v31 }
 0x658   : > { %10431 = vmatprep.subr.mxu1 %v13306_v43  ;;  %10413 = vmatmul.mubr.f32.gmra.mxu1 %v13363_v45  ;;  %v13449_v25 = vand.u32 4294901760, %v6927_v0 }
 0x659   : > { %10433 = vmatprep.mubr.f32.mxu1 %v6389_v23  ;;  %v6391_v27 = vand.u32 4294901760, %v6390_v41  ;;  %10432 = vmatpush3.msra.mxu1 %v13306_v43  ;;  %v6409_v49 = vand.u32 4294901760, %v6408_v2  ;;  %v6420_v62 = vsub.f32 %v13374_v19, %v6419_v6  ;;  %v8298_v23 = vld [vmem:[%s13703_s8 + $0x30] sm:$0xff] }
 0x65a   : > { %10451 = vmatprep.subr.mxu1 %v13302_v39  ;;  %v13463_v3 = vsub.f32 %v6927_v0, %v13449_v25 }
 0x65b   : > { %10397 = vmatprep.mubr.f32.mxu0 %v6391_v27  ;;  %v6410_v61 = vsub.f32 %v6408_v2, %v6409_v49  ;;  %v6421_v48 = vand.u32 4294901760, %v6420_v62 }
 0x65c   : > { %10398 = vmatmul.mubr.f32.vlgmr.msra.gmra.mxu0 %v6401_v18  ;;  %10434 = vmatmul.mubr.f32.vlgmr.msra.gmra.mxu1 %v6399_v57 }
 0x65d   : > { %10416 = vmatpush3.msra.mxu0 %v13309_v1  ;;  %10436 = vmatprep.mubr.f32.mxu1 %v6409_v49  ;;  %v6411_v63 = vand.u32 4294901760, %v6410_v61  ;;  %v6921_v1 = vsel %vm4266_vm3, %v6281_v56, 0  ;;  %v7541_v61 = vsel %vm4266_vm3, %v14165_v59, 0 }
 0x65e   : > { %10417 = vmatprep.subr.mxu0 %v13312_v5  ;;  %10452 = vmatpush3.msra.mxu1 %v13302_v39  ;;  %v13421_v39 = vand.u32 4294901760, %v13407_v37  ;;  %v13550_v46 = vand.u32 4294901760, %v7541_v61 }
 0x65f   : > { %10400 = vmatprep.mubr.f32.mxu0 %v6411_v63  ;;  %10418 = vmatpush3.msra.mxu0 %v13312_v5  ;;  %v13425_v5 = vand.u32 4294901760, %v6921_v1 }
 0x660   : > { %10401 = vmatmul.mubr.f32.gmra.mxu0 %v6421_v48  ;;  %10437 = vmatmul.mubr.f32.gmra.mxu1 %v6419_v6  ;;  %v7087_v21 = vsub.f32 %v13407_v37, %v13421_v39  ;;  %v13511_v6 = vand.u32 4294901760, %v8298_v23  ;;  %v14168_v48 = vld [vmem:[#allocation71_spill] sm:$0xff] }
 0x661   : > { %10453 = vmatprep.subr.mxu1 %v13304_v34  ;;  %10421 = vmatprep.mubr.f32.mxu0 %v6388_v30  ;;  %v13444_v52 = vsub.f32 %v6921_v1, %v13425_v5  ;;  %v8299_v30 = vld [vmem:[%s13703_s8 + $0x38] sm:$0xff]  ;;  %v14170_v1 = vmax.f32 %v14168_v48, %v14169_v47 }
 0x662   : > { %10454 = vmatpush3.msra.mxu1 %v13304_v34  ;;  %10457 = vmatprep.mubr.f32.mxu1 %v13355_v29  ;;  %v7074_v34 = vand.u32 4294901760, %v7073_v7  ;;  %v7088_v17 = vand.u32 4294901760, %v7087_v21  ;;  %v13502_v31 = vand.u32 4294901760, %v8299_v30  ;;  %v13524_v18 = vsub.f32 %v8298_v23, %v13511_v6 }
 0x663   : > { %10419 = vmatprep.subr.mxu0 %v13315_v35  ;;  %10455 = vmatprep.subr.mxu1 %v13306_v43  ;;  %v7005_v44 = vand.u32 4294901760, %v13444_v52  ;;  %v7547_v7 = vsel %vm4266_vm3, %v14170_v1, 0 }
 0x664   : > { %10420 = vmatpush3.msra.mxu0 %v13315_v35  ;;  %10456 = vmatpush3.msra.mxu1 %v13306_v43  ;;  %v7081_v43 = vand.u32 4294901760, %v7080_v8  ;;  %v6930_v35 = vsel %vm4266_vm3, %v6284_v51, 0  ;;  %v13517_v41 = vsub.f32 %v8299_v30, %v13502_v31  ;;  %v13576_v4 = vand.u32 4294901760, %v7547_v7  ;;  %v14172_v8 = vld [vmem:[#allocation74_spill] sm:$0xff] }
 0x665   : > { %10422 = vmatmul.mubr.f32.vlgmr.msra.gmra.mxu0 %v13353_v20  ;;  %10439 = vmatprep.subr.mxu0 %v13320_v40  ;;  %v13458_v20 = vand.u32 4294901760, %v6930_v35  ;;  %v7006_v12 = vsub.f32 %v13444_v52, %v7005_v44 }
 0x666   : > { %10458 = vmatmul.mubr.f32.vlgmr.msra.gmra.mxu1 %v13344_v14  ;;  %10424 = vmatprep.mubr.f32.mxu0 %v6408_v2  ;;  %v13530_v62 = vand.u32 4294901760, %v13517_v41 }
 0x667   : > { %10440 = vmatpush3.msra.mxu0 %v13320_v40  ;;  %10460 = vmatprep.mubr.f32.mxu1 %v13376_v9  ;;  %v13456_v40 = vsub.f32 %v6924_v32, %v13441_v13  ;;  %v13473_v28 = vsub.f32 %v6930_v35, %v13458_v20  ;;  %v14173_v32 = vmax.f32 %v14171_v24, %v14172_v8 }
 0x668   : > { %10475 = vmatprep.subr.mxu1 %v7074_v34  ;;  %10441 = vmatprep.subr.mxu0 %v13323_v55  ;;  %v7700_v33 = vsub.f32 %v13517_v41, %v13530_v62 }
 0x669   : > { %10476 = vmatpush3.msra.mxu1 %v7074_v34  ;;  %10425 = vmatmul.mubr.f32.gmra.mxu0 %v13374_v19  ;;  %v7035_v10 = vand.u32 4294901760, %v13473_v28  ;;  %v7007_v19 = vand.u32 4294901760, %v7006_v12  ;;  %v7550_v51 = vsel %vm4266_vm3, %v14173_v32, 0 }
 0x66a   : > { %10442 = vmatpush3.msra.mxu0 %v13323_v55  ;;  %10461 = vmatmul.mubr.f32.gmra.mxu1 %v13363_v45  ;;  %v8300_v55 = vld [vmem:[%s13703_s8 + $0x40] sm:$0xf]  ;;  %v13589_v0 = vand.u32 4294901760, %v7550_v51 }
 0x66b   : > { %10477 = vmatprep.subr.mxu1 %v7081_v43  ;;  %10445 = vmatprep.mubr.f32.mxu0 %v13355_v29  ;;  %v7015_v29 = vand.u32 4294901760, %v13456_v40  ;;  %v7553_v57 = vsel %vm1811_vm0, %v8300_v55, 0  ;;  %v7036_v11 = vsub.f32 %v13473_v28, %v7035_v10 }
 0x66c   : > { %10478 = vmatpush3.msra.mxu1 %v7081_v43  ;;  %10481 = vmatprep.mubr.f32.mxu1 %v13425_v5 }
 0x66d   : > { %10443 = vmatprep.subr.mxu0 %v13326_v36  ;;  %10479 = vmatprep.subr.mxu1 %v7088_v17  ;;  %v7016_v53 = vsub.f32 %v13456_v40, %v7015_v29  ;;  %v7037_v49 = vand.u32 4294901760, %v7036_v11 }
 0x66e   : > { %10444 = vmatpush3.msra.mxu0 %v13326_v36  ;;  %10480 = vmatpush3.msra.mxu1 %v7088_v17  ;;  %v7025_v36 = vand.u32 4294901760, %v13463_v3 }
 0x66f   : > { %10446 = vmatmul.mubr.f32.vlgmr.msra.gmra.mxu0 %v13344_v14  ;;  %10463 = vmatprep.subr.mxu0 %v13368_v26  ;;  %v13486_v14 = vand.u32 4294901760, %v7553_v57  ;;  %v7017_v58 = vand.u32 4294901760, %v7016_v53 }
 0x670   : > { %10482 = vmatmul.mubr.f32.vlgmr.msra.gmra.mxu1 %v13441_v13  ;;  %10448 = vmatprep.mubr.f32.mxu0 %v13376_v9  ;;  %v7026_v9 = vsub.f32 %v13463_v3, %v7025_v36 }
 0x671   : > { %10464 = vmatpush3.msra.mxu0 %v13368_v26  ;;  %10484 = vmatprep.mubr.f32.mxu1 %v13449_v25 }
 0x672   : > { %10499 = vmatprep.subr.mxu1 %v13368_v26  ;;  %10465 = vmatprep.subr.mxu0 %v13388_v42  ;;  %v7027_v2 = vand.u32 4294901760, %v7026_v9 }
 0x673   : > { %10500 = vmatpush3.msra.mxu1 %v13368_v26  ;;  %10449 = vmatmul.mubr.f32.gmra.mxu0 %v13363_v45  ;;  %v13506_v45 = vsub.f32 %v7553_v57, %v13486_v14 }
 0x674   : > { %10466 = vmatpush3.msra.mxu0 %v13388_v42  ;;  %10485 = vmatmul.mubr.f32.gmra.mxu1 %v13458_v20 }
 0x675   : > { %10501 = vmatprep.subr.mxu1 %v13388_v42  ;;  %10469 = vmatprep.mubr.f32.mxu0 %v7007_v19  ;;  %v13520_v27 = vand.u32 4294901760, %v13506_v45 }
 0x676   : > { %10502 = vmatpush3.msra.mxu1 %v13388_v42  ;;  %10505 = vmatprep.mubr.f32.mxu1 %v7005_v44 }
 0x677   : > { %10467 = vmatprep.subr.mxu0 %v13395_v50  ;;  %10503 = vmatprep.subr.mxu1 %v13395_v50 }
 0x678   : > { %10468 = vmatpush3.msra.mxu0 %v13395_v50  ;;  %10504 = vmatpush3.msra.mxu1 %v13395_v50 }
 0x679   : > { %10470 = vmatmul.mubr.f32.vlgmr.msra.gmra.mxu0 %v7017_v58  ;;  %10487 = vmatprep.subr.mxu0 %v13392_v60 }
 0x67a   : > { %10506 = vmatmul.mubr.f32.vlgmr.msra.gmra.mxu1 %v7015_v29  ;;  %10472 = vmatprep.mubr.f32.mxu0 %v7027_v2 }
 0x67b   : > { %10488 = vmatpush3.msra.mxu0 %v13392_v60  ;;  %10508 = vmatprep.mubr.f32.mxu1 %v7025_v36  ;;  %v7693_v60 = vsub.f32 %v13506_v45, %v13520_v27 }
 0x67c   : > { %10523 = vmatprep.subr.mxu1 %v13368_v26  ;;  %10489 = vmatprep.subr.mxu0 %v13400_v54 }
 0x67d   : > { %10524 = vmatpush3.msra.mxu1 %v13368_v26  ;;  %10473 = vmatmul.mubr.f32.gmra.mxu0 %v7037_v49  ;;  %v13542_v26 = vand.u32 4294901760, %v13524_v18 }
 0x67e   : > { %10490 = vmatpush3.msra.mxu0 %v13400_v54  ;;  %10509 = vmatmul.mubr.f32.gmra.mxu1 %v7035_v10  ;;  %v14166_v54 = vld [vmem:[#allocation34_spill] sm:$0xff] }
 0x67f   : > { %10525 = vmatprep.subr.mxu1 %v13388_v42  ;;  %10493 = vmatprep.mubr.f32.mxu0 %v13444_v52  ;;  %v14167_v56 = vmax.f32 %v12854_v16, %v14166_v54  ;;  %v7707_v63 = vsub.f32 %v13524_v18, %v13542_v26  ;;  %v7644_v52 = vsub.f32 %v7547_v7, %v13576_v4 }
 0x680   : > { %10526 = vmatpush3.msra.mxu1 %v13388_v42  ;;  %10529 = vmatprep.mubr.f32.mxu1 %v13425_v5  ;;  %v7694_v42 = vand.u32 4294901760, %v7693_v60 }
 0x681   : > { %10491 = vmatprep.subr.mxu0 %v13407_v37  ;;  %10527 = vmatprep.subr.mxu1 %v13395_v50  ;;  %v7544_v15 = vsel %vm4266_vm3, %v14167_v56, 0  ;;  %v7645_v35 = vand.u32 4294901760, %v7644_v52 }
 0x682   : > { %10492 = vmatpush3.msra.mxu0 %v13407_v37  ;;  %10528 = vmatpush3.msra.mxu1 %v13395_v50  ;;  %v13568_v16 = vand.u32 4294901760, %v7544_v15  ;;  %v7701_v50 = vand.u32 4294901760, %v7700_v33  ;;  %v13573_v37 = vsub.f32 %v7541_v61, %v13550_v46 }
 0x683   : > { %10494 = vmatmul.mubr.f32.vlgmr.msra.gmra.mxu0 %v13456_v40  ;;  %10511 = vmatprep.subr.mxu0 %v13403_v22 }
 0x684   : > { %10530 = vmatmul.mubr.f32.vlgmr.msra.gmra.mxu1 %v13441_v13  ;;  %10496 = vmatprep.mubr.f32.mxu0 %v13463_v3  ;;  %v13586_v34 = vsub.f32 %v7544_v15, %v13568_v16  ;;  %v7625_v21 = vand.u32 4294901760, %v13573_v37 }
 0x685   : > { %10512 = vmatpush3.msra.mxu0 %v13403_v22  ;;  %10532 = vmatprep.mubr.f32.mxu1 %v13449_v25  ;;  %v7708_v22 = vand.u32 4294901760, %v7707_v63 }
 0x686   : > { %10547 = vmatprep.subr.mxu1 %v7694_v42  ;;  %10513 = vmatprep.subr.mxu0 %v13413_v38  ;;  %v7626_v43 = vsub.f32 %v13573_v37, %v7625_v21 }
 0x687   : > { %10548 = vmatpush3.msra.mxu1 %v7694_v42  ;;  %10497 = vmatmul.mubr.f32.gmra.mxu0 %v13473_v28 }
 0x688   : > { %10514 = vmatpush3.msra.mxu0 %v13413_v38  ;;  %10533 = vmatmul.mubr.f32.gmra.mxu1 %v13458_v20  ;;  %v7635_v38 = vand.u32 4294901760, %v13586_v34 }
 0x689   : > { %10549 = vmatprep.subr.mxu1 %v7701_v50  ;;  %10517 = vmatprep.mubr.f32.mxu0 %v13425_v5  ;;  %v7654_v5 = vsub.f32 %v7550_v51, %v13589_v0 }
 0x68a   : > { %10550 = vmatpush3.msra.mxu1 %v7701_v50  ;;  %10553 = vmatprep.mubr.f32.mxu1 %v13550_v46 }
 0x68b   : > { %10515 = vmatprep.subr.mxu0 %v13421_v39  ;;  %10551 = vmatprep.subr.mxu1 %v7708_v22  ;;  %v7655_v17 = vand.u32 4294901760, %v7654_v5 }
 0x68c   : > { %10516 = vmatpush3.msra.mxu0 %v13421_v39  ;;  %10552 = vmatpush3.msra.mxu1 %v7708_v22  ;;  %v7636_v39 = vsub.f32 %v13586_v34, %v7635_v38 }
 0x68d   : > { %10518 = vmatmul.mubr.f32.vlgmr.msra.gmra.mxu0 %v13441_v13  ;;  %10535 = vmatprep.subr.mxu0 %v13486_v14  ;;  %v7627_v13 = vand.u32 4294901760, %v7626_v43  ;;  %v7656_v44 = vsub.f32 %v7654_v5, %v7655_v17 }
 0x68e   : > { %10554 = vmatmul.mubr.f32.vlgmr.msra.gmra.mxu1 %v13568_v16  ;;  %10520 = vmatprep.mubr.f32.mxu0 %v13449_v25  ;;  %v7646_v25 = vsub.f32 %v7644_v52, %v7645_v35  ;;  %v7637_v40 = vand.u32 4294901760, %v7636_v39 }
 0x68f   : > { %10536 = vmatpush3.msra.mxu0 %v13486_v14  ;;  %10556 = vmatprep.mubr.f32.mxu1 %v13576_v4  ;;  %v7657_v3 = vand.u32 4294901760, %v7656_v44 }
 0x690   : > { %10571 = vmatprep.subr.mxu1 %v13486_v14  ;;  %10537 = vmatprep.subr.mxu0 %v13502_v31 }
 0x691   : > { %10572 = vmatpush3.msra.mxu1 %v13486_v14  ;;  %10521 = vmatmul.mubr.f32.gmra.mxu0 %v13458_v20  ;;  %v7647_v20 = vand.u32 4294901760, %v7646_v25 }
 0x692   : > { %10538 = vmatpush3.msra.mxu0 %v13502_v31  ;;  %10557 = vmatmul.mubr.f32.gmra.mxu1 %v13589_v0 }
 0x693   : > { %10573 = vmatprep.subr.mxu1 %v13502_v31  ;;  %10541 = vmatprep.mubr.f32.mxu0 %v7627_v13 }
 0x694   : > { %10574 = vmatpush3.msra.mxu1 %v13502_v31  ;;  %10577 = vmatprep.mubr.f32.mxu1 %v7625_v21 }
 0x695   : > { %10539 = vmatprep.subr.mxu0 %v13511_v6  ;;  %10575 = vmatprep.subr.mxu1 %v13511_v6 }
 0x696   : > { %10540 = vmatpush3.msra.mxu0 %v13511_v6  ;;  %10576 = vmatpush3.msra.mxu1 %v13511_v6 }
 0x697   : > { %10542 = vmatmul.mubr.f32.vlgmr.msra.gmra.mxu0 %v7637_v40  ;;  %10559 = vmatprep.subr.mxu0 %v13506_v45 }
 0x698   : > { %10578 = vmatmul.mubr.f32.vlgmr.msra.gmra.mxu1 %v7635_v38  ;;  %10544 = vmatprep.mubr.f32.mxu0 %v7647_v20 }
 0x699   : > { %10560 = vmatpush3.msra.mxu0 %v13506_v45  ;;  %10580 = vmatprep.mubr.f32.mxu1 %v7645_v35 }
 0x69a   : > { %10595 = vmatprep.subr.mxu1 %v13486_v14  ;;  %10561 = vmatprep.subr.mxu0 %v13517_v41 }
 0x69b   : > { %10596 = vmatpush3.msra.mxu1 %v13486_v14  ;;  %10545 = vmatmul.mubr.f32.gmra.mxu0 %v7657_v3 }
 0x69c   : > { %10562 = vmatpush3.msra.mxu0 %v13517_v41  ;;  %10581 = vmatmul.mubr.f32.gmra.mxu1 %v7655_v17 }
 0x69d   : > { %10597 = vmatprep.subr.mxu1 %v13502_v31  ;;  %10565 = vmatprep.mubr.f32.mxu0 %v13573_v37 }
 0x69e   : > { %10598 = vmatpush3.msra.mxu1 %v13502_v31  ;;  %10601 = vmatprep.mubr.f32.mxu1 %v13550_v46 }
 0x69f   : > { %10563 = vmatprep.subr.mxu0 %v13524_v18  ;;  %10599 = vmatprep.subr.mxu1 %v13511_v6 }
 0x6a0   : > { %10564 = vmatpush3.msra.mxu0 %v13524_v18  ;;  %10600 = vmatpush3.msra.mxu1 %v13511_v6 }
 0x6a1   : > { %10566 = vmatmul.mubr.f32.vlgmr.msra.gmra.mxu0 %v13586_v34  ;;  %10583 = vmatprep.subr.mxu0 %v13520_v27 }
 0x6a2   : > { %10602 = vmatmul.mubr.f32.vlgmr.msra.gmra.mxu1 %v13568_v16  ;;  %10568 = vmatprep.mubr.f32.mxu0 %v7644_v52 }
 0x6a3   : > { %10584 = vmatpush3.msra.mxu0 %v13520_v27  ;;  %10604 = vmatprep.mubr.f32.mxu1 %v13576_v4 }
 0x6a4   : > { %10585 = vmatprep.subr.mxu0 %v13530_v62 }
 0x6a5   : > { %10569 = vmatmul.mubr.f32.gmra.mxu0 %v7654_v5 }
 0x6a6   : > { %10586 = vmatpush3.msra.mxu0 %v13530_v62  ;;  %10605 = vmatmul.mubr.f32.gmra.mxu1 %v13589_v0 }
 0x6a7   : > { %10589 = vmatprep.mubr.f32.mxu0 %v13550_v46  ;;  %10587 = vmatprep.subr.mxu0 %v13542_v26 }
 0x6a8   : > { %10588 = vmatpush3.msra.mxu0 %v13542_v26 }
 0x6a9   : > { %10590 = vmatmul.mubr.f32.vlgmr.msra.gmra.mxu0 %v13568_v16 }
 0x6aa   : > { %10592 = vmatprep.mubr.f32.mxu0 %v13576_v4 }
 0x6ad   : > { %10593 = vmatmul.mubr.f32.gmra.mxu0 %v13589_v0 }
 0x714   : > { %v10411_v55 = vpop.f32.mrf.mxu1 }
 0x716   : > { %v6509_v29 = vpop.f32.mrf.mxu1 }
 0x718   : > { %v10414_v28 = vpop.f32.mrf.mxu1 }
 0x71a   : > { %v6521_v12 = vpop.f32.mrf.mxu1 }
 0x71c   : > { %v10399_v57 = vpop.f32.mrf.mxu0  ;;  %v10435_v36 = vpop.f32.mrf.mxu1 }
 0x71d   : > { %v6516_v32 = vadd.f32 %v10411_v55, %v10399_v57 }
 0x71e   : > { %v6393_v14 = vpop.f32.mrf.mxu0  ;;  %v6702_v30 = vpop.f32.mrf.mxu1 }
 0x71f   : > { %v6510_v22 = vadd.f32 %v6509_v29, %v6393_v14 }
 0x720   : > { %v10402_v53 = vpop.f32.mrf.mxu0  ;;  %v10438_v10 = vpop.f32.mrf.mxu1 }
 0x721   : > { %v6528_v52 = vadd.f32 %v10414_v28, %v10402_v53 }
 0x722   : > { %v6413_v19 = vpop.f32.mrf.mxu0  ;;  %v6718_v9 = vpop.f32.mrf.mxu1 }
 0x723   : > { %v6522_v25 = vadd.f32 %v6521_v12, %v6413_v19 }
 0x725   : > { %v10423_v23 = vpop.f32.mrf.mxu0 }
 0x726   : > { %v10459_v31 = vpop.f32.mrf.mxu1  ;;  %v6613_v0 = vadd.f32 %v10423_v23, %v6516_v32 }
 0x727   : > { %v6605_v45 = vpop.f32.mrf.mxu0 }
 0x728   : > { %v6898_v58 = vpop.f32.mrf.mxu1  ;;  %v6606_v38 = vadd.f32 %v6605_v45, %v6510_v22  ;;  %v6711_v13 = vadd.f32 %v10435_v36, %v6613_v0 }
 0x729   : > { %v10426_v11 = vpop.f32.mrf.mxu0 }
 0x72a   : > { %v10462_v6 = vpop.f32.mrf.mxu1  ;;  %v6627_v35 = vadd.f32 %v10426_v11, %v6528_v52  ;;  %v6703_v40 = vadd.f32 %v6702_v30, %v6606_v38 }
 0x72b   : > { %v6619_v2 = vpop.f32.mrf.mxu0 }
 0x72c   : > { %v13646_v41 = vpop.f32.mrf.mxu1  ;;  %v6620_v20 = vadd.f32 %v6619_v2, %v6522_v25  ;;  %v6727_v55 = vadd.f32 %v10438_v10, %v6627_v35 }
 0x72e   : > { %v6719_v53 = vadd.f32 %v6718_v9, %v6620_v20 }
 0x72f   : > { %v10447_v27 = vpop.f32.mrf.mxu0 }
 0x730   : > { %v10483_v49 = vpop.f32.mrf.mxu1  ;;  %v6813_v44 = vadd.f32 %v10447_v27, %v6711_v13 }
 0x731   : > { %v6806_v18 = vpop.f32.mrf.mxu0 }
 0x732   : > { %v7125_v62 = vpop.f32.mrf.mxu1  ;;  %v6807_v3 = vadd.f32 %v6806_v18, %v6703_v40  ;;  %v6905_v32 = vadd.f32 %v10459_v31, %v6813_v44 }
 0x733   : > { %v10450_v60 = vpop.f32.mrf.mxu0 }
 0x734   : > { %v13648_v59 = vpop.f32.mrf.mxu1  ;;  %v6825_v14 = vadd.f32 %v10450_v60, %v6727_v55  ;;  %v6899_v45 = vadd.f32 %v6898_v58, %v6807_v3 }
 0x735   : > { %v6818_v61 = vpop.f32.mrf.mxu0 }
 0x736   : > { %v13650_v26 = vpop.f32.mrf.mxu1  ;;  %v6819_v52 = vadd.f32 %v6818_v61, %v6719_v53  ;;  %v6917_v36 = vadd.f32 %v10462_v6, %v6825_v14 }
 0x738   : > { %v6911_v2 = vadd.f32 %v13646_v41, %v6819_v52 }
 0x739   : > { %v10471_v33 = vpop.f32.mrf.mxu0 }
 0x73a   : > { %v13652_v46 = vpop.f32.mrf.mxu1  ;;  %v7020_v11 = vadd.f32 %v10471_v33, %v6905_v32 }
 0x73b   : > { %v7009_v54 = vpop.f32.mrf.mxu0 }
 0x73c   : > { %v13654_v56 = vpop.f32.mrf.mxu1  ;;  %v7132_v19 = vadd.f32 %v10483_v49, %v7020_v11 }
 0x73d   : > { %v10474_v15 = vpop.f32.mrf.mxu0 }
 0x73e   : > { %v13656_v42 = vpop.f32.mrf.mxu1  ;;  %v7040_v30 = vadd.f32 %v10474_v15, %v6917_v36 }
 0x73f   : > { %v7029_v63 = vpop.f32.mrf.mxu0 }
 0x740   : > { %v13658_v48 = vpop.f32.mrf.mxu1  ;;  %v7030_v31 = vadd.f32 %v7029_v63, %v6911_v2  ;;  %v7144_v9 = vadd.f32 %v13648_v59, %v7040_v30 }
 0x742   : > { %v7138_v41 = vadd.f32 %v13650_v26, %v7030_v31 }
 0x743   : > { %v10495_v47 = vpop.f32.mrf.mxu0 }
 0x744   : > { %v13660_v1 = vpop.f32.mrf.mxu1  ;;  %v7229_v18 = vadd.f32 %v10495_v47, %v7132_v19 }
 0x745   : > { %v7221_v7 = vpop.f32.mrf.mxu0 }
 0x746   : > { %v13662_v16 = vpop.f32.mrf.mxu1  ;;  %v7327_v13 = vadd.f32 %v13652_v46, %v7229_v18 }
 0x747   : > { %v10498_v50 = vpop.f32.mrf.mxu0 }
 0x748   : > { %v13664_v37 = vpop.f32.mrf.mxu1 }
 0x749   : > { %v13666_v4 = vpop.f32.mrf.mxu0 }
 0x74a   : > { %v13668_v24 = vpop.f32.mrf.mxu1  ;;  %v7236_v59 = vadd.f32 %v13666_v4, %v7138_v41 }
 0x74b   : > { %14174 = vst [vmem:[#allocation77_spill] sm:$0xff] %v13668_v24  ;;  %v7010_v24 = vadd.f32 %v7009_v54, %v6899_v45  ;;  %v7243_v54 = vadd.f32 %v10498_v50, %v7144_v9 }
 0x74d   : > { %v10519_v8 = vpop.f32.mrf.mxu0  ;;  %v7126_v10 = vadd.f32 %v7125_v62, %v7010_v24  ;;  %v7343_v50 = vadd.f32 %v13656_v42, %v7243_v54  ;;  %v8301_v42 = vld [vmem:[%s13704_s9] ss:$0 sm:$0xff] }
 0x74e   : > { %v10555_v51 = vpop.f32.mrf.mxu1  ;;  %v7429_v24 = vadd.f32 %v10519_v8, %v7327_v13 }
 0x74f   : > { %v7422_v34 = vpop.f32.mrf.mxu0  ;;  %v7222_v35 = vadd.f32 %v7221_v7, %v7126_v10 }
 0x750   : > { %v7745_v21 = vpop.f32.mrf.mxu1  ;;  %v7521_v26 = vadd.f32 %v13660_v1, %v7429_v24 }
 0x751   : > { %v10522_v5 = vpop.f32.mrf.mxu0  ;;  %v7319_v62 = vadd.f32 %v13654_v56, %v7222_v35 }
 0x752   : > { %v10558_v43 = vpop.f32.mrf.mxu1  ;;  %v7441_v3 = vadd.f32 %v10522_v5, %v7343_v50 }
 0x753   : > { %v13670_v39 = vpop.f32.mrf.mxu0 }
 0x754   : > { %v7757_v17 = vpop.f32.mrf.mxu1  ;;  %v7533_v1 = vadd.f32 %v13664_v37, %v7441_v3 }
 0x757   : > { %v10543_v57 = vpop.f32.mrf.mxu0 }
 0x758   : > { %v10579_v29 = vpop.f32.mrf.mxu1  ;;  %v7752_v60 = vadd.f32 %v10555_v51, %v10543_v57 }
 0x759   : > { %v7629_v23 = vpop.f32.mrf.mxu0 }
 0x75a   : > { %v7938_v28 = vpop.f32.mrf.mxu1  ;;  %v7746_v33 = vadd.f32 %v7745_v21, %v7629_v23  ;;  %v7423_v21 = vadd.f32 %v7422_v34, %v7319_v62 }
 0x75b   : > { %v10546_v22 = vpop.f32.mrf.mxu0 }
 0x75c   : > { %v10582_v12 = vpop.f32.mrf.mxu1  ;;  %v7764_v15 = vadd.f32 %v10558_v43, %v10546_v22 }
 0x75d   : > { %v7649_v0 = vpop.f32.mrf.mxu0 }
 0x75e   : > { %v7954_v38 = vpop.f32.mrf.mxu1  ;;  %v7758_v63 = vadd.f32 %v7757_v17, %v7649_v0  ;;  %v7515_v17 = vadd.f32 %v13662_v16, %v7423_v21 }
 0x761   : > { %v10567_v27 = vpop.f32.mrf.mxu0 }
 0x762   : > { %v7849_v61 = vadd.f32 %v10567_v27, %v7752_v60  ;;  %v10603_v49 = vpop.f32.mrf.mxu1 }
 0x763   : > { %v7841_v58 = vpop.f32.mrf.mxu0 }
 0x764   : > { %v7842_v25 = vadd.f32 %v7841_v58, %v7746_v33  ;;  %v7947_v51 = vadd.f32 %v10579_v29, %v7849_v61  ;;  %v8134_v44 = vpop.f32.mrf.mxu1  ;;  %v7335_v29 = vadd.f32 %v13658_v48, %v7236_v59 }
 0x765   : > { %v10570_v6 = vpop.f32.mrf.mxu0 }
 0x766   : > { %v7863_v7 = vadd.f32 %v10570_v6, %v7764_v15  ;;  %v7939_v20 = vadd.f32 %v7938_v28, %v7842_v25  ;;  %v10606_v34 = vpop.f32.mrf.mxu1  ;;  %v7435_v28 = vadd.f32 %v13670_v39, %v7335_v29 }
 0x767   : > { %v7855_v47 = vpop.f32.mrf.mxu0 }
 0x768   : > { %v7856_v46 = vadd.f32 %v7855_v47, %v7758_v63  ;;  %v7963_v8 = vadd.f32 %v10582_v12, %v7863_v7  ;;  %v8146_v11 = vpop.f32.mrf.mxu1  ;;  %v14175_v12 = vld [vmem:[#allocation77_spill] sm:$0xff] }
 0x769   : > { %v10591_v40 = vpop.f32.mrf.mxu0  ;;  %v7527_v30 = vadd.f32 %v14175_v12, %v7435_v28 }
 0x76a   : > { %v8049_v43 = vadd.f32 %v10591_v40, %v7947_v51  ;;  %v7955_v32 = vadd.f32 %v7954_v38, %v7856_v46 }
 0x76b   : > { %v8042_v55 = vpop.f32.mrf.mxu0 }
 0x76c   : > { %v8141_v56 = vadd.f32 %v10603_v49, %v8049_v43  ;;  %v8043_v57 = vadd.f32 %v8042_v55, %v7939_v20 }
 0x76d   : > { %v10594_v4 = vpop.f32.mrf.mxu0 }
 0x76e   : > { %v8157_v14 = vadd.f32 %v8141_v56, %v7521_v26  ;;  %v8135_v23 = vadd.f32 %v8134_v44, %v8043_v57  ;;  %v8061_v5 = vadd.f32 %v10594_v4, %v7963_v8 }
 0x76f   : > { %v8054_v53 = vpop.f32.mrf.mxu0 }
 0x770   : > { %v8168_v45 = vadd.f32 %v8301_v42, %v8157_v14  ;;  %v8156_v16 = vadd.f32 %v8135_v23, %v7515_v17  ;;  %v8153_v22 = vadd.f32 %v10606_v34, %v8061_v5  ;;  %v8055_v48 = vadd.f32 %v8054_v53, %v7955_v32 }
 0x772   : > { %vm8172_vm0 = vcmp.gt.f32.partialorder %v8168_v45, 0.0  ;;  %v8176_v52 = vmul.f32 0.01, %v8168_v45  ;;  %v8167_v36 = vadd.f32 %v8301_v42, %v8156_v16  ;;  %v8159_v0 = vadd.f32 %v8153_v22, %v7533_v1 }
 0x773   : > { %v8147_v19 = vadd.f32 %v8146_v11, %v8055_v48 }
 0x774   : > { %v8180_v37 = vsel %vm8172_vm0, %v8168_v45, %v8176_v52  ;;  %vm8171_vm3 = vcmp.gt.f32.partialorder %v8167_v36, 0.0  ;;  %v8175_v39 = vmul.f32 0.01, %v8167_v36  ;;  %v8170_v2 = vadd.f32 %v8301_v42, %v8159_v0 }
 0x775   : > { %8184 = vst [vmem:[%s419_s26 + $0x8] sm:$0xff] %v8180_v37  ;;  %v8158_v10 = vadd.f32 %v8147_v19, %v7527_v30 }
 0x776   : > { %v8179_v27 = vsel %vm8171_vm3, %v8167_v36, %v8175_v39  ;;  %vm8174_vm6 = vcmp.gt.f32.partialorder %v8170_v2, 0.0  ;;  %v8178_v18 = vmul.f32 0.01, %v8170_v2 }
 0x777   : > { %8183 = vst [vmem:[%s419_s26] sm:$0xff] %v8179_v27  ;;  %v8169_v60 = vadd.f32 %v8301_v42, %v8158_v10 }
 0x778   : > { %v8182_v38 = vsel %vm8174_vm6, %v8170_v2, %v8178_v18 }
 0x779   : > { %8186 = vst [vmem:[%s419_s26 + $0x18] sm:$0xff] %v8182_v38  ;;  %vm8173_vm7 = vcmp.gt.f32.partialorder %v8169_v60, 0.0  ;;  %v8177_v31 = vmul.f32 0.01, %v8169_v60 }
 0x77b   : > { %v8181_v35 = vsel %vm8173_vm7, %v8169_v60, %v8177_v31 }
 0x77c   : > { %8185 = vst [vmem:[%s419_s26 + $0x10] sm:$0xff] %v8181_v35 }
 0x77d PF: > { %s20_s13 = sadd.s32 1, %s10640_s13  }
 0x77e   : > { %p17_p4 = scmp.ge.s32.totalorder %s20_s13, 4  }
 0x780   :  { %19 = sbr.rel (!%p17_p4) target bundleno = 1 (0x1), region = 101 }

</bundles_post_ra>
